<compile_context>
chip_gen: v7x
topology: tpu7x:2x2x1
jax: 0.10.0
libtpu: 0.0.40
codegen_flags: <defaults>
</compile_context>

<pallas_src>
import jax
import jax.numpy as jnp
import numpy as np
from jax.experimental import pallas as pl
from jax.experimental.pallas import tpu as pltpu


def _cdiv(a, b):
    return -(-a // b)


def _round_up(a, b):
    return _cdiv(a, b) * b


def _make_kernel(h, w, c_in, c_out, chunk, n_chunks, margin):
    """Builds the kernel for static shape parameters."""
    hw = h * w
    k0 = margin  # flat lane position of tap offset 0 inside the scratch
    # Tap order (row-major over dy, dx) must match the wrapper's mask order
    # and the C-order flattening of the OIHW weights.
    offsets = [(dy - 1) * w + (dx - 1) for dy in range(3) for dx in range(3)]

    def kernel(x_ref, w_ref, base_ref, mask_ref, o_ref, pad_ref):
        # x_ref:    (images_per_step, c_in * hw)   VMEM
        # w_ref:    (c_out * c_in * 9,)            SMEM  gain-folded weights
        # base_ref: (chunk, c_out * hw)            VMEM  bias + constant-1 halo
        # mask_ref: (9, chunk, hw)                 VMEM  in-image tap masks
        # o_ref:    (images_per_step, c_out * hw)  VMEM
        # pad_ref:  (chunk, hw + 2 * margin)       VMEM  flat-plane scratch

        # Zero the scratch once per step: the interior is rewritten before
        # every use, the margins only feed masked-out taps but must be finite
        # so that mask * margin == 0.
        pad_ref[...] = jnp.zeros(pad_ref.shape, pad_ref.dtype)

        # Accumulator init value per output channel: bias + constant-1 halo.
        bases = [base_ref[:, co * hw:(co + 1) * hw] for co in range(c_out)]

        def do_chunk(c, carry):
            i0 = pl.multiple_of(c * chunk, chunk)
            accs = [bases[co] for co in range(c_out)]
            for ci in range(c_in):
                plane = x_ref[pl.ds(i0, chunk),
                              pl.ds(ci * hw, hw)].astype(jnp.float32)
                # Stage the flat plane so each tap is a static lane-offset
                # slice (the interior store itself is 128-lane aligned).
                pad_ref[:, k0:k0 + hw] = plane
                for t, off in enumerate(offsets):
                    if off == 0:
                        patch = plane  # centre tap: mask is all ones
                    else:
                        patch = (pad_ref[:, k0 + off:k0 + off + hw]
                                 * mask_ref[t])
                    wb = ci * 9 + t
                    for co in range(c_out):
                        accs[co] = accs[co] + w_ref[co * (c_in * 9) + wb] * patch
            for co in range(c_out):
                o_ref[pl.ds(i0, chunk),
                      pl.ds(co * hw, hw)] = accs[co].astype(o_ref.dtype)
            return carry

        jax.lax.fori_loop(0, n_chunks, do_chunk, 0)

    return kernel


def zero_conv2d_forward(x, weight, bias, scale, *,
                        chunk=8, max_chunks_per_step=32):
    """ZeroConv2d.forward: pad(value=1) -> 3x3 conv (+bias) -> * exp(3*scale).

    Args:
      x:      (N, C_in, H, W)      float32, NCHW.
      weight: (C_out, C_in, 3, 3)  float32 (OIHW).
      bias:   (C_out,)             float32.
      scale:  (1, C_out, 1, 1)     float32.
    Returns:
      (N, C_out, H, W) float32.
    """
    n, c_in, h, w = x.shape
    c_out = weight.shape[0]
    assert weight.shape == (c_out, c_in, 3, 3)
    hw = h * w

    # ---- hoisted parameter preprocessing (tiny, batch independent) ---------
    gain = jnp.exp(3.0 * scale.reshape(c_out).astype(jnp.float32))
    w_eff = weight.astype(jnp.float32) * gain[:, None, None, None]
    b_eff = bias.astype(jnp.float32) * gain
    w_flat = w_eff.reshape(c_out * c_in * 9)

    # Validity mask per tap: mask[t, p] == 1 iff tap t of output pixel p lands
    # inside the unpadded image (static, built with numpy at trace time).
    ys = np.repeat(np.arange(h), w)
    xs = np.tile(np.arange(w), h)
    mask_flat = np.zeros((9, hw), np.float32)
    t = 0
    for dy in range(3):
        for dx in range(3):
            oy, ox = dy - 1, dx - 1
            mask_flat[t] = ((ys + oy >= 0) & (ys + oy < h) &
                            (xs + ox >= 0) & (xs + ox < w)).astype(np.float32)
            t += 1
    masks = jnp.asarray(np.broadcast_to(mask_flat[:, None, :], (9, chunk, hw)))

    # Constant-1 halo folded into a (c_out, hw) base table (+ bias):
    #   conv(pad1(x, 1)) = conv_same_zero(x) + sum over out-of-image taps of w
    w_sum_ci = w_eff.reshape(c_out, c_in, 9).sum(axis=1)            # (c_out, 9)
    halo = w_sum_ci @ (1.0 - jnp.asarray(mask_flat))                # (c_out, hw)
    base = halo + b_eff[:, None]
    base_b = jnp.broadcast_to(base.reshape(1, c_out * hw), (chunk, c_out * hw))

    # ---- batch tiling -------------------------------------------------------
    n_chunks_total = _cdiv(n, chunk)
    num_steps = _cdiv(n_chunks_total, max_chunks_per_step)
    if n_chunks_total >= 2:
        num_steps = max(num_steps, 2)       # let v7x's two TCs both get work
    chunks_per_step = _cdiv(n_chunks_total, num_steps)
    num_steps = _cdiv(n_chunks_total, chunks_per_step)
    ips = chunks_per_step * chunk           # images per grid step
    nb = num_steps * ips

    x2d = x.reshape(n, c_in * hw)           # free reshape (contiguous)
    if nb != n:
        # Pad the batch with zero images (their outputs are sliced off below).
        x2d = jnp.concatenate(
            [x2d, jnp.zeros((nb - n, c_in * hw), x.dtype)], axis=0)

    margin = _round_up(w + 1, 128)          # lane-aligned scratch interior
    kernel = _make_kernel(h, w, c_in, c_out, chunk, chunks_per_step, margin)

    # VMEM per step (f32, double buffered):
    #   2 * (ips*c_in*hw + ips*c_out*hw) * 4 B + base/mask/scratch (tiny)
    #   ~= 4.2 MiB at ips=256, c_in=c_out=4, hw=256 -> fits every generation
    #   (v5e default scoped limit is 16 MiB; v7x physical VMEM is 64 MiB).
    out2d = pl.pallas_call(
        kernel,
        out_shape=jax.ShapeDtypeStruct((nb, c_out * hw), x.dtype),
        grid_spec=pltpu.PrefetchScalarGridSpec(
            num_scalar_prefetch=0,
            grid=(num_steps,),
            in_specs=[
                pl.BlockSpec((ips, c_in * hw), lambda i: (i, 0)),
                pl.BlockSpec(memory_space=pltpu.MemorySpace.SMEM),   # w_flat
                pl.BlockSpec((chunk, c_out * hw), lambda i: (0, 0)),  # base
                pl.BlockSpec((9, chunk, hw), lambda i: (0, 0, 0)),    # masks
            ],
            out_specs=pl.BlockSpec((ips, c_out * hw), lambda i: (i, 0)),
            scratch_shapes=[pltpu.VMEM((chunk, hw + 2 * margin), jnp.float32)],
        ),
        compiler_params=pltpu.CompilerParams(
            dimension_semantics=("parallel",),
            vmem_limit_bytes=32 * 1024 * 1024,
        ),
    )(x2d, w_flat, base_b, masks)

    return out2d[:n].reshape(n, c_out, h, w)


def zero_conv2d_reference(x, weight, bias, scale):
    """Pure-JAX reference matching the PyTorch module."""
    xp = jnp.pad(x, ((0, 0), (0, 0), (1, 1), (1, 1)), constant_values=1.0)
    y = jax.lax.conv_general_dilated(
        xp, weight, window_strides=(1, 1), padding="VALID",
        dimension_numbers=("NCHW", "OIHW", "NCHW"))
    y = y + bias[None, :, None, None]
    return y * jnp.exp(3.0 * scale)


if __name__ == "__main__":
    key = jax.random.PRNGKey(0)
    k_x, k_w, k_b, k_s = jax.random.split(key, 4)

    N, C_IN, C_OUT, H, W = 2, 4, 4, 16, 16
    x = jax.random.normal(k_x, (N, C_IN, H, W), dtype=jnp.float32)

    fwd = jax.jit(zero_conv2d_forward)

    # 1) The module's actual init: weight = bias = scale = 0 -> output == 0.
    w0 = jnp.zeros((C_OUT, C_IN, 3, 3), jnp.float32)
    b0 = jnp.zeros((C_OUT,), jnp.float32)
    s0 = jnp.zeros((1, C_OUT, 1, 1), jnp.float32)
    out0 = jax.block_until_ready(fwd(x, w0, b0, s0))
    assert out0.shape == (N, C_OUT, H, W)
    assert jnp.max(jnp.abs(out0)) < 1e-7

    # 2) Non-trivial deterministic parameters so the check is meaningful.
    weight = 0.1 * jax.random.normal(k_w, (C_OUT, C_IN, 3, 3), dtype=jnp.float32)
    bias = 0.1 * jax.random.normal(k_b, (C_OUT,), dtype=jnp.float32)
    scale = 0.1 * jax.random.normal(k_s, (1, C_OUT, 1, 1), dtype=jnp.float32)

    out = jax.block_until_ready(fwd(x, weight, bias, scale))
    ref = zero_conv2d_reference(x, weight, bias, scale)

    assert out.shape == (N, C_OUT, H, W)
    assert jnp.max(jnp.abs(out - ref)) < 1e-4

    print("KERNEL_OK")
</pallas_src>

<mosaic_0001>
module attributes {stable_mosaic.version = 11 : i64} {
  func.func @kernel(%arg0: i32, %arg1: memref<8x1024xf32, #tpu.memory_space<vmem>>, %arg2: memref<144xf32, #tpu.memory_space<smem>>, %arg3: memref<8x1024xf32, #tpu.memory_space<vmem>>, %arg4: memref<9x8x256xf32, #tpu.memory_space<vmem>>, %arg5: memref<8x1024xf32, #tpu.memory_space<vmem>>, %arg6: memref<8x512xf32, #tpu.memory_space<vmem>>) attributes {dimension_semantics = [#tpu.dimension_semantics<parallel>], iteration_bounds = array<i64: 1>, scalar_prefetch = 0 : i64, scratch_operands = 1 : i64, tpu.core_type = #tpu.core_type<tc>, window_params = [{transform_indices = @transform_0, window_bounds = array<i64: 8, 1024>}, {transform_indices = @transform_1, window_bounds = array<i64: 144>}, {pipeline_mode = #tpu.pipeline_mode<synchronous>, transform_indices = @transform_2, window_bounds = array<i64: 8, 1024>}, {pipeline_mode = #tpu.pipeline_mode<synchronous>, transform_indices = @transform_3, window_bounds = array<i64: 9, 8, 256>}, {transform_indices = @transform_4, window_bounds = array<i64: 8, 1024>}]} {
    %cst = arith.constant 0.000000e+00 : f32
    %0 = vector.broadcast %cst : f32 to vector<8x512xf32>
    %c0 = arith.constant 0 : index
    %c0_0 = arith.constant 0 : index
    %1 = vector.load %arg6[%c0, %c0_0] : memref<8x512xf32, #tpu.memory_space<vmem>>, vector<8x512xf32>
    tpu.vector_store %arg6[%c0, %c0_0], %0 {strides = array<i32>} : memref<8x512xf32, #tpu.memory_space<vmem>>, vector<8x512xf32>,
    %c0_1 = arith.constant 0 : index
    %c0_2 = arith.constant 0 : index
    %2 = vector.load %arg3[%c0_1, %c0_2] : memref<8x1024xf32, #tpu.memory_space<vmem>>, vector<8x256xf32>
    %c0_3 = arith.constant 0 : index
    %c256 = arith.constant 256 : index
    %3 = vector.load %arg3[%c0_3, %c256] : memref<8x1024xf32, #tpu.memory_space<vmem>>, vector<8x256xf32>
    %c0_4 = arith.constant 0 : index
    %c512 = arith.constant 512 : index
    %4 = vector.load %arg3[%c0_4, %c512] : memref<8x1024xf32, #tpu.memory_space<vmem>>, vector<8x256xf32>
    %c0_5 = arith.constant 0 : index
    %c768 = arith.constant 768 : index
    %5 = vector.load %arg3[%c0_5, %c768] : memref<8x1024xf32, #tpu.memory_space<vmem>>, vector<8x256xf32>
    %c0_i32 = arith.constant 0 : i32
    %c8_i32 = arith.constant 8 : i32
    %6 = arith.muli %c0_i32, %c8_i32 : i32
    %7 = tpu.assume_multiple %6, 8 : i32
    %8 = arith.index_cast %7 : i32 to index
    %c0_6 = arith.constant 0 : index
    %9 = vector.load %arg1[%8, %c0_6] : memref<8x1024xf32, #tpu.memory_space<vmem>>, vector<8x256xf32>
    %c0_7 = arith.constant 0 : index
    %c128 = arith.constant 128 : index
    %10 = vector.load %arg6[%c0_7, %c128] : memref<8x512xf32, #tpu.memory_space<vmem>>, vector<8x256xf32>
    tpu.vector_store %arg6[%c0_7, %c128], %9 {strides = array<i32>} : memref<8x512xf32, #tpu.memory_space<vmem>>, vector<8x256xf32>,
    %c0_8 = arith.constant 0 : index
    %c111 = arith.constant 111 : index
    %11 = vector.load %arg6[%c0_8, %c111] : memref<8x512xf32, #tpu.memory_space<vmem>>, vector<8x256xf32>
    %c0_9 = arith.constant 0 : index
    %c0_10 = arith.constant 0 : index
    %c0_11 = arith.constant 0 : index
    %12 = vector.load %arg4[%c0_9, %c0_10, %c0_11] : memref<9x8x256xf32, #tpu.memory_space<vmem>>, vector<1x8x256xf32>
    %13 = vector.shape_cast %12 : vector<1x8x256xf32> to vector<8x256xf32>
    %14 = arith.mulf %11, %13 : vector<8x256xf32>
    %c0_12 = arith.constant 0 : index
    %15 = memref.load %arg2[%c0_12] : memref<144xf32, #tpu.memory_space<smem>>
    %16 = vector.broadcast %15 : f32 to vector<8x256xf32>
    %17 = arith.mulf %16, %14 : vector<8x256xf32>
    %18 = arith.addf %2, %17 : vector<8x256xf32>
    %c36 = arith.constant 36 : index
    %19 = memref.load %arg2[%c36] : memref<144xf32, #tpu.memory_space<smem>>
    %20 = vector.broadcast %19 : f32 to vector<8x256xf32>
    %21 = arith.mulf %20, %14 : vector<8x256xf32>
    %22 = arith.addf %3, %21 : vector<8x256xf32>
    %c72 = arith.constant 72 : index
    %23 = memref.load %arg2[%c72] : memref<144xf32, #tpu.memory_space<smem>>
    %24 = vector.broadcast %23 : f32 to vector<8x256xf32>
    %25 = arith.mulf %24, %14 : vector<8x256xf32>
    %26 = arith.addf %4, %25 : vector<8x256xf32>
    %c108 = arith.constant 108 : index
    %27 = memref.load %arg2[%c108] : memref<144xf32, #tpu.memory_space<smem>>
    %28 = vector.broadcast %27 : f32 to vector<8x256xf32>
    %29 = arith.mulf %28, %14 : vector<8x256xf32>
    %30 = arith.addf %5, %29 : vector<8x256xf32>
    %c0_13 = arith.constant 0 : index
    %c112 = arith.constant 112 : index
    %31 = vector.load %arg6[%c0_13, %c112] : memref<8x512xf32, #tpu.memory_space<vmem>>, vector<8x256xf32>
    %c1 = arith.constant 1 : index
    %c0_14 = arith.constant 0 : index
    %c0_15 = arith.constant 0 : index
    %32 = vector.load %arg4[%c1, %c0_14, %c0_15] : memref<9x8x256xf32, #tpu.memory_space<vmem>>, vector<1x8x256xf32>
    %33 = vector.shape_cast %32 : vector<1x8x256xf32> to vector<8x256xf32>
    %34 = arith.mulf %31, %33 : vector<8x256xf32>
    %c1_16 = arith.constant 1 : index
    %35 = memref.load %arg2[%c1_16] : memref<144xf32, #tpu.memory_space<smem>>
    %36 = vector.broadcast %35 : f32 to vector<8x256xf32>
    %37 = arith.mulf %36, %34 : vector<8x256xf32>
    %38 = arith.addf %18, %37 : vector<8x256xf32>
    %c37 = arith.constant 37 : index
    %39 = memref.load %arg2[%c37] : memref<144xf32, #tpu.memory_space<smem>>
    %40 = vector.broadcast %39 : f32 to vector<8x256xf32>
    %41 = arith.mulf %40, %34 : vector<8x256xf32>
    %42 = arith.addf %22, %41 : vector<8x256xf32>
    %c73 = arith.constant 73 : index
    %43 = memref.load %arg2[%c73] : memref<144xf32, #tpu.memory_space<smem>>
    %44 = vector.broadcast %43 : f32 to vector<8x256xf32>
    %45 = arith.mulf %44, %34 : vector<8x256xf32>
    %46 = arith.addf %26, %45 : vector<8x256xf32>
    %c109 = arith.constant 109 : index
    %47 = memref.load %arg2[%c109] : memref<144xf32, #tpu.memory_space<smem>>
    %48 = vector.broadcast %47 : f32 to vector<8x256xf32>
    %49 = arith.mulf %48, %34 : vector<8x256xf32>
    %50 = arith.addf %30, %49 : vector<8x256xf32>
    %c0_17 = arith.constant 0 : index
    %c113 = arith.constant 113 : index
    %51 = vector.load %arg6[%c0_17, %c113] : memref<8x512xf32, #tpu.memory_space<vmem>>, vector<8x256xf32>
    %c2 = arith.constant 2 : index
    %c0_18 = arith.constant 0 : index
    %c0_19 = arith.constant 0 : index
    %52 = vector.load %arg4[%c2, %c0_18, %c0_19] : memref<9x8x256xf32, #tpu.memory_space<vmem>>, vector<1x8x256xf32>
    %53 = vector.shape_cast %52 : vector<1x8x256xf32> to vector<8x256xf32>
    %54 = arith.mulf %51, %53 : vector<8x256xf32>
    %c2_20 = arith.constant 2 : index
    %55 = memref.load %arg2[%c2_20] : memref<144xf32, #tpu.memory_space<smem>>
    %56 = vector.broadcast %55 : f32 to vector<8x256xf32>
    %57 = arith.mulf %56, %54 : vector<8x256xf32>
    %58 = arith.addf %38, %57 : vector<8x256xf32>
    %c38 = arith.constant 38 : index
    %59 = memref.load %arg2[%c38] : memref<144xf32, #tpu.memory_space<smem>>
    %60 = vector.broadcast %59 : f32 to vector<8x256xf32>
    %61 = arith.mulf %60, %54 : vector<8x256xf32>
    %62 = arith.addf %42, %61 : vector<8x256xf32>
    %c74 = arith.constant 74 : index
    %63 = memref.load %arg2[%c74] : memref<144xf32, #tpu.memory_space<smem>>
    %64 = vector.broadcast %63 : f32 to vector<8x256xf32>
    %65 = arith.mulf %64, %54 : vector<8x256xf32>
    %66 = arith.addf %46, %65 : vector<8x256xf32>
    %c110 = arith.constant 110 : index
    %67 = memref.load %arg2[%c110] : memref<144xf32, #tpu.memory_space<smem>>
    %68 = vector.broadcast %67 : f32 to vector<8x256xf32>
    %69 = arith.mulf %68, %54 : vector<8x256xf32>
    %70 = arith.addf %50, %69 : vector<8x256xf32>
    %c0_21 = arith.constant 0 : index
    %c127 = arith.constant 127 : index
    %71 = vector.load %arg6[%c0_21, %c127] : memref<8x512xf32, #tpu.memory_space<vmem>>, vector<8x256xf32>
    %c3 = arith.constant 3 : index
    %c0_22 = arith.constant 0 : index
    %c0_23 = arith.constant 0 : index
    %72 = vector.load %arg4[%c3, %c0_22, %c0_23] : memref<9x8x256xf32, #tpu.memory_space<vmem>>, vector<1x8x256xf32>
    %73 = vector.shape_cast %72 : vector<1x8x256xf32> to vector<8x256xf32>
    %74 = arith.mulf %71, %73 : vector<8x256xf32>
    %c3_24 = arith.constant 3 : index
    %75 = memref.load %arg2[%c3_24] : memref<144xf32, #tpu.memory_space<smem>>
    %76 = vector.broadcast %75 : f32 to vector<8x256xf32>
    %77 = arith.mulf %76, %74 : vector<8x256xf32>
    %78 = arith.addf %58, %77 : vector<8x256xf32>
    %c39 = arith.constant 39 : index
    %79 = memref.load %arg2[%c39] : memref<144xf32, #tpu.memory_space<smem>>
    %80 = vector.broadcast %79 : f32 to vector<8x256xf32>
    %81 = arith.mulf %80, %74 : vector<8x256xf32>
    %82 = arith.addf %62, %81 : vector<8x256xf32>
    %c75 = arith.constant 75 : index
    %83 = memref.load %arg2[%c75] : memref<144xf32, #tpu.memory_space<smem>>
    %84 = vector.broadcast %83 : f32 to vector<8x256xf32>
    %85 = arith.mulf %84, %74 : vector<8x256xf32>
    %86 = arith.addf %66, %85 : vector<8x256xf32>
    %c111_25 = arith.constant 111 : index
    %87 = memref.load %arg2[%c111_25] : memref<144xf32, #tpu.memory_space<smem>>
    %88 = vector.broadcast %87 : f32 to vector<8x256xf32>
    %89 = arith.mulf %88, %74 : vector<8x256xf32>
    %90 = arith.addf %70, %89 : vector<8x256xf32>
    %c4 = arith.constant 4 : index
    %91 = memref.load %arg2[%c4] : memref<144xf32, #tpu.memory_space<smem>>
    %92 = vector.broadcast %91 : f32 to vector<8x256xf32>
    %93 = arith.mulf %92, %9 : vector<8x256xf32>
    %94 = arith.addf %78, %93 : vector<8x256xf32>
    %c40 = arith.constant 40 : index
    %95 = memref.load %arg2[%c40] : memref<144xf32, #tpu.memory_space<smem>>
    %96 = vector.broadcast %95 : f32 to vector<8x256xf32>
    %97 = arith.mulf %96, %9 : vector<8x256xf32>
    %98 = arith.addf %82, %97 : vector<8x256xf32>
    %c76 = arith.constant 76 : index
    %99 = memref.load %arg2[%c76] : memref<144xf32, #tpu.memory_space<smem>>
    %100 = vector.broadcast %99 : f32 to vector<8x256xf32>
    %101 = arith.mulf %100, %9 : vector<8x256xf32>
    %102 = arith.addf %86, %101 : vector<8x256xf32>
    %c112_26 = arith.constant 112 : index
    %103 = memref.load %arg2[%c112_26] : memref<144xf32, #tpu.memory_space<smem>>
    %104 = vector.broadcast %103 : f32 to vector<8x256xf32>
    %105 = arith.mulf %104, %9 : vector<8x256xf32>
    %106 = arith.addf %90, %105 : vector<8x256xf32>
    %c0_27 = arith.constant 0 : index
    %c129 = arith.constant 129 : index
    %107 = vector.load %arg6[%c0_27, %c129] : memref<8x512xf32, #tpu.memory_space<vmem>>, vector<8x256xf32>
    %c5 = arith.constant 5 : index
    %c0_28 = arith.constant 0 : index
    %c0_29 = arith.constant 0 : index
    %108 = vector.load %arg4[%c5, %c0_28, %c0_29] : memref<9x8x256xf32, #tpu.memory_space<vmem>>, vector<1x8x256xf32>
    %109 = vector.shape_cast %108 : vector<1x8x256xf32> to vector<8x256xf32>
    %110 = arith.mulf %107, %109 : vector<8x256xf32>
    %c5_30 = arith.constant 5 : index
    %111 = memref.load %arg2[%c5_30] : memref<144xf32, #tpu.memory_space<smem>>
    %112 = vector.broadcast %111 : f32 to vector<8x256xf32>
    %113 = arith.mulf %112, %110 : vector<8x256xf32>
    %114 = arith.addf %94, %113 : vector<8x256xf32>
    %c41 = arith.constant 41 : index
    %115 = memref.load %arg2[%c41] : memref<144xf32, #tpu.memory_space<smem>>
    %116 = vector.broadcast %115 : f32 to vector<8x256xf32>
    %117 = arith.mulf %116, %110 : vector<8x256xf32>
    %118 = arith.addf %98, %117 : vector<8x256xf32>
    %c77 = arith.constant 77 : index
    %119 = memref.load %arg2[%c77] : memref<144xf32, #tpu.memory_space<smem>>
    %120 = vector.broadcast %119 : f32 to vector<8x256xf32>
    %121 = arith.mulf %120, %110 : vector<8x256xf32>
    %122 = arith.addf %102, %121 : vector<8x256xf32>
    %c113_31 = arith.constant 113 : index
    %123 = memref.load %arg2[%c113_31] : memref<144xf32, #tpu.memory_space<smem>>
    %124 = vector.broadcast %123 : f32 to vector<8x256xf32>
    %125 = arith.mulf %124, %110 : vector<8x256xf32>
    %126 = arith.addf %106, %125 : vector<8x256xf32>
    %c0_32 = arith.constant 0 : index
    %c143 = arith.constant 143 : index
    %127 = vector.load %arg6[%c0_32, %c143] : memref<8x512xf32, #tpu.memory_space<vmem>>, vector<8x256xf32>
    %c6 = arith.constant 6 : index
    %c0_33 = arith.constant 0 : index
    %c0_34 = arith.constant 0 : index
    %128 = vector.load %arg4[%c6, %c0_33, %c0_34] : memref<9x8x256xf32, #tpu.memory_space<vmem>>, vector<1x8x256xf32>
    %129 = vector.shape_cast %128 : vector<1x8x256xf32> to vector<8x256xf32>
    %130 = arith.mulf %127, %129 : vector<8x256xf32>
    %c6_35 = arith.constant 6 : index
    %131 = memref.load %arg2[%c6_35] : memref<144xf32, #tpu.memory_space<smem>>
    %132 = vector.broadcast %131 : f32 to vector<8x256xf32>
    %133 = arith.mulf %132, %130 : vector<8x256xf32>
    %134 = arith.addf %114, %133 : vector<8x256xf32>
    %c42 = arith.constant 42 : index
    %135 = memref.load %arg2[%c42] : memref<144xf32, #tpu.memory_space<smem>>
    %136 = vector.broadcast %135 : f32 to vector<8x256xf32>
    %137 = arith.mulf %136, %130 : vector<8x256xf32>
    %138 = arith.addf %118, %137 : vector<8x256xf32>
    %c78 = arith.constant 78 : index
    %139 = memref.load %arg2[%c78] : memref<144xf32, #tpu.memory_space<smem>>
    %140 = vector.broadcast %139 : f32 to vector<8x256xf32>
    %141 = arith.mulf %140, %130 : vector<8x256xf32>
    %142 = arith.addf %122, %141 : vector<8x256xf32>
    %c114 = arith.constant 114 : index
    %143 = memref.load %arg2[%c114] : memref<144xf32, #tpu.memory_space<smem>>
    %144 = vector.broadcast %143 : f32 to vector<8x256xf32>
    %145 = arith.mulf %144, %130 : vector<8x256xf32>
    %146 = arith.addf %126, %145 : vector<8x256xf32>
    %c0_36 = arith.constant 0 : index
    %c144 = arith.constant 144 : index
    %147 = vector.load %arg6[%c0_36, %c144] : memref<8x512xf32, #tpu.memory_space<vmem>>, vector<8x256xf32>
    %c7 = arith.constant 7 : index
    %c0_37 = arith.constant 0 : index
    %c0_38 = arith.constant 0 : index
    %148 = vector.load %arg4[%c7, %c0_37, %c0_38] : memref<9x8x256xf32, #tpu.memory_space<vmem>>, vector<1x8x256xf32>
    %149 = vector.shape_cast %148 : vector<1x8x256xf32> to vector<8x256xf32>
    %150 = arith.mulf %147, %149 : vector<8x256xf32>
    %c7_39 = arith.constant 7 : index
    %151 = memref.load %arg2[%c7_39] : memref<144xf32, #tpu.memory_space<smem>>
    %152 = vector.broadcast %151 : f32 to vector<8x256xf32>
    %153 = arith.mulf %152, %150 : vector<8x256xf32>
    %154 = arith.addf %134, %153 : vector<8x256xf32>
    %c43 = arith.constant 43 : index
    %155 = memref.load %arg2[%c43] : memref<144xf32, #tpu.memory_space<smem>>
    %156 = vector.broadcast %155 : f32 to vector<8x256xf32>
    %157 = arith.mulf %156, %150 : vector<8x256xf32>
    %158 = arith.addf %138, %157 : vector<8x256xf32>
    %c79 = arith.constant 79 : index
    %159 = memref.load %arg2[%c79] : memref<144xf32, #tpu.memory_space<smem>>
    %160 = vector.broadcast %159 : f32 to vector<8x256xf32>
    %161 = arith.mulf %160, %150 : vector<8x256xf32>
    %162 = arith.addf %142, %161 : vector<8x256xf32>
    %c115 = arith.constant 115 : index
    %163 = memref.load %arg2[%c115] : memref<144xf32, #tpu.memory_space<smem>>
    %164 = vector.broadcast %163 : f32 to vector<8x256xf32>
    %165 = arith.mulf %164, %150 : vector<8x256xf32>
    %166 = arith.addf %146, %165 : vector<8x256xf32>
    %c0_40 = arith.constant 0 : index
    %c145 = arith.constant 145 : index
    %167 = vector.load %arg6[%c0_40, %c145] : memref<8x512xf32, #tpu.memory_space<vmem>>, vector<8x256xf32>
    %c8 = arith.constant 8 : index
    %c0_41 = arith.constant 0 : index
    %c0_42 = arith.constant 0 : index
    %168 = vector.load %arg4[%c8, %c0_41, %c0_42] : memref<9x8x256xf32, #tpu.memory_space<vmem>>, vector<1x8x256xf32>
    %169 = vector.shape_cast %168 : vector<1x8x256xf32> to vector<8x256xf32>
    %170 = arith.mulf %167, %169 : vector<8x256xf32>
    %c8_43 = arith.constant 8 : index
    %171 = memref.load %arg2[%c8_43] : memref<144xf32, #tpu.memory_space<smem>>
    %172 = vector.broadcast %171 : f32 to vector<8x256xf32>
    %173 = arith.mulf %172, %170 : vector<8x256xf32>
    %174 = arith.addf %154, %173 : vector<8x256xf32>
    %c44 = arith.constant 44 : index
    %175 = memref.load %arg2[%c44] : memref<144xf32, #tpu.memory_space<smem>>
    %176 = vector.broadcast %175 : f32 to vector<8x256xf32>
    %177 = arith.mulf %176, %170 : vector<8x256xf32>
    %178 = arith.addf %158, %177 : vector<8x256xf32>
    %c80 = arith.constant 80 : index
    %179 = memref.load %arg2[%c80] : memref<144xf32, #tpu.memory_space<smem>>
    %180 = vector.broadcast %179 : f32 to vector<8x256xf32>
    %181 = arith.mulf %180, %170 : vector<8x256xf32>
    %182 = arith.addf %162, %181 : vector<8x256xf32>
    %c116 = arith.constant 116 : index
    %183 = memref.load %arg2[%c116] : memref<144xf32, #tpu.memory_space<smem>>
    %184 = vector.broadcast %183 : f32 to vector<8x256xf32>
    %185 = arith.mulf %184, %170 : vector<8x256xf32>
    %186 = arith.addf %166, %185 : vector<8x256xf32>
    %187 = arith.index_cast %7 : i32 to index
    %c256_44 = arith.constant 256 : index
    %188 = vector.load %arg1[%187, %c256_44] : memref<8x1024xf32, #tpu.memory_space<vmem>>, vector<8x256xf32>
    %c0_45 = arith.constant 0 : index
    %c128_46 = arith.constant 128 : index
    %189 = vector.load %arg6[%c0_45, %c128_46] : memref<8x512xf32, #tpu.memory_space<vmem>>, vector<8x256xf32>
    tpu.vector_store %arg6[%c0_45, %c128_46], %188 {strides = array<i32>} : memref<8x512xf32, #tpu.memory_space<vmem>>, vector<8x256xf32>,
    %c0_47 = arith.constant 0 : index
    %c111_48 = arith.constant 111 : index
    %190 = vector.load %arg6[%c0_47, %c111_48] : memref<8x512xf32, #tpu.memory_space<vmem>>, vector<8x256xf32>
    %c0_49 = arith.constant 0 : index
    %c0_50 = arith.constant 0 : index
    %c0_51 = arith.constant 0 : index
    %191 = vector.load %arg4[%c0_49, %c0_50, %c0_51] : memref<9x8x256xf32, #tpu.memory_space<vmem>>, vector<1x8x256xf32>
    %192 = vector.shape_cast %191 : vector<1x8x256xf32> to vector<8x256xf32>
    %193 = arith.mulf %190, %192 : vector<8x256xf32>
    %c9 = arith.constant 9 : index
    %194 = memref.load %arg2[%c9] : memref<144xf32, #tpu.memory_space<smem>>
    %195 = vector.broadcast %194 : f32 to vector<8x256xf32>
    %196 = arith.mulf %195, %193 : vector<8x256xf32>
    %197 = arith.addf %174, %196 : vector<8x256xf32>
    %c45 = arith.constant 45 : index
    %198 = memref.load %arg2[%c45] : memref<144xf32, #tpu.memory_space<smem>>
    %199 = vector.broadcast %198 : f32 to vector<8x256xf32>
    %200 = arith.mulf %199, %193 : vector<8x256xf32>
    %201 = arith.addf %178, %200 : vector<8x256xf32>
    %c81 = arith.constant 81 : index
    %202 = memref.load %arg2[%c81] : memref<144xf32, #tpu.memory_space<smem>>
    %203 = vector.broadcast %202 : f32 to vector<8x256xf32>
    %204 = arith.mulf %203, %193 : vector<8x256xf32>
    %205 = arith.addf %182, %204 : vector<8x256xf32>
    %c117 = arith.constant 117 : index
    %206 = memref.load %arg2[%c117] : memref<144xf32, #tpu.memory_space<smem>>
    %207 = vector.broadcast %206 : f32 to vector<8x256xf32>
    %208 = arith.mulf %207, %193 : vector<8x256xf32>
    %209 = arith.addf %186, %208 : vector<8x256xf32>
    %c0_52 = arith.constant 0 : index
    %c112_53 = arith.constant 112 : index
    %210 = vector.load %arg6[%c0_52, %c112_53] : memref<8x512xf32, #tpu.memory_space<vmem>>, vector<8x256xf32>
    %c1_54 = arith.constant 1 : index
    %c0_55 = arith.constant 0 : index
    %c0_56 = arith.constant 0 : index
    %211 = vector.load %arg4[%c1_54, %c0_55, %c0_56] : memref<9x8x256xf32, #tpu.memory_space<vmem>>, vector<1x8x256xf32>
    %212 = vector.shape_cast %211 : vector<1x8x256xf32> to vector<8x256xf32>
    %213 = arith.mulf %210, %212 : vector<8x256xf32>
    %c10 = arith.constant 10 : index
    %214 = memref.load %arg2[%c10] : memref<144xf32, #tpu.memory_space<smem>>
    %215 = vector.broadcast %214 : f32 to vector<8x256xf32>
    %216 = arith.mulf %215, %213 : vector<8x256xf32>
    %217 = arith.addf %197, %216 : vector<8x256xf32>
    %c46 = arith.constant 46 : index
    %218 = memref.load %arg2[%c46] : memref<144xf32, #tpu.memory_space<smem>>
    %219 = vector.broadcast %218 : f32 to vector<8x256xf32>
    %220 = arith.mulf %219, %213 : vector<8x256xf32>
    %221 = arith.addf %201, %220 : vector<8x256xf32>
    %c82 = arith.constant 82 : index
    %222 = memref.load %arg2[%c82] : memref<144xf32, #tpu.memory_space<smem>>
    %223 = vector.broadcast %222 : f32 to vector<8x256xf32>
    %224 = arith.mulf %223, %213 : vector<8x256xf32>
    %225 = arith.addf %205, %224 : vector<8x256xf32>
    %c118 = arith.constant 118 : index
    %226 = memref.load %arg2[%c118] : memref<144xf32, #tpu.memory_space<smem>>
    %227 = vector.broadcast %226 : f32 to vector<8x256xf32>
    %228 = arith.mulf %227, %213 : vector<8x256xf32>
    %229 = arith.addf %209, %228 : vector<8x256xf32>
    %c0_57 = arith.constant 0 : index
    %c113_58 = arith.constant 113 : index
    %230 = vector.load %arg6[%c0_57, %c113_58] : memref<8x512xf32, #tpu.memory_space<vmem>>, vector<8x256xf32>
    %c2_59 = arith.constant 2 : index
    %c0_60 = arith.constant 0 : index
    %c0_61 = arith.constant 0 : index
    %231 = vector.load %arg4[%c2_59, %c0_60, %c0_61] : memref<9x8x256xf32, #tpu.memory_space<vmem>>, vector<1x8x256xf32>
    %232 = vector.shape_cast %231 : vector<1x8x256xf32> to vector<8x256xf32>
    %233 = arith.mulf %230, %232 : vector<8x256xf32>
    %c11 = arith.constant 11 : index
    %234 = memref.load %arg2[%c11] : memref<144xf32, #tpu.memory_space<smem>>
    %235 = vector.broadcast %234 : f32 to vector<8x256xf32>
    %236 = arith.mulf %235, %233 : vector<8x256xf32>
    %237 = arith.addf %217, %236 : vector<8x256xf32>
    %c47 = arith.constant 47 : index
    %238 = memref.load %arg2[%c47] : memref<144xf32, #tpu.memory_space<smem>>
    %239 = vector.broadcast %238 : f32 to vector<8x256xf32>
    %240 = arith.mulf %239, %233 : vector<8x256xf32>
    %241 = arith.addf %221, %240 : vector<8x256xf32>
    %c83 = arith.constant 83 : index
    %242 = memref.load %arg2[%c83] : memref<144xf32, #tpu.memory_space<smem>>
    %243 = vector.broadcast %242 : f32 to vector<8x256xf32>
    %244 = arith.mulf %243, %233 : vector<8x256xf32>
    %245 = arith.addf %225, %244 : vector<8x256xf32>
    %c119 = arith.constant 119 : index
    %246 = memref.load %arg2[%c119] : memref<144xf32, #tpu.memory_space<smem>>
    %247 = vector.broadcast %246 : f32 to vector<8x256xf32>
    %248 = arith.mulf %247, %233 : vector<8x256xf32>
    %249 = arith.addf %229, %248 : vector<8x256xf32>
    %c0_62 = arith.constant 0 : index
    %c127_63 = arith.constant 127 : index
    %250 = vector.load %arg6[%c0_62, %c127_63] : memref<8x512xf32, #tpu.memory_space<vmem>>, vector<8x256xf32>
    %c3_64 = arith.constant 3 : index
    %c0_65 = arith.constant 0 : index
    %c0_66 = arith.constant 0 : index
    %251 = vector.load %arg4[%c3_64, %c0_65, %c0_66] : memref<9x8x256xf32, #tpu.memory_space<vmem>>, vector<1x8x256xf32>
    %252 = vector.shape_cast %251 : vector<1x8x256xf32> to vector<8x256xf32>
    %253 = arith.mulf %250, %252 : vector<8x256xf32>
    %c12 = arith.constant 12 : index
    %254 = memref.load %arg2[%c12] : memref<144xf32, #tpu.memory_space<smem>>
    %255 = vector.broadcast %254 : f32 to vector<8x256xf32>
    %256 = arith.mulf %255, %253 : vector<8x256xf32>
    %257 = arith.addf %237, %256 : vector<8x256xf32>
    %c48 = arith.constant 48 : index
    %258 = memref.load %arg2[%c48] : memref<144xf32, #tpu.memory_space<smem>>
    %259 = vector.broadcast %258 : f32 to vector<8x256xf32>
    %260 = arith.mulf %259, %253 : vector<8x256xf32>
    %261 = arith.addf %241, %260 : vector<8x256xf32>
    %c84 = arith.constant 84 : index
    %262 = memref.load %arg2[%c84] : memref<144xf32, #tpu.memory_space<smem>>
    %263 = vector.broadcast %262 : f32 to vector<8x256xf32>
    %264 = arith.mulf %263, %253 : vector<8x256xf32>
    %265 = arith.addf %245, %264 : vector<8x256xf32>
    %c120 = arith.constant 120 : index
    %266 = memref.load %arg2[%c120] : memref<144xf32, #tpu.memory_space<smem>>
    %267 = vector.broadcast %266 : f32 to vector<8x256xf32>
    %268 = arith.mulf %267, %253 : vector<8x256xf32>
    %269 = arith.addf %249, %268 : vector<8x256xf32>
    %c13 = arith.constant 13 : index
    %270 = memref.load %arg2[%c13] : memref<144xf32, #tpu.memory_space<smem>>
    %271 = vector.broadcast %270 : f32 to vector<8x256xf32>
    %272 = arith.mulf %271, %188 : vector<8x256xf32>
    %273 = arith.addf %257, %272 : vector<8x256xf32>
    %c49 = arith.constant 49 : index
    %274 = memref.load %arg2[%c49] : memref<144xf32, #tpu.memory_space<smem>>
    %275 = vector.broadcast %274 : f32 to vector<8x256xf32>
    %276 = arith.mulf %275, %188 : vector<8x256xf32>
    %277 = arith.addf %261, %276 : vector<8x256xf32>
    %c85 = arith.constant 85 : index
    %278 = memref.load %arg2[%c85] : memref<144xf32, #tpu.memory_space<smem>>
    %279 = vector.broadcast %278 : f32 to vector<8x256xf32>
    %280 = arith.mulf %279, %188 : vector<8x256xf32>
    %281 = arith.addf %265, %280 : vector<8x256xf32>
    %c121 = arith.constant 121 : index
    %282 = memref.load %arg2[%c121] : memref<144xf32, #tpu.memory_space<smem>>
    %283 = vector.broadcast %282 : f32 to vector<8x256xf32>
    %284 = arith.mulf %283, %188 : vector<8x256xf32>
    %285 = arith.addf %269, %284 : vector<8x256xf32>
    %c0_67 = arith.constant 0 : index
    %c129_68 = arith.constant 129 : index
    %286 = vector.load %arg6[%c0_67, %c129_68] : memref<8x512xf32, #tpu.memory_space<vmem>>, vector<8x256xf32>
    %c5_69 = arith.constant 5 : index
    %c0_70 = arith.constant 0 : index
    %c0_71 = arith.constant 0 : index
    %287 = vector.load %arg4[%c5_69, %c0_70, %c0_71] : memref<9x8x256xf32, #tpu.memory_space<vmem>>, vector<1x8x256xf32>
    %288 = vector.shape_cast %287 : vector<1x8x256xf32> to vector<8x256xf32>
    %289 = arith.mulf %286, %288 : vector<8x256xf32>
    %c14 = arith.constant 14 : index
    %290 = memref.load %arg2[%c14] : memref<144xf32, #tpu.memory_space<smem>>
    %291 = vector.broadcast %290 : f32 to vector<8x256xf32>
    %292 = arith.mulf %291, %289 : vector<8x256xf32>
    %293 = arith.addf %273, %292 : vector<8x256xf32>
    %c50 = arith.constant 50 : index
    %294 = memref.load %arg2[%c50] : memref<144xf32, #tpu.memory_space<smem>>
    %295 = vector.broadcast %294 : f32 to vector<8x256xf32>
    %296 = arith.mulf %295, %289 : vector<8x256xf32>
    %297 = arith.addf %277, %296 : vector<8x256xf32>
    %c86 = arith.constant 86 : index
    %298 = memref.load %arg2[%c86] : memref<144xf32, #tpu.memory_space<smem>>
    %299 = vector.broadcast %298 : f32 to vector<8x256xf32>
    %300 = arith.mulf %299, %289 : vector<8x256xf32>
    %301 = arith.addf %281, %300 : vector<8x256xf32>
    %c122 = arith.constant 122 : index
    %302 = memref.load %arg2[%c122] : memref<144xf32, #tpu.memory_space<smem>>
    %303 = vector.broadcast %302 : f32 to vector<8x256xf32>
    %304 = arith.mulf %303, %289 : vector<8x256xf32>
    %305 = arith.addf %285, %304 : vector<8x256xf32>
    %c0_72 = arith.constant 0 : index
    %c143_73 = arith.constant 143 : index
    %306 = vector.load %arg6[%c0_72, %c143_73] : memref<8x512xf32, #tpu.memory_space<vmem>>, vector<8x256xf32>
    %c6_74 = arith.constant 6 : index
    %c0_75 = arith.constant 0 : index
    %c0_76 = arith.constant 0 : index
    %307 = vector.load %arg4[%c6_74, %c0_75, %c0_76] : memref<9x8x256xf32, #tpu.memory_space<vmem>>, vector<1x8x256xf32>
    %308 = vector.shape_cast %307 : vector<1x8x256xf32> to vector<8x256xf32>
    %309 = arith.mulf %306, %308 : vector<8x256xf32>
    %c15 = arith.constant 15 : index
    %310 = memref.load %arg2[%c15] : memref<144xf32, #tpu.memory_space<smem>>
    %311 = vector.broadcast %310 : f32 to vector<8x256xf32>
    %312 = arith.mulf %311, %309 : vector<8x256xf32>
    %313 = arith.addf %293, %312 : vector<8x256xf32>
    %c51 = arith.constant 51 : index
    %314 = memref.load %arg2[%c51] : memref<144xf32, #tpu.memory_space<smem>>
    %315 = vector.broadcast %314 : f32 to vector<8x256xf32>
    %316 = arith.mulf %315, %309 : vector<8x256xf32>
    %317 = arith.addf %297, %316 : vector<8x256xf32>
    %c87 = arith.constant 87 : index
    %318 = memref.load %arg2[%c87] : memref<144xf32, #tpu.memory_space<smem>>
    %319 = vector.broadcast %318 : f32 to vector<8x256xf32>
    %320 = arith.mulf %319, %309 : vector<8x256xf32>
    %321 = arith.addf %301, %320 : vector<8x256xf32>
    %c123 = arith.constant 123 : index
    %322 = memref.load %arg2[%c123] : memref<144xf32, #tpu.memory_space<smem>>
    %323 = vector.broadcast %322 : f32 to vector<8x256xf32>
    %324 = arith.mulf %323, %309 : vector<8x256xf32>
    %325 = arith.addf %305, %324 : vector<8x256xf32>
    %c0_77 = arith.constant 0 : index
    %c144_78 = arith.constant 144 : index
    %326 = vector.load %arg6[%c0_77, %c144_78] : memref<8x512xf32, #tpu.memory_space<vmem>>, vector<8x256xf32>
    %c7_79 = arith.constant 7 : index
    %c0_80 = arith.constant 0 : index
    %c0_81 = arith.constant 0 : index
    %327 = vector.load %arg4[%c7_79, %c0_80, %c0_81] : memref<9x8x256xf32, #tpu.memory_space<vmem>>, vector<1x8x256xf32>
    %328 = vector.shape_cast %327 : vector<1x8x256xf32> to vector<8x256xf32>
    %329 = arith.mulf %326, %328 : vector<8x256xf32>
    %c16 = arith.constant 16 : index
    %330 = memref.load %arg2[%c16] : memref<144xf32, #tpu.memory_space<smem>>
    %331 = vector.broadcast %330 : f32 to vector<8x256xf32>
    %332 = arith.mulf %331, %329 : vector<8x256xf32>
    %333 = arith.addf %313, %332 : vector<8x256xf32>
    %c52 = arith.constant 52 : index
    %334 = memref.load %arg2[%c52] : memref<144xf32, #tpu.memory_space<smem>>
    %335 = vector.broadcast %334 : f32 to vector<8x256xf32>
    %336 = arith.mulf %335, %329 : vector<8x256xf32>
    %337 = arith.addf %317, %336 : vector<8x256xf32>
    %c88 = arith.constant 88 : index
    %338 = memref.load %arg2[%c88] : memref<144xf32, #tpu.memory_space<smem>>
    %339 = vector.broadcast %338 : f32 to vector<8x256xf32>
    %340 = arith.mulf %339, %329 : vector<8x256xf32>
    %341 = arith.addf %321, %340 : vector<8x256xf32>
    %c124 = arith.constant 124 : index
    %342 = memref.load %arg2[%c124] : memref<144xf32, #tpu.memory_space<smem>>
    %343 = vector.broadcast %342 : f32 to vector<8x256xf32>
    %344 = arith.mulf %343, %329 : vector<8x256xf32>
    %345 = arith.addf %325, %344 : vector<8x256xf32>
    %c0_82 = arith.constant 0 : index
    %c145_83 = arith.constant 145 : index
    %346 = vector.load %arg6[%c0_82, %c145_83] : memref<8x512xf32, #tpu.memory_space<vmem>>, vector<8x256xf32>
    %c8_84 = arith.constant 8 : index
    %c0_85 = arith.constant 0 : index
    %c0_86 = arith.constant 0 : index
    %347 = vector.load %arg4[%c8_84, %c0_85, %c0_86] : memref<9x8x256xf32, #tpu.memory_space<vmem>>, vector<1x8x256xf32>
    %348 = vector.shape_cast %347 : vector<1x8x256xf32> to vector<8x256xf32>
    %349 = arith.mulf %346, %348 : vector<8x256xf32>
    %c17 = arith.constant 17 : index
    %350 = memref.load %arg2[%c17] : memref<144xf32, #tpu.memory_space<smem>>
    %351 = vector.broadcast %350 : f32 to vector<8x256xf32>
    %352 = arith.mulf %351, %349 : vector<8x256xf32>
    %353 = arith.addf %333, %352 : vector<8x256xf32>
    %c53 = arith.constant 53 : index
    %354 = memref.load %arg2[%c53] : memref<144xf32, #tpu.memory_space<smem>>
    %355 = vector.broadcast %354 : f32 to vector<8x256xf32>
    %356 = arith.mulf %355, %349 : vector<8x256xf32>
    %357 = arith.addf %337, %356 : vector<8x256xf32>
    %c89 = arith.constant 89 : index
    %358 = memref.load %arg2[%c89] : memref<144xf32, #tpu.memory_space<smem>>
    %359 = vector.broadcast %358 : f32 to vector<8x256xf32>
    %360 = arith.mulf %359, %349 : vector<8x256xf32>
    %361 = arith.addf %341, %360 : vector<8x256xf32>
    %c125 = arith.constant 125 : index
    %362 = memref.load %arg2[%c125] : memref<144xf32, #tpu.memory_space<smem>>
    %363 = vector.broadcast %362 : f32 to vector<8x256xf32>
    %364 = arith.mulf %363, %349 : vector<8x256xf32>
    %365 = arith.addf %345, %364 : vector<8x256xf32>
    %366 = arith.index_cast %7 : i32 to index
    %c512_87 = arith.constant 512 : index
    %367 = vector.load %arg1[%366, %c512_87] : memref<8x1024xf32, #tpu.memory_space<vmem>>, vector<8x256xf32>
    %c0_88 = arith.constant 0 : index
    %c128_89 = arith.constant 128 : index
    %368 = vector.load %arg6[%c0_88, %c128_89] : memref<8x512xf32, #tpu.memory_space<vmem>>, vector<8x256xf32>
    tpu.vector_store %arg6[%c0_88, %c128_89], %367 {strides = array<i32>} : memref<8x512xf32, #tpu.memory_space<vmem>>, vector<8x256xf32>,
    %c0_90 = arith.constant 0 : index
    %c111_91 = arith.constant 111 : index
    %369 = vector.load %arg6[%c0_90, %c111_91] : memref<8x512xf32, #tpu.memory_space<vmem>>, vector<8x256xf32>
    %c0_92 = arith.constant 0 : index
    %c0_93 = arith.constant 0 : index
    %c0_94 = arith.constant 0 : index
    %370 = vector.load %arg4[%c0_92, %c0_93, %c0_94] : memref<9x8x256xf32, #tpu.memory_space<vmem>>, vector<1x8x256xf32>
    %371 = vector.shape_cast %370 : vector<1x8x256xf32> to vector<8x256xf32>
    %372 = arith.mulf %369, %371 : vector<8x256xf32>
    %c18 = arith.constant 18 : index
    %373 = memref.load %arg2[%c18] : memref<144xf32, #tpu.memory_space<smem>>
    %374 = vector.broadcast %373 : f32 to vector<8x256xf32>
    %375 = arith.mulf %374, %372 : vector<8x256xf32>
    %376 = arith.addf %353, %375 : vector<8x256xf32>
    %c54 = arith.constant 54 : index
    %377 = memref.load %arg2[%c54] : memref<144xf32, #tpu.memory_space<smem>>
    %378 = vector.broadcast %377 : f32 to vector<8x256xf32>
    %379 = arith.mulf %378, %372 : vector<8x256xf32>
    %380 = arith.addf %357, %379 : vector<8x256xf32>
    %c90 = arith.constant 90 : index
    %381 = memref.load %arg2[%c90] : memref<144xf32, #tpu.memory_space<smem>>
    %382 = vector.broadcast %381 : f32 to vector<8x256xf32>
    %383 = arith.mulf %382, %372 : vector<8x256xf32>
    %384 = arith.addf %361, %383 : vector<8x256xf32>
    %c126 = arith.constant 126 : index
    %385 = memref.load %arg2[%c126] : memref<144xf32, #tpu.memory_space<smem>>
    %386 = vector.broadcast %385 : f32 to vector<8x256xf32>
    %387 = arith.mulf %386, %372 : vector<8x256xf32>
    %388 = arith.addf %365, %387 : vector<8x256xf32>
    %c0_95 = arith.constant 0 : index
    %c112_96 = arith.constant 112 : index
    %389 = vector.load %arg6[%c0_95, %c112_96] : memref<8x512xf32, #tpu.memory_space<vmem>>, vector<8x256xf32>
    %c1_97 = arith.constant 1 : index
    %c0_98 = arith.constant 0 : index
    %c0_99 = arith.constant 0 : index
    %390 = vector.load %arg4[%c1_97, %c0_98, %c0_99] : memref<9x8x256xf32, #tpu.memory_space<vmem>>, vector<1x8x256xf32>
    %391 = vector.shape_cast %390 : vector<1x8x256xf32> to vector<8x256xf32>
    %392 = arith.mulf %389, %391 : vector<8x256xf32>
    %c19 = arith.constant 19 : index
    %393 = memref.load %arg2[%c19] : memref<144xf32, #tpu.memory_space<smem>>
    %394 = vector.broadcast %393 : f32 to vector<8x256xf32>
    %395 = arith.mulf %394, %392 : vector<8x256xf32>
    %396 = arith.addf %376, %395 : vector<8x256xf32>
    %c55 = arith.constant 55 : index
    %397 = memref.load %arg2[%c55] : memref<144xf32, #tpu.memory_space<smem>>
    %398 = vector.broadcast %397 : f32 to vector<8x256xf32>
    %399 = arith.mulf %398, %392 : vector<8x256xf32>
    %400 = arith.addf %380, %399 : vector<8x256xf32>
    %c91 = arith.constant 91 : index
    %401 = memref.load %arg2[%c91] : memref<144xf32, #tpu.memory_space<smem>>
    %402 = vector.broadcast %401 : f32 to vector<8x256xf32>
    %403 = arith.mulf %402, %392 : vector<8x256xf32>
    %404 = arith.addf %384, %403 : vector<8x256xf32>
    %c127_100 = arith.constant 127 : index
    %405 = memref.load %arg2[%c127_100] : memref<144xf32, #tpu.memory_space<smem>>
    %406 = vector.broadcast %405 : f32 to vector<8x256xf32>
    %407 = arith.mulf %406, %392 : vector<8x256xf32>
    %408 = arith.addf %388, %407 : vector<8x256xf32>
    %c0_101 = arith.constant 0 : index
    %c113_102 = arith.constant 113 : index
    %409 = vector.load %arg6[%c0_101, %c113_102] : memref<8x512xf32, #tpu.memory_space<vmem>>, vector<8x256xf32>
    %c2_103 = arith.constant 2 : index
    %c0_104 = arith.constant 0 : index
    %c0_105 = arith.constant 0 : index
    %410 = vector.load %arg4[%c2_103, %c0_104, %c0_105] : memref<9x8x256xf32, #tpu.memory_space<vmem>>, vector<1x8x256xf32>
    %411 = vector.shape_cast %410 : vector<1x8x256xf32> to vector<8x256xf32>
    %412 = arith.mulf %409, %411 : vector<8x256xf32>
    %c20 = arith.constant 20 : index
    %413 = memref.load %arg2[%c20] : memref<144xf32, #tpu.memory_space<smem>>
    %414 = vector.broadcast %413 : f32 to vector<8x256xf32>
    %415 = arith.mulf %414, %412 : vector<8x256xf32>
    %416 = arith.addf %396, %415 : vector<8x256xf32>
    %c56 = arith.constant 56 : index
    %417 = memref.load %arg2[%c56] : memref<144xf32, #tpu.memory_space<smem>>
    %418 = vector.broadcast %417 : f32 to vector<8x256xf32>
    %419 = arith.mulf %418, %412 : vector<8x256xf32>
    %420 = arith.addf %400, %419 : vector<8x256xf32>
    %c92 = arith.constant 92 : index
    %421 = memref.load %arg2[%c92] : memref<144xf32, #tpu.memory_space<smem>>
    %422 = vector.broadcast %421 : f32 to vector<8x256xf32>
    %423 = arith.mulf %422, %412 : vector<8x256xf32>
    %424 = arith.addf %404, %423 : vector<8x256xf32>
    %c128_106 = arith.constant 128 : index
    %425 = memref.load %arg2[%c128_106] : memref<144xf32, #tpu.memory_space<smem>>
    %426 = vector.broadcast %425 : f32 to vector<8x256xf32>
    %427 = arith.mulf %426, %412 : vector<8x256xf32>
    %428 = arith.addf %408, %427 : vector<8x256xf32>
    %c0_107 = arith.constant 0 : index
    %c127_108 = arith.constant 127 : index
    %429 = vector.load %arg6[%c0_107, %c127_108] : memref<8x512xf32, #tpu.memory_space<vmem>>, vector<8x256xf32>
    %c3_109 = arith.constant 3 : index
    %c0_110 = arith.constant 0 : index
    %c0_111 = arith.constant 0 : index
    %430 = vector.load %arg4[%c3_109, %c0_110, %c0_111] : memref<9x8x256xf32, #tpu.memory_space<vmem>>, vector<1x8x256xf32>
    %431 = vector.shape_cast %430 : vector<1x8x256xf32> to vector<8x256xf32>
    %432 = arith.mulf %429, %431 : vector<8x256xf32>
    %c21 = arith.constant 21 : index
    %433 = memref.load %arg2[%c21] : memref<144xf32, #tpu.memory_space<smem>>
    %434 = vector.broadcast %433 : f32 to vector<8x256xf32>
    %435 = arith.mulf %434, %432 : vector<8x256xf32>
    %436 = arith.addf %416, %435 : vector<8x256xf32>
    %c57 = arith.constant 57 : index
    %437 = memref.load %arg2[%c57] : memref<144xf32, #tpu.memory_space<smem>>
    %438 = vector.broadcast %437 : f32 to vector<8x256xf32>
    %439 = arith.mulf %438, %432 : vector<8x256xf32>
    %440 = arith.addf %420, %439 : vector<8x256xf32>
    %c93 = arith.constant 93 : index
    %441 = memref.load %arg2[%c93] : memref<144xf32, #tpu.memory_space<smem>>
    %442 = vector.broadcast %441 : f32 to vector<8x256xf32>
    %443 = arith.mulf %442, %432 : vector<8x256xf32>
    %444 = arith.addf %424, %443 : vector<8x256xf32>
    %c129_112 = arith.constant 129 : index
    %445 = memref.load %arg2[%c129_112] : memref<144xf32, #tpu.memory_space<smem>>
    %446 = vector.broadcast %445 : f32 to vector<8x256xf32>
    %447 = arith.mulf %446, %432 : vector<8x256xf32>
    %448 = arith.addf %428, %447 : vector<8x256xf32>
    %c22 = arith.constant 22 : index
    %449 = memref.load %arg2[%c22] : memref<144xf32, #tpu.memory_space<smem>>
    %450 = vector.broadcast %449 : f32 to vector<8x256xf32>
    %451 = arith.mulf %450, %367 : vector<8x256xf32>
    %452 = arith.addf %436, %451 : vector<8x256xf32>
    %c58 = arith.constant 58 : index
    %453 = memref.load %arg2[%c58] : memref<144xf32, #tpu.memory_space<smem>>
    %454 = vector.broadcast %453 : f32 to vector<8x256xf32>
    %455 = arith.mulf %454, %367 : vector<8x256xf32>
    %456 = arith.addf %440, %455 : vector<8x256xf32>
    %c94 = arith.constant 94 : index
    %457 = memref.load %arg2[%c94] : memref<144xf32, #tpu.memory_space<smem>>
    %458 = vector.broadcast %457 : f32 to vector<8x256xf32>
    %459 = arith.mulf %458, %367 : vector<8x256xf32>
    %460 = arith.addf %444, %459 : vector<8x256xf32>
    %c130 = arith.constant 130 : index
    %461 = memref.load %arg2[%c130] : memref<144xf32, #tpu.memory_space<smem>>
    %462 = vector.broadcast %461 : f32 to vector<8x256xf32>
    %463 = arith.mulf %462, %367 : vector<8x256xf32>
    %464 = arith.addf %448, %463 : vector<8x256xf32>
    %c0_113 = arith.constant 0 : index
    %c129_114 = arith.constant 129 : index
    %465 = vector.load %arg6[%c0_113, %c129_114] : memref<8x512xf32, #tpu.memory_space<vmem>>, vector<8x256xf32>
    %c5_115 = arith.constant 5 : index
    %c0_116 = arith.constant 0 : index
    %c0_117 = arith.constant 0 : index
    %466 = vector.load %arg4[%c5_115, %c0_116, %c0_117] : memref<9x8x256xf32, #tpu.memory_space<vmem>>, vector<1x8x256xf32>
    %467 = vector.shape_cast %466 : vector<1x8x256xf32> to vector<8x256xf32>
    %468 = arith.mulf %465, %467 : vector<8x256xf32>
    %c23 = arith.constant 23 : index
    %469 = memref.load %arg2[%c23] : memref<144xf32, #tpu.memory_space<smem>>
    %470 = vector.broadcast %469 : f32 to vector<8x256xf32>
    %471 = arith.mulf %470, %468 : vector<8x256xf32>
    %472 = arith.addf %452, %471 : vector<8x256xf32>
    %c59 = arith.constant 59 : index
    %473 = memref.load %arg2[%c59] : memref<144xf32, #tpu.memory_space<smem>>
    %474 = vector.broadcast %473 : f32 to vector<8x256xf32>
    %475 = arith.mulf %474, %468 : vector<8x256xf32>
    %476 = arith.addf %456, %475 : vector<8x256xf32>
    %c95 = arith.constant 95 : index
    %477 = memref.load %arg2[%c95] : memref<144xf32, #tpu.memory_space<smem>>
    %478 = vector.broadcast %477 : f32 to vector<8x256xf32>
    %479 = arith.mulf %478, %468 : vector<8x256xf32>
    %480 = arith.addf %460, %479 : vector<8x256xf32>
    %c131 = arith.constant 131 : index
    %481 = memref.load %arg2[%c131] : memref<144xf32, #tpu.memory_space<smem>>
    %482 = vector.broadcast %481 : f32 to vector<8x256xf32>
    %483 = arith.mulf %482, %468 : vector<8x256xf32>
    %484 = arith.addf %464, %483 : vector<8x256xf32>
    %c0_118 = arith.constant 0 : index
    %c143_119 = arith.constant 143 : index
    %485 = vector.load %arg6[%c0_118, %c143_119] : memref<8x512xf32, #tpu.memory_space<vmem>>, vector<8x256xf32>
    %c6_120 = arith.constant 6 : index
    %c0_121 = arith.constant 0 : index
    %c0_122 = arith.constant 0 : index
    %486 = vector.load %arg4[%c6_120, %c0_121, %c0_122] : memref<9x8x256xf32, #tpu.memory_space<vmem>>, vector<1x8x256xf32>
    %487 = vector.shape_cast %486 : vector<1x8x256xf32> to vector<8x256xf32>
    %488 = arith.mulf %485, %487 : vector<8x256xf32>
    %c24 = arith.constant 24 : index
    %489 = memref.load %arg2[%c24] : memref<144xf32, #tpu.memory_space<smem>>
    %490 = vector.broadcast %489 : f32 to vector<8x256xf32>
    %491 = arith.mulf %490, %488 : vector<8x256xf32>
    %492 = arith.addf %472, %491 : vector<8x256xf32>
    %c60 = arith.constant 60 : index
    %493 = memref.load %arg2[%c60] : memref<144xf32, #tpu.memory_space<smem>>
    %494 = vector.broadcast %493 : f32 to vector<8x256xf32>
    %495 = arith.mulf %494, %488 : vector<8x256xf32>
    %496 = arith.addf %476, %495 : vector<8x256xf32>
    %c96 = arith.constant 96 : index
    %497 = memref.load %arg2[%c96] : memref<144xf32, #tpu.memory_space<smem>>
    %498 = vector.broadcast %497 : f32 to vector<8x256xf32>
    %499 = arith.mulf %498, %488 : vector<8x256xf32>
    %500 = arith.addf %480, %499 : vector<8x256xf32>
    %c132 = arith.constant 132 : index
    %501 = memref.load %arg2[%c132] : memref<144xf32, #tpu.memory_space<smem>>
    %502 = vector.broadcast %501 : f32 to vector<8x256xf32>
    %503 = arith.mulf %502, %488 : vector<8x256xf32>
    %504 = arith.addf %484, %503 : vector<8x256xf32>
    %c0_123 = arith.constant 0 : index
    %c144_124 = arith.constant 144 : index
    %505 = vector.load %arg6[%c0_123, %c144_124] : memref<8x512xf32, #tpu.memory_space<vmem>>, vector<8x256xf32>
    %c7_125 = arith.constant 7 : index
    %c0_126 = arith.constant 0 : index
    %c0_127 = arith.constant 0 : index
    %506 = vector.load %arg4[%c7_125, %c0_126, %c0_127] : memref<9x8x256xf32, #tpu.memory_space<vmem>>, vector<1x8x256xf32>
    %507 = vector.shape_cast %506 : vector<1x8x256xf32> to vector<8x256xf32>
    %508 = arith.mulf %505, %507 : vector<8x256xf32>
    %c25 = arith.constant 25 : index
    %509 = memref.load %arg2[%c25] : memref<144xf32, #tpu.memory_space<smem>>
    %510 = vector.broadcast %509 : f32 to vector<8x256xf32>
    %511 = arith.mulf %510, %508 : vector<8x256xf32>
    %512 = arith.addf %492, %511 : vector<8x256xf32>
    %c61 = arith.constant 61 : index
    %513 = memref.load %arg2[%c61] : memref<144xf32, #tpu.memory_space<smem>>
    %514 = vector.broadcast %513 : f32 to vector<8x256xf32>
    %515 = arith.mulf %514, %508 : vector<8x256xf32>
    %516 = arith.addf %496, %515 : vector<8x256xf32>
    %c97 = arith.constant 97 : index
    %517 = memref.load %arg2[%c97] : memref<144xf32, #tpu.memory_space<smem>>
    %518 = vector.broadcast %517 : f32 to vector<8x256xf32>
    %519 = arith.mulf %518, %508 : vector<8x256xf32>
    %520 = arith.addf %500, %519 : vector<8x256xf32>
    %c133 = arith.constant 133 : index
    %521 = memref.load %arg2[%c133] : memref<144xf32, #tpu.memory_space<smem>>
    %522 = vector.broadcast %521 : f32 to vector<8x256xf32>
    %523 = arith.mulf %522, %508 : vector<8x256xf32>
    %524 = arith.addf %504, %523 : vector<8x256xf32>
    %c0_128 = arith.constant 0 : index
    %c145_129 = arith.constant 145 : index
    %525 = vector.load %arg6[%c0_128, %c145_129] : memref<8x512xf32, #tpu.memory_space<vmem>>, vector<8x256xf32>
    %c8_130 = arith.constant 8 : index
    %c0_131 = arith.constant 0 : index
    %c0_132 = arith.constant 0 : index
    %526 = vector.load %arg4[%c8_130, %c0_131, %c0_132] : memref<9x8x256xf32, #tpu.memory_space<vmem>>, vector<1x8x256xf32>
    %527 = vector.shape_cast %526 : vector<1x8x256xf32> to vector<8x256xf32>
    %528 = arith.mulf %525, %527 : vector<8x256xf32>
    %c26 = arith.constant 26 : index
    %529 = memref.load %arg2[%c26] : memref<144xf32, #tpu.memory_space<smem>>
    %530 = vector.broadcast %529 : f32 to vector<8x256xf32>
    %531 = arith.mulf %530, %528 : vector<8x256xf32>
    %532 = arith.addf %512, %531 : vector<8x256xf32>
    %c62 = arith.constant 62 : index
    %533 = memref.load %arg2[%c62] : memref<144xf32, #tpu.memory_space<smem>>
    %534 = vector.broadcast %533 : f32 to vector<8x256xf32>
    %535 = arith.mulf %534, %528 : vector<8x256xf32>
    %536 = arith.addf %516, %535 : vector<8x256xf32>
    %c98 = arith.constant 98 : index
    %537 = memref.load %arg2[%c98] : memref<144xf32, #tpu.memory_space<smem>>
    %538 = vector.broadcast %537 : f32 to vector<8x256xf32>
    %539 = arith.mulf %538, %528 : vector<8x256xf32>
    %540 = arith.addf %520, %539 : vector<8x256xf32>
    %c134 = arith.constant 134 : index
    %541 = memref.load %arg2[%c134] : memref<144xf32, #tpu.memory_space<smem>>
    %542 = vector.broadcast %541 : f32 to vector<8x256xf32>
    %543 = arith.mulf %542, %528 : vector<8x256xf32>
    %544 = arith.addf %524, %543 : vector<8x256xf32>
    %545 = arith.index_cast %7 : i32 to index
    %c768_133 = arith.constant 768 : index
    %546 = vector.load %arg1[%545, %c768_133] : memref<8x1024xf32, #tpu.memory_space<vmem>>, vector<8x256xf32>
    %c0_134 = arith.constant 0 : index
    %c128_135 = arith.constant 128 : index
    %547 = vector.load %arg6[%c0_134, %c128_135] : memref<8x512xf32, #tpu.memory_space<vmem>>, vector<8x256xf32>
    tpu.vector_store %arg6[%c0_134, %c128_135], %546 {strides = array<i32>} : memref<8x512xf32, #tpu.memory_space<vmem>>, vector<8x256xf32>,
    %c0_136 = arith.constant 0 : index
    %c111_137 = arith.constant 111 : index
    %548 = vector.load %arg6[%c0_136, %c111_137] : memref<8x512xf32, #tpu.memory_space<vmem>>, vector<8x256xf32>
    %c0_138 = arith.constant 0 : index
    %c0_139 = arith.constant 0 : index
    %c0_140 = arith.constant 0 : index
    %549 = vector.load %arg4[%c0_138, %c0_139, %c0_140] : memref<9x8x256xf32, #tpu.memory_space<vmem>>, vector<1x8x256xf32>
    %550 = vector.shape_cast %549 : vector<1x8x256xf32> to vector<8x256xf32>
    %551 = arith.mulf %548, %550 : vector<8x256xf32>
    %c27 = arith.constant 27 : index
    %552 = memref.load %arg2[%c27] : memref<144xf32, #tpu.memory_space<smem>>
    %553 = vector.broadcast %552 : f32 to vector<8x256xf32>
    %554 = arith.mulf %553, %551 : vector<8x256xf32>
    %555 = arith.addf %532, %554 : vector<8x256xf32>
    %c63 = arith.constant 63 : index
    %556 = memref.load %arg2[%c63] : memref<144xf32, #tpu.memory_space<smem>>
    %557 = vector.broadcast %556 : f32 to vector<8x256xf32>
    %558 = arith.mulf %557, %551 : vector<8x256xf32>
    %559 = arith.addf %536, %558 : vector<8x256xf32>
    %c99 = arith.constant 99 : index
    %560 = memref.load %arg2[%c99] : memref<144xf32, #tpu.memory_space<smem>>
    %561 = vector.broadcast %560 : f32 to vector<8x256xf32>
    %562 = arith.mulf %561, %551 : vector<8x256xf32>
    %563 = arith.addf %540, %562 : vector<8x256xf32>
    %c135 = arith.constant 135 : index
    %564 = memref.load %arg2[%c135] : memref<144xf32, #tpu.memory_space<smem>>
    %565 = vector.broadcast %564 : f32 to vector<8x256xf32>
    %566 = arith.mulf %565, %551 : vector<8x256xf32>
    %567 = arith.addf %544, %566 : vector<8x256xf32>
    %c0_141 = arith.constant 0 : index
    %c112_142 = arith.constant 112 : index
    %568 = vector.load %arg6[%c0_141, %c112_142] : memref<8x512xf32, #tpu.memory_space<vmem>>, vector<8x256xf32>
    %c1_143 = arith.constant 1 : index
    %c0_144 = arith.constant 0 : index
    %c0_145 = arith.constant 0 : index
    %569 = vector.load %arg4[%c1_143, %c0_144, %c0_145] : memref<9x8x256xf32, #tpu.memory_space<vmem>>, vector<1x8x256xf32>
    %570 = vector.shape_cast %569 : vector<1x8x256xf32> to vector<8x256xf32>
    %571 = arith.mulf %568, %570 : vector<8x256xf32>
    %c28 = arith.constant 28 : index
    %572 = memref.load %arg2[%c28] : memref<144xf32, #tpu.memory_space<smem>>
    %573 = vector.broadcast %572 : f32 to vector<8x256xf32>
    %574 = arith.mulf %573, %571 : vector<8x256xf32>
    %575 = arith.addf %555, %574 : vector<8x256xf32>
    %c64 = arith.constant 64 : index
    %576 = memref.load %arg2[%c64] : memref<144xf32, #tpu.memory_space<smem>>
    %577 = vector.broadcast %576 : f32 to vector<8x256xf32>
    %578 = arith.mulf %577, %571 : vector<8x256xf32>
    %579 = arith.addf %559, %578 : vector<8x256xf32>
    %c100 = arith.constant 100 : index
    %580 = memref.load %arg2[%c100] : memref<144xf32, #tpu.memory_space<smem>>
    %581 = vector.broadcast %580 : f32 to vector<8x256xf32>
    %582 = arith.mulf %581, %571 : vector<8x256xf32>
    %583 = arith.addf %563, %582 : vector<8x256xf32>
    %c136 = arith.constant 136 : index
    %584 = memref.load %arg2[%c136] : memref<144xf32, #tpu.memory_space<smem>>
    %585 = vector.broadcast %584 : f32 to vector<8x256xf32>
    %586 = arith.mulf %585, %571 : vector<8x256xf32>
    %587 = arith.addf %567, %586 : vector<8x256xf32>
    %c0_146 = arith.constant 0 : index
    %c113_147 = arith.constant 113 : index
    %588 = vector.load %arg6[%c0_146, %c113_147] : memref<8x512xf32, #tpu.memory_space<vmem>>, vector<8x256xf32>
    %c2_148 = arith.constant 2 : index
    %c0_149 = arith.constant 0 : index
    %c0_150 = arith.constant 0 : index
    %589 = vector.load %arg4[%c2_148, %c0_149, %c0_150] : memref<9x8x256xf32, #tpu.memory_space<vmem>>, vector<1x8x256xf32>
    %590 = vector.shape_cast %589 : vector<1x8x256xf32> to vector<8x256xf32>
    %591 = arith.mulf %588, %590 : vector<8x256xf32>
    %c29 = arith.constant 29 : index
    %592 = memref.load %arg2[%c29] : memref<144xf32, #tpu.memory_space<smem>>
    %593 = vector.broadcast %592 : f32 to vector<8x256xf32>
    %594 = arith.mulf %593, %591 : vector<8x256xf32>
    %595 = arith.addf %575, %594 : vector<8x256xf32>
    %c65 = arith.constant 65 : index
    %596 = memref.load %arg2[%c65] : memref<144xf32, #tpu.memory_space<smem>>
    %597 = vector.broadcast %596 : f32 to vector<8x256xf32>
    %598 = arith.mulf %597, %591 : vector<8x256xf32>
    %599 = arith.addf %579, %598 : vector<8x256xf32>
    %c101 = arith.constant 101 : index
    %600 = memref.load %arg2[%c101] : memref<144xf32, #tpu.memory_space<smem>>
    %601 = vector.broadcast %600 : f32 to vector<8x256xf32>
    %602 = arith.mulf %601, %591 : vector<8x256xf32>
    %603 = arith.addf %583, %602 : vector<8x256xf32>
    %c137 = arith.constant 137 : index
    %604 = memref.load %arg2[%c137] : memref<144xf32, #tpu.memory_space<smem>>
    %605 = vector.broadcast %604 : f32 to vector<8x256xf32>
    %606 = arith.mulf %605, %591 : vector<8x256xf32>
    %607 = arith.addf %587, %606 : vector<8x256xf32>
    %c0_151 = arith.constant 0 : index
    %c127_152 = arith.constant 127 : index
    %608 = vector.load %arg6[%c0_151, %c127_152] : memref<8x512xf32, #tpu.memory_space<vmem>>, vector<8x256xf32>
    %c3_153 = arith.constant 3 : index
    %c0_154 = arith.constant 0 : index
    %c0_155 = arith.constant 0 : index
    %609 = vector.load %arg4[%c3_153, %c0_154, %c0_155] : memref<9x8x256xf32, #tpu.memory_space<vmem>>, vector<1x8x256xf32>
    %610 = vector.shape_cast %609 : vector<1x8x256xf32> to vector<8x256xf32>
    %611 = arith.mulf %608, %610 : vector<8x256xf32>
    %c30 = arith.constant 30 : index
    %612 = memref.load %arg2[%c30] : memref<144xf32, #tpu.memory_space<smem>>
    %613 = vector.broadcast %612 : f32 to vector<8x256xf32>
    %614 = arith.mulf %613, %611 : vector<8x256xf32>
    %615 = arith.addf %595, %614 : vector<8x256xf32>
    %c66 = arith.constant 66 : index
    %616 = memref.load %arg2[%c66] : memref<144xf32, #tpu.memory_space<smem>>
    %617 = vector.broadcast %616 : f32 to vector<8x256xf32>
    %618 = arith.mulf %617, %611 : vector<8x256xf32>
    %619 = arith.addf %599, %618 : vector<8x256xf32>
    %c102 = arith.constant 102 : index
    %620 = memref.load %arg2[%c102] : memref<144xf32, #tpu.memory_space<smem>>
    %621 = vector.broadcast %620 : f32 to vector<8x256xf32>
    %622 = arith.mulf %621, %611 : vector<8x256xf32>
    %623 = arith.addf %603, %622 : vector<8x256xf32>
    %c138 = arith.constant 138 : index
    %624 = memref.load %arg2[%c138] : memref<144xf32, #tpu.memory_space<smem>>
    %625 = vector.broadcast %624 : f32 to vector<8x256xf32>
    %626 = arith.mulf %625, %611 : vector<8x256xf32>
    %627 = arith.addf %607, %626 : vector<8x256xf32>
    %c31 = arith.constant 31 : index
    %628 = memref.load %arg2[%c31] : memref<144xf32, #tpu.memory_space<smem>>
    %629 = vector.broadcast %628 : f32 to vector<8x256xf32>
    %630 = arith.mulf %629, %546 : vector<8x256xf32>
    %631 = arith.addf %615, %630 : vector<8x256xf32>
    %c67 = arith.constant 67 : index
    %632 = memref.load %arg2[%c67] : memref<144xf32, #tpu.memory_space<smem>>
    %633 = vector.broadcast %632 : f32 to vector<8x256xf32>
    %634 = arith.mulf %633, %546 : vector<8x256xf32>
    %635 = arith.addf %619, %634 : vector<8x256xf32>
    %c103 = arith.constant 103 : index
    %636 = memref.load %arg2[%c103] : memref<144xf32, #tpu.memory_space<smem>>
    %637 = vector.broadcast %636 : f32 to vector<8x256xf32>
    %638 = arith.mulf %637, %546 : vector<8x256xf32>
    %639 = arith.addf %623, %638 : vector<8x256xf32>
    %c139 = arith.constant 139 : index
    %640 = memref.load %arg2[%c139] : memref<144xf32, #tpu.memory_space<smem>>
    %641 = vector.broadcast %640 : f32 to vector<8x256xf32>
    %642 = arith.mulf %641, %546 : vector<8x256xf32>
    %643 = arith.addf %627, %642 : vector<8x256xf32>
    %c0_156 = arith.constant 0 : index
    %c129_157 = arith.constant 129 : index
    %644 = vector.load %arg6[%c0_156, %c129_157] : memref<8x512xf32, #tpu.memory_space<vmem>>, vector<8x256xf32>
    %c5_158 = arith.constant 5 : index
    %c0_159 = arith.constant 0 : index
    %c0_160 = arith.constant 0 : index
    %645 = vector.load %arg4[%c5_158, %c0_159, %c0_160] : memref<9x8x256xf32, #tpu.memory_space<vmem>>, vector<1x8x256xf32>
    %646 = vector.shape_cast %645 : vector<1x8x256xf32> to vector<8x256xf32>
    %647 = arith.mulf %644, %646 : vector<8x256xf32>
    %c32 = arith.constant 32 : index
    %648 = memref.load %arg2[%c32] : memref<144xf32, #tpu.memory_space<smem>>
    %649 = vector.broadcast %648 : f32 to vector<8x256xf32>
    %650 = arith.mulf %649, %647 : vector<8x256xf32>
    %651 = arith.addf %631, %650 : vector<8x256xf32>
    %c68 = arith.constant 68 : index
    %652 = memref.load %arg2[%c68] : memref<144xf32, #tpu.memory_space<smem>>
    %653 = vector.broadcast %652 : f32 to vector<8x256xf32>
    %654 = arith.mulf %653, %647 : vector<8x256xf32>
    %655 = arith.addf %635, %654 : vector<8x256xf32>
    %c104 = arith.constant 104 : index
    %656 = memref.load %arg2[%c104] : memref<144xf32, #tpu.memory_space<smem>>
    %657 = vector.broadcast %656 : f32 to vector<8x256xf32>
    %658 = arith.mulf %657, %647 : vector<8x256xf32>
    %659 = arith.addf %639, %658 : vector<8x256xf32>
    %c140 = arith.constant 140 : index
    %660 = memref.load %arg2[%c140] : memref<144xf32, #tpu.memory_space<smem>>
    %661 = vector.broadcast %660 : f32 to vector<8x256xf32>
    %662 = arith.mulf %661, %647 : vector<8x256xf32>
    %663 = arith.addf %643, %662 : vector<8x256xf32>
    %c0_161 = arith.constant 0 : index
    %c143_162 = arith.constant 143 : index
    %664 = vector.load %arg6[%c0_161, %c143_162] : memref<8x512xf32, #tpu.memory_space<vmem>>, vector<8x256xf32>
    %c6_163 = arith.constant 6 : index
    %c0_164 = arith.constant 0 : index
    %c0_165 = arith.constant 0 : index
    %665 = vector.load %arg4[%c6_163, %c0_164, %c0_165] : memref<9x8x256xf32, #tpu.memory_space<vmem>>, vector<1x8x256xf32>
    %666 = vector.shape_cast %665 : vector<1x8x256xf32> to vector<8x256xf32>
    %667 = arith.mulf %664, %666 : vector<8x256xf32>
    %c33 = arith.constant 33 : index
    %668 = memref.load %arg2[%c33] : memref<144xf32, #tpu.memory_space<smem>>
    %669 = vector.broadcast %668 : f32 to vector<8x256xf32>
    %670 = arith.mulf %669, %667 : vector<8x256xf32>
    %671 = arith.addf %651, %670 : vector<8x256xf32>
    %c69 = arith.constant 69 : index
    %672 = memref.load %arg2[%c69] : memref<144xf32, #tpu.memory_space<smem>>
    %673 = vector.broadcast %672 : f32 to vector<8x256xf32>
    %674 = arith.mulf %673, %667 : vector<8x256xf32>
    %675 = arith.addf %655, %674 : vector<8x256xf32>
    %c105 = arith.constant 105 : index
    %676 = memref.load %arg2[%c105] : memref<144xf32, #tpu.memory_space<smem>>
    %677 = vector.broadcast %676 : f32 to vector<8x256xf32>
    %678 = arith.mulf %677, %667 : vector<8x256xf32>
    %679 = arith.addf %659, %678 : vector<8x256xf32>
    %c141 = arith.constant 141 : index
    %680 = memref.load %arg2[%c141] : memref<144xf32, #tpu.memory_space<smem>>
    %681 = vector.broadcast %680 : f32 to vector<8x256xf32>
    %682 = arith.mulf %681, %667 : vector<8x256xf32>
    %683 = arith.addf %663, %682 : vector<8x256xf32>
    %c0_166 = arith.constant 0 : index
    %c144_167 = arith.constant 144 : index
    %684 = vector.load %arg6[%c0_166, %c144_167] : memref<8x512xf32, #tpu.memory_space<vmem>>, vector<8x256xf32>
    %c7_168 = arith.constant 7 : index
    %c0_169 = arith.constant 0 : index
    %c0_170 = arith.constant 0 : index
    %685 = vector.load %arg4[%c7_168, %c0_169, %c0_170] : memref<9x8x256xf32, #tpu.memory_space<vmem>>, vector<1x8x256xf32>
    %686 = vector.shape_cast %685 : vector<1x8x256xf32> to vector<8x256xf32>
    %687 = arith.mulf %684, %686 : vector<8x256xf32>
    %c34 = arith.constant 34 : index
    %688 = memref.load %arg2[%c34] : memref<144xf32, #tpu.memory_space<smem>>
    %689 = vector.broadcast %688 : f32 to vector<8x256xf32>
    %690 = arith.mulf %689, %687 : vector<8x256xf32>
    %691 = arith.addf %671, %690 : vector<8x256xf32>
    %c70 = arith.constant 70 : index
    %692 = memref.load %arg2[%c70] : memref<144xf32, #tpu.memory_space<smem>>
    %693 = vector.broadcast %692 : f32 to vector<8x256xf32>
    %694 = arith.mulf %693, %687 : vector<8x256xf32>
    %695 = arith.addf %675, %694 : vector<8x256xf32>
    %c106 = arith.constant 106 : index
    %696 = memref.load %arg2[%c106] : memref<144xf32, #tpu.memory_space<smem>>
    %697 = vector.broadcast %696 : f32 to vector<8x256xf32>
    %698 = arith.mulf %697, %687 : vector<8x256xf32>
    %699 = arith.addf %679, %698 : vector<8x256xf32>
    %c142 = arith.constant 142 : index
    %700 = memref.load %arg2[%c142] : memref<144xf32, #tpu.memory_space<smem>>
    %701 = vector.broadcast %700 : f32 to vector<8x256xf32>
    %702 = arith.mulf %701, %687 : vector<8x256xf32>
    %703 = arith.addf %683, %702 : vector<8x256xf32>
    %c0_171 = arith.constant 0 : index
    %c145_172 = arith.constant 145 : index
    %704 = vector.load %arg6[%c0_171, %c145_172] : memref<8x512xf32, #tpu.memory_space<vmem>>, vector<8x256xf32>
    %c8_173 = arith.constant 8 : index
    %c0_174 = arith.constant 0 : index
    %c0_175 = arith.constant 0 : index
    %705 = vector.load %arg4[%c8_173, %c0_174, %c0_175] : memref<9x8x256xf32, #tpu.memory_space<vmem>>, vector<1x8x256xf32>
    %706 = vector.shape_cast %705 : vector<1x8x256xf32> to vector<8x256xf32>
    %707 = arith.mulf %704, %706 : vector<8x256xf32>
    %c35 = arith.constant 35 : index
    %708 = memref.load %arg2[%c35] : memref<144xf32, #tpu.memory_space<smem>>
    %709 = vector.broadcast %708 : f32 to vector<8x256xf32>
    %710 = arith.mulf %709, %707 : vector<8x256xf32>
    %711 = arith.addf %691, %710 : vector<8x256xf32>
    %c71 = arith.constant 71 : index
    %712 = memref.load %arg2[%c71] : memref<144xf32, #tpu.memory_space<smem>>
    %713 = vector.broadcast %712 : f32 to vector<8x256xf32>
    %714 = arith.mulf %713, %707 : vector<8x256xf32>
    %715 = arith.addf %695, %714 : vector<8x256xf32>
    %c107 = arith.constant 107 : index
    %716 = memref.load %arg2[%c107] : memref<144xf32, #tpu.memory_space<smem>>
    %717 = vector.broadcast %716 : f32 to vector<8x256xf32>
    %718 = arith.mulf %717, %707 : vector<8x256xf32>
    %719 = arith.addf %699, %718 : vector<8x256xf32>
    %c143_176 = arith.constant 143 : index
    %720 = memref.load %arg2[%c143_176] : memref<144xf32, #tpu.memory_space<smem>>
    %721 = vector.broadcast %720 : f32 to vector<8x256xf32>
    %722 = arith.mulf %721, %707 : vector<8x256xf32>
    %723 = arith.addf %703, %722 : vector<8x256xf32>
    %724 = arith.index_cast %7 : i32 to index
    %c0_177 = arith.constant 0 : index
    %725 = vector.load %arg5[%724, %c0_177] : memref<8x1024xf32, #tpu.memory_space<vmem>>, vector<8x256xf32>
    tpu.vector_store %arg5[%724, %c0_177], %711 {strides = array<i32>} : memref<8x1024xf32, #tpu.memory_space<vmem>>, vector<8x256xf32>,
    %726 = arith.index_cast %7 : i32 to index
    %c256_178 = arith.constant 256 : index
    %727 = vector.load %arg5[%726, %c256_178] : memref<8x1024xf32, #tpu.memory_space<vmem>>, vector<8x256xf32>
    tpu.vector_store %arg5[%726, %c256_178], %715 {strides = array<i32>} : memref<8x1024xf32, #tpu.memory_space<vmem>>, vector<8x256xf32>,
    %728 = arith.index_cast %7 : i32 to index
    %c512_179 = arith.constant 512 : index
    %729 = vector.load %arg5[%728, %c512_179] : memref<8x1024xf32, #tpu.memory_space<vmem>>, vector<8x256xf32>
    tpu.vector_store %arg5[%728, %c512_179], %719 {strides = array<i32>} : memref<8x1024xf32, #tpu.memory_space<vmem>>, vector<8x256xf32>,
    %730 = arith.index_cast %7 : i32 to index
    %c768_180 = arith.constant 768 : index
    %731 = vector.load %arg5[%730, %c768_180] : memref<8x1024xf32, #tpu.memory_space<vmem>>, vector<8x256xf32>
    tpu.vector_store %arg5[%730, %c768_180], %723 {strides = array<i32>} : memref<8x1024xf32, #tpu.memory_space<vmem>>, vector<8x256xf32>,
    %c1_i32 = arith.constant 1 : i32
    return
  }
  func.func @transform_0(%arg0: i32) -> (i32, i32) {
    %c0_i32 = arith.constant 0 : i32
    %c0_i32_0 = arith.constant 0 : i32
    return %arg0, %c0_i32 : i32, i32
  }
  func.func @transform_1(%arg0: i32) -> i32 {
    %c0_i32 = arith.constant 0 : i32
    %c0_i32_0 = arith.constant 0 : i32
    return %c0_i32 : i32
  }
  func.func @transform_2(%arg0: i32) -> (i32, i32) {
    %c0_i32 = arith.constant 0 : i32
    %c0_i32_0 = arith.constant 0 : i32
    %c0_i32_1 = arith.constant 0 : i32
    return %c0_i32, %c0_i32_0 : i32, i32
  }
  func.func @transform_3(%arg0: i32) -> (i32, i32, i32) {
    %c0_i32 = arith.constant 0 : i32
    %c0_i32_0 = arith.constant 0 : i32
    %c0_i32_1 = arith.constant 0 : i32
    %c0_i32_2 = arith.constant 0 : i32
    return %c0_i32, %c0_i32_0, %c0_i32_1 : i32, i32, i32
  }
  func.func @transform_4(%arg0: i32) -> (i32, i32) {
    %c0_i32 = arith.constant 0 : i32
    %c0_i32_0 = arith.constant 0 : i32
    return %arg0, %c0_i32 : i32, i32
  }
}

</mosaic_0001>

<bundles_post_ra>
// kernel: zero_conv2d_forward.1
= control target key start
LH: loop header
LB: loop body
LE: loop exit
PB: predicated region body
PF: predicated region fallthrough
CT: control target
= control target key end

     0   :  { %9 = vsyncpa [#allocation4], 0  ;;  %s5963_s0 = inlined_call_operand.vmem [shape: f32[8,1024], index: 0, kind: input, shape index: {}]   ;;  %s5964_s1 = inlined_call_operand.vmem [shape: f32[144], index: 1, kind: input, shape index: {}]   ;;  %s5965_s2 = inlined_call_operand.vmem [shape: f32[8,1024], index: 2, kind: input, shape index: {}]   ;;  %s5966_s3 = inlined_call_operand.vmem [shape: f32[9,8,256], index: 3, kind: input, shape index: {}]   ;;  %s5967_s4 = inlined_call_operand.vmem [shape: f32[8,1024], index: 4, kind: output, shape index: {}]  }
   0x1   :  { %s18_s17 = sshll.u32 %s5964_s1, 4  ;;  %s19_s17 = int_to_ptr.vmem [resolvable:$true] %s18_s17 }
   0x2   :  { %s3473_s18 = scalar_lea.vmem %s19_s17, 32  ;;  %p3478_p1 = scmp.lt.s32.totalorder %s19_s17, %s19_s17 }
   0x3   :  { %p3474_p0 = scmp.ne.s32.totalorder %s19_s17, %s3473_s18  ;;  %p3479_p2 = scmp.lt.s32.totalorder %s3473_s18, %s3473_s18 }
   0x5   :  { %p3480_p3 = por %p3479_p2, %p3478_p1 }
   0x7   :  { %p3481_p4 = pnand %p3480_p3, %p3474_p0 }
   0x9   :  { %3484 = shalt.err (!%p3481_p4)
}
   0xa   :  { %s3487_s19 = smov [#allocation3]  }
   0xb   :  { %21 = dma.vmem_to_smem %s19_s17, 32, %s3487_s19, [#allocation4]  }
   0xc   :  { %3485 = dma.done.wait [#allocation4], 32  }
   0xd   :  { %3486 = vsyncadd [#allocation4], 4294967264 }
   0xe   :  { %29 = sfence }
   0xf   :  { %v52_v0 = vld [vmem:[%s5966_s3] sm:$0xff]  ;;  %s3488_s22 = smov 111   ;;  %v3255_v1 = vld [vmem:[%s5966_s3 + $0x18] sm:$0xff]  ;;  %v53_v2 = vld [vmem:[%s5966_s3 + $0x8] sm:$0xff]  ;;  %s3489_s26 = smov 112   ;;  %vm60_vm0 = vcmask 908288  }
  0x10   :  { %56 = vrot.lane.b32.xlu0 %v52_v0, %s3488_s22  ;;  %156 = vrot.lane.b32.xlu1 %v3255_v1, %s3489_s26  ;;  %v3261_v3 = vld [vmem:[%s5966_s3 + $0x28] sm:$0xff]  ;;  %v3254_v4 = vld [vmem:[%s5966_s3 + $0x10] sm:$0xff]  ;;  %s3490_s5 = smov 113   ;;  %s3491_s10 = smov 127   ;;  %vm158_vm1 = vcmask 916480   ;;  %vm256_vm2 = vcmask 924672  }
  0x11   :  { %v3267_v5 = vld [vmem:[%s5966_s3 + $0x38] sm:$0xff]  ;;  %v3260_v6 = vld [vmem:[%s5966_s3 + $0x20] sm:$0xff]  ;;  %v3266_v8 = vld [vmem:[%s5966_s3 + $0x30] sm:$0xff]  ;;  %s3492_s15 = smov 1   ;;  %s68_s18 = sld [smem:[#allocation3]]  ;;  %vm354_vm3 = vcmask 1039360  }
  0x12   :  { %v3277_v7 = vld [vmem:[%s5966_s3 + $0x58] sm:$0xff]  ;;  %v3276_v9 = vld [vmem:[%s5966_s3 + $0x50] sm:$0xff]  ;;  %s3251_s19 = sld [smem:[#allocation3 + $0x24]]  ;;  %s3252_s20 = sld [smem:[#allocation3 + $0x48]]  ;;  %v3572_v13 = vld [vmem:[%s5963_s0 + $0x8] sm:$0xff]  ;;  %vm376_vm4 = vcmask 7168  }
  0x13   :  { %s3253_s23 = sld [smem:[#allocation3 + $0x6c]]  ;;  %s3493_s24 = smov 17   ;;  %vm278_vm5 = vcmask 121856   ;;  %vm180_vm6 = vcmask 130048   ;;  %vm82_vm7 = vcmask 138240  }
  0x14   :  { %58 = vrot.lane.b32.xlu0 %v53_v2, %s3488_s22  ;;  %254 = vrot.lane.b32.xlu1 %v3261_v3, %s3490_s5  ;;  %s3256_s25 = sld [smem:[#allocation3 + $0x1]]  ;;  %s3257_s27 = sld [smem:[#allocation3 + $0x25]] }
  0x15   :  { %s3258_s28 = sld [smem:[#allocation3 + $0x49]]  ;;  %s3259_s29 = sld [smem:[#allocation3 + $0x6d]] }
  0x16   :  { %s3494_s30 = smov 16   ;;  %s3262_s6 = sld [smem:[#allocation3 + $0x2]] }
  0x17   :  { %v3566_v11 = vstv %s68_s18  ;;  %s3263_s7 = sld [smem:[#allocation3 + $0x26]]  ;;  %s3264_s8 = sld [smem:[#allocation3 + $0x4a]] }
  0x18   :  { %154 = vrot.lane.b32.xlu0 %v3254_v4, %s3489_s26  ;;  %352 = vrot.lane.b32.xlu1 %v3267_v5, %s3491_s10  ;;  %v3577_v16 = vstv %s3251_s19  ;;  %v3584_v20 = vstv %s3252_s20  ;;  %s3265_s9 = sld [smem:[#allocation3 + $0x6e]]  ;;  %s3495_s11 = smov 15  }
  0x19   :  { %v3592_v24 = vstv %s3253_s23  ;;  %s3268_s12 = sld [smem:[#allocation3 + $0x3]]  ;;  %s3269_s13 = sld [smem:[#allocation3 + $0x27]] }
  0x1a   :  { %v3599_v27 = vstv %s3256_s25  ;;  %v3608_v32 = vstv %s3257_s27  ;;  %s3270_s14 = sld [smem:[#allocation3 + $0x4b]]  ;;  %s3271_s16 = sld [smem:[#allocation3 + $0x6f]] }
  0x1b   :  { %v3615_v36 = vstv %s3258_s28  ;;  %v3623_v40 = vstv %s3259_s29  ;;  %s3278_s17 = sld [smem:[#allocation3 + $0x5]]  ;;  %s3279_s18 = sld [smem:[#allocation3 + $0x29]] }
  0x1c   :  { %252 = vrot.lane.b32.xlu0 %v3260_v6, %s3490_s5  ;;  %477 = vrot.lane.b32.xlu1 %v3277_v7, %s3492_s15  ;;  %v3630_v43 = vstv %s3262_s6  ;;  %s3280_s21 = sld [smem:[#allocation3 + $0x4d]]  ;;  %s3281_s1 = sld [smem:[#allocation3 + $0x71]] }
  0x1d   :  { %v3639_v48 = vstv %s3263_s7  ;;  %v3646_v52 = vstv %s3264_s8  ;;  %s3284_s29 = sld [smem:[#allocation3 + $0x6]]  ;;  %s3285_s6 = sld [smem:[#allocation3 + $0x2a]] }
  0x1e   :  { %v3654_v56 = vstv %s3265_s9  ;;  %s3286_s7 = sld [smem:[#allocation3 + $0x4e]]  ;;  %s3287_s8 = sld [smem:[#allocation3 + $0x72]] }
  0x1f   :  { %v3661_v59 = vstv %s3268_s12  ;;  %v3670_v0 = vstv %s3269_s13  ;;  %s3293_s19 = sld [smem:[#allocation3 + $0x73]]  ;;  %s3296_s25 = sld [smem:[#allocation3 + $0x8]] }
  0x20   :  { %350 = vrot.lane.b32.xlu0 %v3266_v8, %s3491_s10  ;;  %v3677_v4 = vstv %s3270_s14  ;;  %v3688_v8 = vld [vmem:[%s5963_s0] sm:$0xff]  ;;  %s3297_s27 = sld [smem:[#allocation3 + $0x2c]]  ;;  %s3298_s28 = sld [smem:[#allocation3 + $0x50]] }
  0x21   :  { %s3300_s12 = sld [smem:[#allocation3 + $0x9]]  ;;  %s3301_s13 = sld [smem:[#allocation3 + $0x2d]] }
  0x22   :  { %s3303_s20 = sld [smem:[#allocation3 + $0x75]]  ;;  %s3313_s14 = sld [smem:[#allocation3 + $0x2f]] }
  0x23   :  { %s3319_s23 = sld [smem:[#allocation3 + $0x30]]  ;;  %s3329_s9 = sld [smem:[#allocation3 + $0x32]] }
  0x24   :  { %475 = vrot.lane.b32.xlu0 %v3276_v9, %s3492_s15  ;;  %v3690_v9 = vstv %s3271_s16  ;;  %s3290_s16 = sld [smem:[#allocation3 + $0x7]] }
  0x82   :  { %v3564_v10 = vpop.permute.xlu0 %56  ;;  %v3597_v26 = vpop.permute.xlu1 %156 }
  0x83   :  { %v65_v12 = vmul.f32 0.0, %v3564_v10  ;;  %v165_v30 = vmul.f32 %v3597_v26, %v3572_v13 }
  0x85   :  { %v70_v14 = vmul.f32 %v3566_v11, %v65_v12  ;;  %v91_v18 = vmul.f32 %v3577_v16, %v65_v12  ;;  %v111_v23 = vmul.f32 %v3584_v20, %v65_v12  ;;  %v131_v28 = vmul.f32 %v3592_v24, %v65_v12 }
  0x86   :  { %v3575_v15 = vpop.permute.xlu0 %58  ;;  %v170_v35 = vmul.f32 %v3599_v27, %v165_v30  ;;  %v191_v37 = vmul.f32 %v3608_v32, %v165_v30  ;;  %v3628_v42 = vpop.permute.xlu1 %254  ;;  %v211_v45 = vmul.f32 %v3615_v36, %v165_v30  ;;  %v231_v49 = vmul.f32 %v3623_v40, %v165_v30 }
  0x87   :  { %v67_v17 = vmul.f32 %v3575_v15, %v3572_v13  ;;  %76 = vrot.lane.b32.xlu1 %v70_v14, %s3493_s24  ;;  %v263_v46 = vmul.f32 %v3628_v42, %v3572_v13 }
  0x89   :  { %v72_v19 = vmul.f32 %v3566_v11, %v67_v17  ;;  %v93_v21 = vmul.f32 %v3577_v16, %v67_v17  ;;  %v113_v29 = vmul.f32 %v3584_v20, %v67_v17  ;;  %v133_v33 = vmul.f32 %v3592_v24, %v67_v17 }
  0x8a   :  { %v3589_v22 = vpop.permute.xlu0 %154  ;;  %v268_v51 = vmul.f32 %v3630_v43, %v263_v46  ;;  %v289_v53 = vmul.f32 %v3639_v48, %v263_v46  ;;  %v3659_v58 = vpop.permute.xlu1 %352  ;;  %v309_v61 = vmul.f32 %v3646_v52, %v263_v46  ;;  %v329_v1 = vmul.f32 %v3654_v56, %v263_v46 }
  0x8b   :  { %97 = vrot.lane.b32.xlu1 %v91_v18, %s3493_s24  ;;  %80 = vrot.lane.b32.xlu0 %v72_v19, %s3493_s24  ;;  %v163_v25 = vmul.f32 0.0, %v3589_v22  ;;  %v361_v62 = vmul.f32 %v3659_v58, %v3572_v13  ;;  %v3698_v17 = vstv %s3278_s17  ;;  %s3291_s17 = sld [smem:[#allocation3 + $0x2b]] }
  0x8d   :  { %v168_v31 = vmul.f32 %v3599_v27, %v163_v25  ;;  %v189_v34 = vmul.f32 %v3608_v32, %v163_v25  ;;  %v209_v39 = vmul.f32 %v3615_v36, %v163_v25  ;;  %v229_v44 = vmul.f32 %v3623_v40, %v163_v25 }
  0x8e   :  { %v3620_v38 = vpop.permute.xlu0 %252  ;;  %v366_v3 = vmul.f32 %v3661_v59, %v361_v62  ;;  %v387_v5 = vmul.f32 %v3670_v0, %v361_v62  ;;  %v478_v14 = vpop.permute.xlu1 %477  ;;  %v407_v19 = vmul.f32 %v3677_v4, %v361_v62  ;;  %v507_v25 = vstv %s3279_s18  ;;  %s3292_s18 = sld [smem:[#allocation3 + $0x4f]] }
  0x8f   :  { %101 = vrot.lane.b32.xlu1 %v93_v21, %s3493_s24  ;;  %117 = vrot.lane.b32.xlu0 %v111_v23, %s3493_s24  ;;  %v261_v41 = vmul.f32 0.0, %v3620_v38  ;;  %v3704_v21 = vmul.f32 0.0, %v478_v14 }
  0x91   :  { %v266_v47 = vmul.f32 %v3630_v43, %v261_v41  ;;  %v287_v50 = vmul.f32 %v3639_v48, %v261_v41  ;;  %v307_v55 = vmul.f32 %v3646_v52, %v261_v41  ;;  %v327_v60 = vmul.f32 %v3654_v56, %v261_v41 }
  0x92   :  { %v3651_v54 = vpop.permute.xlu0 %350 }
  0x93   :  { %137 = vrot.lane.b32.xlu1 %v131_v28, %s3493_s24  ;;  %121 = vrot.lane.b32.xlu0 %v113_v29, %s3493_s24  ;;  %v359_v57 = vmul.f32 0.0, %v3651_v54  ;;  %v427_v28 = vmul.f32 %v3690_v9, %v361_v62  ;;  %v61_v29 = vsel %vm60_vm0, %v3564_v10, %v3575_v15  ;;  %v159_v15 = vsel %vm158_vm1, %v3589_v22, %v3597_v26 }
  0x94   :  { %v257_v22 = vsel %vm256_vm2, %v3620_v38, %v3628_v42  ;;  %v355_v38 = vsel %vm354_vm3, %v3651_v54, %v3659_v58 }
  0x95   :  { %v364_v63 = vmul.f32 %v3661_v59, %v359_v57  ;;  %v385_v2 = vmul.f32 %v3670_v0, %v359_v57  ;;  %v405_v7 = vmul.f32 %v3677_v4, %v359_v57  ;;  %v425_v18 = vmul.f32 %v3690_v9, %v359_v57 }
  0x96   :  { %v3682_v6 = vpop.permute.xlu0 %475 }
  0x97   :  { %141 = vrot.lane.b32.xlu1 %v133_v33, %s3493_s24  ;;  %174 = vrot.lane.b32.xlu0 %v168_v31, %s3494_s30  ;;  %v3696_v12 = vmul.f32 %v3682_v6, %v3688_v8  ;;  %v490_v31 = vmul.f32 %v3698_v17, %v3704_v21  ;;  %v66_v33 = vmul.f32 %v61_v29, %v3688_v8 }
  0x99   :  { %v488_v23 = vmul.f32 %v3698_v17, %v3696_v12  ;;  %v508_v30 = vmul.f32 %v507_v25, %v3696_v12  ;;  %v71_v10 = vmul.f32 %v3566_v11, %v66_v33 }
  0x9b   :  { %195 = vrot.lane.b32.xlu1 %v189_v34, %s3494_s30  ;;  %178 = vrot.lane.b32.xlu0 %v170_v35, %s3494_s30  ;;  %v92_v34 = vmul.f32 %v3577_v16, %v66_v33  ;;  %v164_v35 = vmul.f32 %v159_v15, %v3688_v8 }
  0x9d   :  { %v190_v11 = vmul.f32 %v3608_v32, %v164_v35  ;;  %v169_v16 = vmul.f32 %v3599_v27, %v164_v35  ;;  %v210_v26 = vmul.f32 %v3615_v36, %v164_v35 }
  0x9f   :  { %199 = vrot.lane.b32.xlu1 %v191_v37, %s3494_s30  ;;  %215 = vrot.lane.b32.xlu0 %v209_v39, %s3494_s30  ;;  %v132_v37 = vmul.f32 %v3592_v24, %v66_v33  ;;  %v112_v39 = vmul.f32 %v3584_v20, %v66_v33  ;;  %v262_v24 = vmul.f32 %v257_v22, %v3688_v8 }
  0xa0   :  { %v230_v20 = vmul.f32 %v3623_v40, %v164_v35  ;;  %v360_v40 = vmul.f32 %v355_v38, %v3688_v8 }
  0xa1   :  { %v288_v27 = vmul.f32 %v3639_v48, %v262_v24  ;;  %v267_v32 = vmul.f32 %v3630_v43, %v262_v24  ;;  %v328_v36 = vmul.f32 %v3654_v56, %v262_v24  ;;  %v308_v41 = vmul.f32 %v3646_v52, %v262_v24 }
  0xa2   :  { %v386_v42 = vmul.f32 %v3670_v0, %v360_v40  ;;  %v365_v43 = vmul.f32 %v3661_v59, %v360_v40  ;;  %v426_v46 = vmul.f32 %v3690_v9, %v360_v40  ;;  %v510_v52 = vmul.f32 %v507_v25, %v3704_v21  ;;  %v3282_v59 = vld [vmem:[%s5966_s3 + $0x60] sm:$0xff] }
  0xa3   :  { %235 = vrot.lane.b32.xlu1 %v229_v44, %s3494_s30  ;;  %219 = vrot.lane.b32.xlu0 %v211_v45, %s3494_s30  ;;  %v479_v44 = vsel %vm376_vm4, %v3682_v6, %v478_v14 }
  0xa4   :  { %v484_v45 = vmul.f32 %v479_v44, %v3572_v13 }
  0xa6   :  { %v509_v48 = vmul.f32 %v507_v25, %v484_v45 }
  0xa7   :  { %239 = vrot.lane.b32.xlu1 %v231_v49, %s3494_s30  ;;  %272 = vrot.lane.b32.xlu0 %v266_v47, %s3495_s11  ;;  %v406_v47 = vmul.f32 %v3677_v4, %v360_v40  ;;  %v489_v49 = vmul.f32 %v3698_v17, %v484_v45 }
  0xab   :  { %293 = vrot.lane.b32.xlu1 %v287_v50, %s3495_s11  ;;  %276 = vrot.lane.b32.xlu0 %v268_v51, %s3495_s11  ;;  %v527_v50 = vstv %s3280_s21  ;;  %s3336_s21 = sld [smem:[#allocation3 + $0x57]] }
  0xac   :  { %v528_v51 = vmul.f32 %v527_v50, %v3696_v12  ;;  %v529_v54 = vmul.f32 %v527_v50, %v484_v45 }
  0xaf   :  { %297 = vrot.lane.b32.xlu1 %v289_v53, %s3495_s11  ;;  %313 = vrot.lane.b32.xlu0 %v307_v55, %s3495_s11  ;;  %v530_v53 = vmul.f32 %v527_v50, %v3704_v21  ;;  %v547_v55 = vstv %s3281_s1  ;;  %s3318_s1 = sld [smem:[#allocation3 + $0xc]] }
  0xb0   :  { %v549_v57 = vmul.f32 %v547_v55, %v484_v45  ;;  %v548_v58 = vmul.f32 %v547_v55, %v3696_v12  ;;  %v550_v62 = vmul.f32 %v547_v55, %v3704_v21 }
  0xb3   :  { %333 = vrot.lane.b32.xlu1 %v327_v60, %s3495_s11  ;;  %317 = vrot.lane.b32.xlu0 %v309_v61, %s3495_s11 }
  0xb7   :  { %337 = vrot.lane.b32.xlu1 %v329_v1, %s3495_s11  ;;  %370 = vrot.lane.b32.xlu0 %v364_v63, %s3492_s15  ;;  %v3283_v63 = vld [vmem:[%s5966_s3 + $0x68] sm:$0xff] }
  0xbb   :  { %391 = vrot.lane.b32.xlu1 %v385_v2, %s3492_s15  ;;  %374 = vrot.lane.b32.xlu0 %v366_v3, %s3492_s15 }
  0xbf   :  { %395 = vrot.lane.b32.xlu1 %v387_v5, %s3492_s15  ;;  %411 = vrot.lane.b32.xlu0 %v405_v7, %s3492_s15 }
  0xc3   :  { %431 = vrot.lane.b32.xlu1 %v425_v18, %s3492_s15  ;;  %415 = vrot.lane.b32.xlu0 %v407_v19, %s3492_s15 }
  0xc7   :  { %435 = vrot.lane.b32.xlu1 %v427_v28, %s3492_s15  ;;  %494 = vrot.lane.b32.xlu0 %v488_v23, %s3491_s10 }
  0xcb   :  { %514 = vrot.lane.b32.xlu1 %v508_v30, %s3491_s10  ;;  %498 = vrot.lane.b32.xlu0 %v490_v31, %s3491_s10 }
  0xcf   :  { %99 = vrot.lane.b32.xlu0 %v92_v34, %s3493_s24  ;;  %78 = vrot.lane.b32.xlu1 %v71_v10, %s3493_s24 }
  0xd3   :  { %139 = vrot.lane.b32.xlu0 %v132_v37, %s3493_s24  ;;  %119 = vrot.lane.b32.xlu1 %v112_v39, %s3493_s24 }
  0xd7   :  { %197 = vrot.lane.b32.xlu0 %v190_v11, %s3494_s30  ;;  %176 = vrot.lane.b32.xlu1 %v169_v16, %s3494_s30 }
  0xdb   :  { %237 = vrot.lane.b32.xlu0 %v230_v20, %s3494_s30  ;;  %217 = vrot.lane.b32.xlu1 %v210_v26, %s3494_s30 }
  0xdf   :  { %295 = vrot.lane.b32.xlu0 %v288_v27, %s3495_s11  ;;  %274 = vrot.lane.b32.xlu1 %v267_v32, %s3495_s11 }
  0xe3   :  { %335 = vrot.lane.b32.xlu0 %v328_v36, %s3495_s11  ;;  %315 = vrot.lane.b32.xlu1 %v308_v41, %s3495_s11 }
  0xe7   :  { %393 = vrot.lane.b32.xlu0 %v386_v42, %s3492_s15  ;;  %372 = vrot.lane.b32.xlu1 %v365_v43, %s3492_s15 }
  0xeb   :  { %433 = vrot.lane.b32.xlu0 %v426_v46, %s3492_s15  ;;  %413 = vrot.lane.b32.xlu1 %v406_v47, %s3492_s15 }
  0xef   :  { %516 = vrot.lane.b32.xlu0 %v509_v48, %s3491_s10  ;;  %496 = vrot.lane.b32.xlu1 %v489_v49, %s3491_s10 }
  0xf3   :  { %534 = vrot.lane.b32.xlu0 %v528_v51, %s3491_s10  ;;  %518 = vrot.lane.b32.xlu1 %v510_v52, %s3491_s10 }
  0xf7   :  { %538 = vrot.lane.b32.xlu0 %v530_v53, %s3491_s10  ;;  %536 = vrot.lane.b32.xlu1 %v529_v54, %s3491_s10 }
  0xf9   :  { %v3777_v56 = vpop.permute.xlu1 %76 }
  0xfb   :  { %556 = vrot.lane.b32.xlu0 %v549_v57, %s3491_s10  ;;  %554 = vrot.lane.b32.xlu1 %v548_v58, %s3491_s10 }
  0xfd   :  { %v3785_v60 = vpop.permute.xlu1 %97  ;;  %v3787_v61 = vpop.permute.xlu0 %80 }
  0xff   :  { %571 = vrot.lane.b32.xlu0 %v3282_v59, %s3495_s11  ;;  %558 = vrot.lane.b32.xlu1 %v550_v62, %s3491_s10 }
 0x101   :  { %v3795_v0 = vpop.permute.xlu1 %101  ;;  %v3797_v1 = vpop.permute.xlu0 %117 }
 0x103   :  { %573 = vrot.lane.b32.xlu1 %v3283_v63, %s3495_s11  ;;  %v583_v63 = vstv %s3284_s29  ;;  %s3299_s29 = sld [smem:[#allocation3 + $0x74]] }
 0x105   :  { %v3800_v2 = vpop.permute.xlu1 %137  ;;  %v3802_v3 = vpop.permute.xlu0 %121 }
 0x109   :  { %v3804_v4 = vpop.permute.xlu1 %141  ;;  %v3806_v5 = vpop.permute.xlu0 %174 }
 0x10d   :  { %v3808_v6 = vpop.permute.xlu1 %195  ;;  %v3810_v7 = vpop.permute.xlu0 %178 }
 0x111   :  { %v3812_v9 = vpop.permute.xlu1 %199  ;;  %v3814_v12 = vpop.permute.xlu0 %215 }
 0x115   :  { %v3816_v14 = vpop.permute.xlu1 %235  ;;  %v3818_v17 = vpop.permute.xlu0 %219 }
 0x119   :  { %v3820_v18 = vpop.permute.xlu1 %239  ;;  %v3822_v19 = vpop.permute.xlu0 %272 }
 0x11d   :  { %v3824_v21 = vpop.permute.xlu1 %293  ;;  %v3826_v23 = vpop.permute.xlu0 %276 }
 0x121   :  { %v3828_v25 = vpop.permute.xlu1 %297  ;;  %v3830_v28 = vpop.permute.xlu0 %313 }
 0x125   :  { %v3832_v29 = vpop.permute.xlu1 %333  ;;  %v3834_v30 = vpop.permute.xlu0 %317 }
 0x129   :  { %v3836_v31 = vpop.permute.xlu1 %337  ;;  %v3838_v33 = vpop.permute.xlu0 %370 }
 0x12d   :  { %v3840_v34 = vpop.permute.xlu1 %391  ;;  %v3842_v10 = vpop.permute.xlu0 %374 }
 0x131   :  { %v3844_v15 = vpop.permute.xlu1 %395  ;;  %v3846_v35 = vpop.permute.xlu0 %411 }
 0x135   :  { %v3848_v37 = vpop.permute.xlu1 %431  ;;  %v3850_v39 = vpop.permute.xlu0 %415 }
 0x139   :  { %v3852_v11 = vpop.permute.xlu1 %435  ;;  %v3854_v16 = vpop.permute.xlu0 %494 }
 0x13a   :  { %6056 = vst [vmem:[#allocation6_spill] sm:$0xff] %v3852_v11  ;;  %6057 = vst [vmem:[#allocation7_spill] sm:$0xff] %v3854_v16  ;;  %v41_v11 = vld [vmem:[%s5965_s2 + $0x38] sm:$0xff] }
 0x13d   :  { %v3856_v22 = vpop.permute.xlu1 %514  ;;  %v3858_v24 = vpop.permute.xlu0 %498 }
 0x13e   :  { %6058 = vst [vmem:[#allocation8_spill] sm:$0xff] %v3856_v22  ;;  %6059 = vst [vmem:[#allocation9_spill] sm:$0xff] %v3858_v24 }
 0x141   :  { %v3860_v20 = vpop.permute.xlu0 %99  ;;  %v3862_v26 = vpop.permute.xlu1 %78 }
 0x145   :  { %v3864_v27 = vpop.permute.xlu0 %139  ;;  %v3866_v32 = vpop.permute.xlu1 %119 }
 0x149   :  { %v3868_v38 = vpop.permute.xlu0 %197  ;;  %v3870_v40 = vpop.permute.xlu1 %176 }
 0x14d   :  { %v3872_v36 = vpop.permute.xlu0 %237  ;;  %v3874_v41 = vpop.permute.xlu1 %217 }
 0x151   :  { %v3876_v42 = vpop.permute.xlu0 %295  ;;  %v3878_v43 = vpop.permute.xlu1 %274 }
 0x155   :  { %v3880_v44 = vpop.permute.xlu0 %335  ;;  %v3882_v45 = vpop.permute.xlu1 %315 }
 0x159   :  { %v3884_v46 = vpop.permute.xlu0 %393  ;;  %v3886_v47 = vpop.permute.xlu1 %372 }
 0x15d   :  { %v3888_v48 = vpop.permute.xlu0 %433  ;;  %v3890_v49 = vpop.permute.xlu1 %413 }
 0x161   :  { %v3892_v50 = vpop.permute.xlu0 %516  ;;  %v3894_v51 = vpop.permute.xlu1 %496 }
 0x162   :  { %6060 = vst [vmem:[#allocation10_spill] sm:$0xff] %v3892_v50  ;;  %6061 = vst [vmem:[#allocation11_spill] sm:$0xff] %v3894_v51  ;;  %v603_v51 = vstv %s3285_s6  ;;  %v623_v50 = vstv %s3286_s7  ;;  %s3309_s6 = sld [smem:[#allocation3 + $0x76]]  ;;  %s3342_s7 = sld [smem:[#allocation3 + $0x58]] }
 0x165   :  { %v3896_v52 = vpop.permute.xlu0 %534  ;;  %v3898_v53 = vpop.permute.xlu1 %518 }
 0x166   :  { %6062 = vst [vmem:[#allocation12_spill] sm:$0xff] %v3896_v52  ;;  %6063 = vst [vmem:[#allocation13_spill] sm:$0xff] %v3898_v53 }
 0x169   :  { %v3900_v54 = vpop.permute.xlu0 %538  ;;  %v3902_v55 = vpop.permute.xlu1 %536 }
 0x16a   :  { %6064 = vst [vmem:[#allocation14_spill] sm:$0xff] %v3900_v54  ;;  %6065 = vst [vmem:[#allocation15_spill] sm:$0xff] %v3902_v55 }
 0x16d   :  { %v3904_v57 = vpop.permute.xlu0 %556  ;;  %v3906_v58 = vpop.permute.xlu1 %554 }
 0x16e   :  { %6066 = vst [vmem:[#allocation16_spill] sm:$0xff] %v3904_v57  ;;  %6067 = vst [vmem:[#allocation17_spill] sm:$0xff] %v3906_v58 }
 0x171   :  { %v572_v59 = vpop.permute.xlu0 %571  ;;  %v3908_v62 = vpop.permute.xlu1 %558 }
 0x172   :  { %6068 = vst [vmem:[#allocation18_spill] sm:$0xff] %v3908_v62  ;;  %v579_v24 = vmul.f32 %v572_v59, %v3688_v8 }
 0x174   :  { %v584_v16 = vmul.f32 %v583_v63, %v579_v24  ;;  %v604_v22 = vmul.f32 %v603_v51, %v579_v24 }
 0x175   :  { %v574_v52 = vpop.permute.xlu1 %573 }
 0x176   :  { %v575_v54 = vsel %vm278_vm5, %v572_v59, %v574_v52  ;;  %v581_v53 = vmul.f32 0.0, %v574_v52  ;;  %590 = vrot.lane.b32.xlu0 %v584_v16, %s3490_s5  ;;  %v624_v52 = vmul.f32 %v623_v50, %v579_v24 }
 0x177   :  { %v580_v57 = vmul.f32 %v575_v54, %v3572_v13 }
 0x178   :  { %v586_v55 = vmul.f32 %v583_v63, %v581_v53  ;;  %v606_v59 = vmul.f32 %v603_v51, %v581_v53  ;;  %v626_v16 = vmul.f32 %v623_v50, %v581_v53 }
 0x179   :  { %v585_v58 = vmul.f32 %v583_v63, %v580_v57  ;;  %v605_v62 = vmul.f32 %v603_v51, %v580_v57  ;;  %v625_v54 = vmul.f32 %v623_v50, %v580_v57  ;;  %v643_v63 = vstv %s3287_s8  ;;  %v3289_v50 = vld [vmem:[%s5966_s3 + $0x78] sm:$0xff]  ;;  %s3328_s8 = sld [smem:[#allocation3 + $0xe]] }
 0x17a   :  { %594 = vrot.lane.b32.xlu0 %v586_v55, %s3490_s5  ;;  %v645_v55 = vmul.f32 %v643_v63, %v580_v57  ;;  %v646_v51 = vmul.f32 %v643_v63, %v581_v53 }
 0x17b   :  { %592 = vrot.lane.b32.xlu1 %v585_v58, %s3490_s5  ;;  %v644_v58 = vmul.f32 %v643_v63, %v579_v24 }
 0x17e   :  { %612 = vrot.lane.b32.xlu0 %v605_v62, %s3490_s5 }
 0x17f   :  { %610 = vrot.lane.b32.xlu1 %v604_v22, %s3490_s5  ;;  %v3288_v22 = vld [vmem:[%s5966_s3 + $0x70] sm:$0xff] }
 0x182   :  { %630 = vrot.lane.b32.xlu0 %v624_v52, %s3490_s5 }
 0x183   :  { %614 = vrot.lane.b32.xlu1 %v606_v59, %s3490_s5 }
 0x186   :  { %634 = vrot.lane.b32.xlu0 %v626_v16, %s3490_s5 }
 0x187   :  { %632 = vrot.lane.b32.xlu1 %v625_v54, %s3490_s5 }
 0x18a   :  { %652 = vrot.lane.b32.xlu0 %v645_v55, %s3490_s5 }
 0x18b   :  { %650 = vrot.lane.b32.xlu1 %v644_v58, %s3490_s5 }
 0x18e   :  { %667 = vrot.lane.b32.xlu0 %v3288_v22, %s3494_s30 }
 0x18f   :  { %654 = vrot.lane.b32.xlu1 %v646_v51, %s3490_s5  ;;  %v679_v51 = vstv %s3290_s16  ;;  %s3314_s16 = sld [smem:[#allocation3 + $0x53]] }
 0x193   :  { %669 = vrot.lane.b32.xlu1 %v3289_v50, %s3494_s30 }
 0x1e8   :  { %v3933_v24 = vpop.permute.xlu0 %590 }
 0x1e9   :  { %6069 = vst [vmem:[#allocation19_spill] sm:$0xff] %v3933_v24 }
 0x1ec   :  { %v3935_v57 = vpop.permute.xlu0 %594 }
 0x1ed   :  { %6070 = vst [vmem:[#allocation20_spill] sm:$0xff] %v3935_v57  ;;  %v3937_v62 = vpop.permute.xlu1 %592  ;;  %v699_v57 = vstv %s3291_s17  ;;  %s3315_s17 = sld [smem:[#allocation3 + $0x77]] }
 0x1ee   :  { %6071 = vst [vmem:[#allocation21_spill] sm:$0xff] %v3937_v62  ;;  %v719_v62 = vstv %s3292_s18  ;;  %s3348_s18 = sld [smem:[#allocation3 + $0x59]] }
 0x1f0   :  { %v3939_v52 = vpop.permute.xlu0 %612 }
 0x1f1   :  { %6072 = vst [vmem:[#allocation22_spill] sm:$0xff] %v3939_v52  ;;  %v3941_v59 = vpop.permute.xlu1 %610 }
 0x1f2   :  { %6073 = vst [vmem:[#allocation23_spill] sm:$0xff] %v3941_v59 }
 0x1f4   :  { %v3943_v53 = vpop.permute.xlu0 %630 }
 0x1f5   :  { %6074 = vst [vmem:[#allocation24_spill] sm:$0xff] %v3943_v53  ;;  %v3945_v16 = vpop.permute.xlu1 %614 }
 0x1f6   :  { %6075 = vst [vmem:[#allocation25_spill] sm:$0xff] %v3945_v16 }
 0x1f8   :  { %v3947_v54 = vpop.permute.xlu0 %634 }
 0x1f9   :  { %6076 = vst [vmem:[#allocation26_spill] sm:$0xff] %v3947_v54  ;;  %v3949_v63 = vpop.permute.xlu1 %632 }
 0x1fa   :  { %6077 = vst [vmem:[#allocation27_spill] sm:$0xff] %v3949_v63 }
 0x1fc   :  { %v3951_v55 = vpop.permute.xlu0 %652 }
 0x1fd   :  { %6078 = vst [vmem:[#allocation28_spill] sm:$0xff] %v3951_v55  ;;  %v3953_v58 = vpop.permute.xlu1 %650 }
 0x1fe   :  { %6079 = vst [vmem:[#allocation29_spill] sm:$0xff] %v3953_v58 }
 0x200   :  { %v668_v22 = vpop.permute.xlu0 %667 }
 0x201   :  { %v675_v50 = vmul.f32 %v668_v22, %v3688_v8  ;;  %v3956_v52 = vpop.permute.xlu1 %654 }
 0x202   :  { %6080 = vst [vmem:[#allocation30_spill] sm:$0xff] %v3956_v52 }
 0x203   :  { %v680_v59 = vmul.f32 %v679_v51, %v675_v50  ;;  %v700_v24 = vmul.f32 %v699_v57, %v675_v50 }
 0x205   :  { %v670_v53 = vpop.permute.xlu1 %669  ;;  %686 = vrot.lane.b32.xlu0 %v680_v59, %s3489_s26  ;;  %v720_v59 = vmul.f32 %v719_v62, %v675_v50 }
 0x206   :  { %v671_v54 = vsel %vm180_vm6, %v668_v22, %v670_v53  ;;  %v677_v63 = vmul.f32 0.0, %v670_v53 }
 0x207   :  { %v676_v55 = vmul.f32 %v671_v54, %v3572_v13 }
 0x208   :  { %v682_v16 = vmul.f32 %v679_v51, %v677_v63  ;;  %v702_v22 = vmul.f32 %v699_v57, %v677_v63  ;;  %v722_v53 = vmul.f32 %v719_v62, %v677_v63 }
 0x209   :  { %v681_v58 = vmul.f32 %v679_v51, %v676_v55  ;;  %v701_v52 = vmul.f32 %v699_v57, %v676_v55  ;;  %v721_v54 = vmul.f32 %v719_v62, %v676_v55  ;;  %v739_v51 = vstv %s3293_s19  ;;  %v3295_v62 = vld [vmem:[%s5966_s3 + $0x88] sm:$0xff]  ;;  %s3302_s19 = sld [smem:[#allocation3 + $0x51]] }
 0x20a   :  { %690 = vrot.lane.b32.xlu0 %v682_v16, %s3489_s26  ;;  %v741_v16 = vmul.f32 %v739_v51, %v676_v55  ;;  %v742_v57 = vmul.f32 %v739_v51, %v677_v63 }
 0x20b   :  { %688 = vrot.lane.b32.xlu1 %v681_v58, %s3489_s26  ;;  %v740_v58 = vmul.f32 %v739_v51, %v675_v50 }
 0x20e   :  { %708 = vrot.lane.b32.xlu0 %v701_v52, %s3489_s26 }
 0x20f   :  { %706 = vrot.lane.b32.xlu1 %v700_v24, %s3489_s26  ;;  %v3294_v24 = vld [vmem:[%s5966_s3 + $0x80] sm:$0xff] }
 0x212   :  { %726 = vrot.lane.b32.xlu0 %v720_v59, %s3489_s26 }
 0x213   :  { %710 = vrot.lane.b32.xlu1 %v702_v22, %s3489_s26 }
 0x216   :  { %730 = vrot.lane.b32.xlu0 %v722_v53, %s3489_s26 }
 0x217   :  { %728 = vrot.lane.b32.xlu1 %v721_v54, %s3489_s26 }
 0x21a   :  { %748 = vrot.lane.b32.xlu0 %v741_v16, %s3489_s26 }
 0x21b   :  { %746 = vrot.lane.b32.xlu1 %v740_v58, %s3489_s26 }
 0x21e   :  { %763 = vrot.lane.b32.xlu0 %v3294_v24, %s3493_s24 }
 0x21f   :  { %750 = vrot.lane.b32.xlu1 %v742_v57, %s3489_s26  ;;  %v775_v57 = vstv %s3296_s25  ;;  %s3320_s25 = sld [smem:[#allocation3 + $0x54]] }
 0x223   :  { %765 = vrot.lane.b32.xlu1 %v3295_v62, %s3493_s24 }
 0x277   :  { %v3980_v52 = vpop.permute.xlu0 %686 }
 0x278   :  { %6081 = vst [vmem:[#allocation31_spill] sm:$0xff] %v3980_v52  ;;  %v815_v52 = vstv %s3298_s28  ;;  %s3307_s28 = sld [smem:[#allocation3 + $0x2e]] }
 0x27c   :  { %v3982_v55 = vpop.permute.xlu0 %690 }
 0x27d   :  { %6082 = vst [vmem:[#allocation32_spill] sm:$0xff] %v3982_v55  ;;  %v3984_v50 = vpop.permute.xlu1 %688  ;;  %v795_v55 = vstv %s3297_s27  ;;  %s3306_s27 = sld [smem:[#allocation3 + $0xa]] }
 0x27e   :  { %6083 = vst [vmem:[#allocation33_spill] sm:$0xff] %v3984_v50  ;;  %v917_v50 = vstv %s3302_s19  ;;  %s3334_s19 = sld [smem:[#allocation3 + $0xf]] }
 0x280   :  { %v3986_v59 = vpop.permute.xlu0 %708 }
 0x281   :  { %6084 = vst [vmem:[#allocation34_spill] sm:$0xff] %v3986_v59  ;;  %v3988_v22 = vpop.permute.xlu1 %706 }
 0x282   :  { %6085 = vst [vmem:[#allocation35_spill] sm:$0xff] %v3988_v22 }
 0x284   :  { %v3990_v63 = vpop.permute.xlu0 %726 }
 0x285   :  { %6086 = vst [vmem:[#allocation36_spill] sm:$0xff] %v3990_v63  ;;  %v3992_v53 = vpop.permute.xlu1 %710 }
 0x286   :  { %6087 = vst [vmem:[#allocation37_spill] sm:$0xff] %v3992_v53 }
 0x288   :  { %v3994_v54 = vpop.permute.xlu0 %730 }
 0x289   :  { %6088 = vst [vmem:[#allocation38_spill] sm:$0xff] %v3994_v54  ;;  %v3996_v51 = vpop.permute.xlu1 %728 }
 0x28a   :  { %6089 = vst [vmem:[#allocation39_spill] sm:$0xff] %v3996_v51 }
 0x28c   :  { %v3998_v16 = vpop.permute.xlu0 %748 }
 0x28d   :  { %6090 = vst [vmem:[#allocation40_spill] sm:$0xff] %v3998_v16  ;;  %v4000_v58 = vpop.permute.xlu1 %746 }
 0x28e   :  { %6091 = vst [vmem:[#allocation41_spill] sm:$0xff] %v4000_v58 }
 0x290   :  { %v764_v24 = vpop.permute.xlu0 %763 }
 0x291   :  { %v771_v62 = vmul.f32 %v764_v24, %v3688_v8  ;;  %v4003_v59 = vpop.permute.xlu1 %750 }
 0x292   :  { %6092 = vst [vmem:[#allocation42_spill] sm:$0xff] %v4003_v59 }
 0x293   :  { %v776_v22 = vmul.f32 %v775_v57, %v771_v62  ;;  %v796_v59 = vmul.f32 %v795_v55, %v771_v62 }
 0x295   :  { %v766_v63 = vpop.permute.xlu1 %765  ;;  %782 = vrot.lane.b32.xlu0 %v776_v22, %s3488_s22  ;;  %v816_v22 = vmul.f32 %v815_v52, %v771_v62 }
 0x296   :  { %v767_v54 = vsel %vm82_vm7, %v764_v24, %v766_v63  ;;  %v773_v51 = vmul.f32 0.0, %v766_v63 }
 0x297   :  { %v772_v16 = vmul.f32 %v767_v54, %v3572_v13  ;;  %v835_v54 = vstv %s3299_s29  ;;  %s3308_s29 = sld [smem:[#allocation3 + $0x52]] }
 0x298   :  { %v778_v53 = vmul.f32 %v775_v57, %v773_v51  ;;  %v798_v24 = vmul.f32 %v795_v55, %v773_v51  ;;  %v818_v13 = vmul.f32 %v815_v52, %v773_v51 }
 0x299   :  { %v777_v58 = vmul.f32 %v775_v57, %v772_v16  ;;  %v797_v8 = vmul.f32 %v795_v55, %v772_v16  ;;  %v817_v63 = vmul.f32 %v815_v52, %v772_v16  ;;  %v861_v55 = vld [vmem:[%s5966_s3] sm:$0xff]  ;;  %v862_v52 = vld [vmem:[%s5966_s3 + $0x8] sm:$0xff] }
 0x29a   :  { %786 = vrot.lane.b32.xlu0 %v778_v53, %s3488_s22  ;;  %v837_v53 = vmul.f32 %v835_v54, %v772_v16 }
 0x29b   :  { %784 = vrot.lane.b32.xlu1 %v777_v58, %s3488_s22  ;;  %v836_v58 = vmul.f32 %v835_v54, %v771_v62 }
 0x29e   :  { %804 = vrot.lane.b32.xlu0 %v797_v8, %s3488_s22 }
 0x29f   :  { %802 = vrot.lane.b32.xlu1 %v796_v59, %s3488_s22  ;;  %v838_v59 = vmul.f32 %v835_v54, %v773_v51 }
 0x2a2   :  { %822 = vrot.lane.b32.xlu0 %v816_v22, %s3488_s22 }
 0x2a3   :  { %806 = vrot.lane.b32.xlu1 %v798_v24, %s3488_s22 }
 0x2a6   :  { %826 = vrot.lane.b32.xlu0 %v818_v13, %s3488_s22 }
 0x2a7   :  { %824 = vrot.lane.b32.xlu1 %v817_v63, %s3488_s22 }
 0x2aa   :  { %844 = vrot.lane.b32.xlu0 %v837_v53, %s3488_s22 }
 0x2ab   :  { %842 = vrot.lane.b32.xlu1 %v836_v58, %s3488_s22 }
 0x2ae   :  { %865 = vrot.lane.b32.xlu0 %v861_v55, %s3488_s22  ;;  %v877_v55 = vstv %s3300_s12  ;;  %s3330_s12 = sld [smem:[#allocation3 + $0x56]] }
 0x2af   :  { %846 = vrot.lane.b32.xlu1 %v838_v59, %s3488_s22 }
 0x2b3   :  { %867 = vrot.lane.b32.xlu1 %v862_v52, %s3488_s22 }
 0x307   :  { %v4027_v16 = vpop.permute.xlu0 %782 }
 0x308   :  { %6093 = vst [vmem:[#allocation43_spill] sm:$0xff] %v4027_v16 }
 0x30c   :  { %v4029_v57 = vpop.permute.xlu0 %786 }
 0x30d   :  { %6094 = vst [vmem:[#allocation44_spill] sm:$0xff] %v4029_v57  ;;  %v4031_v62 = vpop.permute.xlu1 %784  ;;  %v897_v57 = vstv %s3301_s13  ;;  %s3312_s13 = sld [smem:[#allocation3 + $0xb]] }
 0x30e   :  { %6095 = vst [vmem:[#allocation45_spill] sm:$0xff] %v4031_v62 }
 0x310   :  { %v4033_v8 = vpop.permute.xlu0 %804 }
 0x311   :  { %6096 = vst [vmem:[#allocation46_spill] sm:$0xff] %v4033_v8  ;;  %v4035_v22 = vpop.permute.xlu1 %802 }
 0x312   :  { %6097 = vst [vmem:[#allocation47_spill] sm:$0xff] %v4035_v22 }
 0x314   :  { %v4037_v51 = vpop.permute.xlu0 %822 }
 0x315   :  { %6098 = vst [vmem:[#allocation48_spill] sm:$0xff] %v4037_v51  ;;  %v4039_v24 = vpop.permute.xlu1 %806  ;;  %v4054_v51 = vld [vmem:[%s5963_s0 + $0x18] sm:$0xff] }
 0x316   :  { %6099 = vst [vmem:[#allocation49_spill] sm:$0xff] %v4039_v24 }
 0x318   :  { %v4041_v13 = vpop.permute.xlu0 %826 }
 0x319   :  { %6100 = vst [vmem:[#allocation50_spill] sm:$0xff] %v4041_v13  ;;  %v4043_v63 = vpop.permute.xlu1 %824  ;;  %v4059_v13 = vld [vmem:[%s5963_s0 + $0x10] sm:$0xff] }
 0x31a   :  { %6101 = vst [vmem:[#allocation51_spill] sm:$0xff] %v4043_v63 }
 0x31c   :  { %v4045_v54 = vpop.permute.xlu0 %844 }
 0x31d   :  { %6102 = vst [vmem:[#allocation52_spill] sm:$0xff] %v4045_v54  ;;  %v4047_v53 = vpop.permute.xlu1 %842 }
 0x31e   :  { %6103 = vst [vmem:[#allocation53_spill] sm:$0xff] %v4047_v53 }
 0x320   :  { %v866_v58 = vpop.permute.xlu0 %865 }
 0x321   :  { %v873_v59 = vmul.f32 0.0, %v866_v58  ;;  %v4049_v52 = vpop.permute.xlu1 %846 }
 0x322   :  { %6104 = vst [vmem:[#allocation54_spill] sm:$0xff] %v4049_v52 }
 0x323   :  { %v878_v24 = vmul.f32 %v877_v55, %v873_v59  ;;  %v898_v62 = vmul.f32 %v897_v57, %v873_v59 }
 0x325   :  { %v868_v54 = vpop.permute.xlu1 %867  ;;  %884 = vrot.lane.b32.xlu0 %v878_v24, %s3493_s24  ;;  %v918_v24 = vmul.f32 %v917_v50, %v873_v59 }
 0x326   :  { %v869_v53 = vsel %vm60_vm0, %v866_v58, %v868_v54  ;;  %v875_v52 = vmul.f32 %v868_v54, %v4054_v51 }
 0x327   :  { %v874_v63 = vmul.f32 %v869_v53, %v4059_v13 }
 0x328   :  { %v880_v22 = vmul.f32 %v877_v55, %v875_v52  ;;  %v900_v58 = vmul.f32 %v897_v57, %v875_v52  ;;  %v920_v54 = vmul.f32 %v917_v50, %v875_v52 }
 0x329   :  { %v879_v8 = vmul.f32 %v877_v55, %v874_v63  ;;  %v899_v16 = vmul.f32 %v897_v57, %v874_v63  ;;  %v919_v53 = vmul.f32 %v917_v50, %v874_v63  ;;  %v937_v55 = vstv %s3303_s20  ;;  %v3305_v50 = vld [vmem:[%s5966_s3 + $0x18] sm:$0xff]  ;;  %s3335_s20 = sld [smem:[#allocation3 + $0x33]] }
 0x32a   :  { %888 = vrot.lane.b32.xlu0 %v880_v22, %s3493_s24  ;;  %v938_v22 = vmul.f32 %v937_v55, %v873_v59  ;;  %v940_v57 = vmul.f32 %v937_v55, %v875_v52 }
 0x32b   :  { %886 = vrot.lane.b32.xlu1 %v879_v8, %s3493_s24  ;;  %v939_v8 = vmul.f32 %v937_v55, %v874_v63 }
 0x32e   :  { %906 = vrot.lane.b32.xlu0 %v899_v16, %s3493_s24  ;;  %v3304_v16 = vld [vmem:[%s5966_s3 + $0x10] sm:$0xff] }
 0x32f   :  { %904 = vrot.lane.b32.xlu1 %v898_v62, %s3493_s24 }
 0x332   :  { %924 = vrot.lane.b32.xlu0 %v918_v24, %s3493_s24 }
 0x333   :  { %908 = vrot.lane.b32.xlu1 %v900_v58, %s3493_s24 }
 0x336   :  { %928 = vrot.lane.b32.xlu0 %v920_v54, %s3493_s24 }
 0x337   :  { %926 = vrot.lane.b32.xlu1 %v919_v53, %s3493_s24 }
 0x33a   :  { %946 = vrot.lane.b32.xlu0 %v939_v8, %s3493_s24 }
 0x33b   :  { %944 = vrot.lane.b32.xlu1 %v938_v22, %s3493_s24 }
 0x33e   :  { %960 = vrot.lane.b32.xlu0 %v3304_v16, %s3489_s26 }
 0x33f   :  { %948 = vrot.lane.b32.xlu1 %v940_v57, %s3493_s24  ;;  %v972_v57 = vstv %s3306_s27  ;;  %s3321_s27 = sld [smem:[#allocation3 + $0x78]] }
 0x343   :  { %962 = vrot.lane.b32.xlu1 %v3305_v50, %s3489_s26 }
 0x397   :  { %v4084_v62 = vpop.permute.xlu0 %884 }
 0x398   :  { %6105 = vst [vmem:[#allocation55_spill] sm:$0xff] %v4084_v62 }
 0x39c   :  { %v4086_v63 = vpop.permute.xlu0 %888 }
 0x39d   :  { %6106 = vst [vmem:[#allocation56_spill] sm:$0xff] %v4086_v63  ;;  %v4088_v59 = vpop.permute.xlu1 %886 }
 0x39e   :  { %6107 = vst [vmem:[#allocation57_spill] sm:$0xff] %v4088_v59  ;;  %v1012_v59 = vstv %s3308_s29  ;;  %s3340_s29 = sld [smem:[#allocation3 + $0x10]] }
 0x3a0   :  { %v4090_v24 = vpop.permute.xlu0 %906 }
 0x3a1   :  { %6108 = vst [vmem:[#allocation58_spill] sm:$0xff] %v4090_v24  ;;  %v4092_v58 = vpop.permute.xlu1 %904 }
 0x3a2   :  { %6109 = vst [vmem:[#allocation59_spill] sm:$0xff] %v4092_v58 }
 0x3a4   :  { %v4094_v52 = vpop.permute.xlu0 %924 }
 0x3a5   :  { %6110 = vst [vmem:[#allocation60_spill] sm:$0xff] %v4094_v52  ;;  %v4096_v54 = vpop.permute.xlu1 %908 }
 0x3a6   :  { %6111 = vst [vmem:[#allocation61_spill] sm:$0xff] %v4096_v54 }
 0x3a8   :  { %v4098_v53 = vpop.permute.xlu0 %928 }
 0x3a9   :  { %6112 = vst [vmem:[#allocation62_spill] sm:$0xff] %v4098_v53  ;;  %v4100_v55 = vpop.permute.xlu1 %926 }
 0x3aa   :  { %6113 = vst [vmem:[#allocation63_spill] sm:$0xff] %v4100_v55 }
 0x3ac   :  { %v4102_v8 = vpop.permute.xlu0 %946 }
 0x3ad   :  { %6114 = vst [vmem:[#allocation64_spill] sm:$0xff] %v4102_v8  ;;  %v4104_v22 = vpop.permute.xlu1 %944 }
 0x3ae   :  { %6115 = vst [vmem:[#allocation65_spill] sm:$0xff] %v4104_v22  ;;  %v992_v22 = vstv %s3307_s28  ;;  %s3363_s28 = sld [smem:[#allocation3 + $0x38]] }
 0x3b0   :  { %v961_v16 = vpop.permute.xlu0 %960 }
 0x3b1   :  { %v968_v50 = vmul.f32 0.0, %v961_v16  ;;  %v4106_v63 = vpop.permute.xlu1 %948 }
 0x3b2   :  { %6116 = vst [vmem:[#allocation66_spill] sm:$0xff] %v4106_v63 }
 0x3b3   :  { %v973_v58 = vmul.f32 %v972_v57, %v968_v50  ;;  %v993_v62 = vmul.f32 %v992_v22, %v968_v50 }
 0x3b5   :  { %v963_v24 = vpop.permute.xlu1 %962  ;;  %979 = vrot.lane.b32.xlu0 %v973_v58, %s3494_s30  ;;  %v1013_v58 = vmul.f32 %v1012_v59, %v968_v50 }
 0x3b6   :  { %v964_v53 = vsel %vm158_vm1, %v961_v16, %v963_v24  ;;  %v970_v52 = vmul.f32 %v963_v24, %v4054_v51 }
 0x3b7   :  { %v969_v55 = vmul.f32 %v964_v53, %v4059_v13 }
 0x3b8   :  { %v975_v8 = vmul.f32 %v972_v57, %v970_v52  ;;  %v995_v16 = vmul.f32 %v992_v22, %v970_v52  ;;  %v1015_v24 = vmul.f32 %v1012_v59, %v970_v52 }
 0x3b9   :  { %v974_v54 = vmul.f32 %v972_v57, %v969_v55  ;;  %v994_v63 = vmul.f32 %v992_v22, %v969_v55  ;;  %v1014_v53 = vmul.f32 %v1012_v59, %v969_v55  ;;  %v1032_v57 = vstv %s3309_s6  ;;  %v3311_v59 = vld [vmem:[%s5966_s3 + $0x28] sm:$0xff]  ;;  %s3341_s6 = sld [smem:[#allocation3 + $0x34]] }
 0x3ba   :  { %983 = vrot.lane.b32.xlu0 %v975_v8, %s3494_s30  ;;  %v1033_v8 = vmul.f32 %v1032_v57, %v968_v50 }
 0x3bb   :  { %981 = vrot.lane.b32.xlu1 %v974_v54, %s3494_s30  ;;  %v1034_v54 = vmul.f32 %v1032_v57, %v969_v55 }
 0x3be   :  { %1001 = vrot.lane.b32.xlu0 %v994_v63, %s3494_s30  ;;  %v1035_v63 = vmul.f32 %v1032_v57, %v970_v52 }
 0x3bf   :  { %999 = vrot.lane.b32.xlu1 %v993_v62, %s3494_s30  ;;  %v3310_v62 = vld [vmem:[%s5966_s3 + $0x20] sm:$0xff] }
 0x3c2   :  { %1019 = vrot.lane.b32.xlu0 %v1013_v58, %s3494_s30 }
 0x3c3   :  { %1003 = vrot.lane.b32.xlu1 %v995_v16, %s3494_s30 }
 0x3c6   :  { %1023 = vrot.lane.b32.xlu0 %v1015_v24, %s3494_s30 }
 0x3c7   :  { %1021 = vrot.lane.b32.xlu1 %v1014_v53, %s3494_s30 }
 0x3ca   :  { %1041 = vrot.lane.b32.xlu0 %v1034_v54, %s3494_s30 }
 0x3cb   :  { %1039 = vrot.lane.b32.xlu1 %v1033_v8, %s3494_s30 }
 0x3ce   :  { %1055 = vrot.lane.b32.xlu0 %v3310_v62, %s3490_s5 }
 0x3cf   :  { %1043 = vrot.lane.b32.xlu1 %v1035_v63, %s3494_s30  ;;  %v1067_v63 = vstv %s3312_s13  ;;  %s3331_s13 = sld [smem:[#allocation3 + $0x7a]] }
 0x3d3   :  { %1057 = vrot.lane.b32.xlu1 %v3311_v59, %s3490_s5 }
 0x427   :  { %v4131_v55 = vpop.permute.xlu0 %979 }
 0x428   :  { %6117 = vst [vmem:[#allocation67_spill] sm:$0xff] %v4131_v55 }
 0x42c   :  { %v4133_v22 = vpop.permute.xlu0 %983 }
 0x42d   :  { %6118 = vst [vmem:[#allocation68_spill] sm:$0xff] %v4133_v22  ;;  %v4135_v50 = vpop.permute.xlu1 %981 }
 0x42e   :  { %6119 = vst [vmem:[#allocation69_spill] sm:$0xff] %v4135_v50  ;;  %v1107_v50 = vstv %s3314_s16  ;;  %s3346_s16 = sld [smem:[#allocation3 + $0x11]] }
 0x430   :  { %v4137_v58 = vpop.permute.xlu0 %1001 }
 0x431   :  { %6120 = vst [vmem:[#allocation70_spill] sm:$0xff] %v4137_v58  ;;  %v4139_v16 = vpop.permute.xlu1 %999 }
 0x432   :  { %6121 = vst [vmem:[#allocation71_spill] sm:$0xff] %v4139_v16 }
 0x434   :  { %v4141_v52 = vpop.permute.xlu0 %1019 }
 0x435   :  { %6122 = vst [vmem:[#allocation72_spill] sm:$0xff] %v4141_v52  ;;  %v4143_v24 = vpop.permute.xlu1 %1003 }
 0x436   :  { %6123 = vst [vmem:[#allocation73_spill] sm:$0xff] %v4143_v24 }
 0x438   :  { %v4145_v53 = vpop.permute.xlu0 %1023 }
 0x439   :  { %6124 = vst [vmem:[#allocation74_spill] sm:$0xff] %v4145_v53  ;;  %v4147_v57 = vpop.permute.xlu1 %1021 }
 0x43a   :  { %6125 = vst [vmem:[#allocation75_spill] sm:$0xff] %v4147_v57 }
 0x43c   :  { %v4149_v54 = vpop.permute.xlu0 %1041 }
 0x43d   :  { %6126 = vst [vmem:[#allocation76_spill] sm:$0xff] %v4149_v54  ;;  %v4151_v8 = vpop.permute.xlu1 %1039 }
 0x43e   :  { %6127 = vst [vmem:[#allocation77_spill] sm:$0xff] %v4151_v8  ;;  %v1087_v8 = vstv %s3313_s14  ;;  %s3369_s14 = sld [smem:[#allocation3 + $0x39]] }
 0x440   :  { %v1056_v62 = vpop.permute.xlu0 %1055 }
 0x441   :  { %v1063_v59 = vmul.f32 0.0, %v1056_v62  ;;  %v4153_v22 = vpop.permute.xlu1 %1043 }
 0x442   :  { %6128 = vst [vmem:[#allocation78_spill] sm:$0xff] %v4153_v22 }
 0x443   :  { %v1068_v16 = vmul.f32 %v1067_v63, %v1063_v59  ;;  %v1088_v55 = vmul.f32 %v1087_v8, %v1063_v59 }
 0x445   :  { %v1058_v58 = vpop.permute.xlu1 %1057  ;;  %1074 = vrot.lane.b32.xlu0 %v1068_v16, %s3495_s11  ;;  %v1108_v16 = vmul.f32 %v1107_v50, %v1063_v59 }
 0x446   :  { %v1059_v53 = vsel %vm256_vm2, %v1056_v62, %v1058_v58  ;;  %v1065_v52 = vmul.f32 %v1058_v58, %v4054_v51 }
 0x447   :  { %v1064_v57 = vmul.f32 %v1059_v53, %v4059_v13 }
 0x448   :  { %v1070_v54 = vmul.f32 %v1067_v63, %v1065_v52  ;;  %v1090_v62 = vmul.f32 %v1087_v8, %v1065_v52  ;;  %v1110_v58 = vmul.f32 %v1107_v50, %v1065_v52 }
 0x449   :  { %v1069_v24 = vmul.f32 %v1067_v63, %v1064_v57  ;;  %v1089_v22 = vmul.f32 %v1087_v8, %v1064_v57  ;;  %v1109_v53 = vmul.f32 %v1107_v50, %v1064_v57  ;;  %v1127_v63 = vstv %s3315_s17  ;;  %v3317_v50 = vld [vmem:[%s5966_s3 + $0x38] sm:$0xff]  ;;  %s3347_s17 = sld [smem:[#allocation3 + $0x35]] }
 0x44a   :  { %1078 = vrot.lane.b32.xlu0 %v1070_v54, %s3495_s11  ;;  %v1128_v54 = vmul.f32 %v1127_v63, %v1063_v59 }
 0x44b   :  { %1076 = vrot.lane.b32.xlu1 %v1069_v24, %s3495_s11  ;;  %v1129_v24 = vmul.f32 %v1127_v63, %v1064_v57 }
 0x44e   :  { %1096 = vrot.lane.b32.xlu0 %v1089_v22, %s3495_s11  ;;  %v1130_v22 = vmul.f32 %v1127_v63, %v1065_v52 }
 0x44f   :  { %1094 = vrot.lane.b32.xlu1 %v1088_v55, %s3495_s11  ;;  %v3316_v55 = vld [vmem:[%s5966_s3 + $0x30] sm:$0xff] }
 0x452   :  { %1114 = vrot.lane.b32.xlu0 %v1108_v16, %s3495_s11 }
 0x453   :  { %1098 = vrot.lane.b32.xlu1 %v1090_v62, %s3495_s11 }
 0x456   :  { %1118 = vrot.lane.b32.xlu0 %v1110_v58, %s3495_s11 }
 0x457   :  { %1116 = vrot.lane.b32.xlu1 %v1109_v53, %s3495_s11 }
 0x45a   :  { %1136 = vrot.lane.b32.xlu0 %v1129_v24, %s3495_s11 }
 0x45b   :  { %1134 = vrot.lane.b32.xlu1 %v1128_v54, %s3495_s11 }
 0x45e   :  { %1150 = vrot.lane.b32.xlu0 %v3316_v55, %s3491_s10 }
 0x45f   :  { %1138 = vrot.lane.b32.xlu1 %v1130_v22, %s3495_s11  ;;  %v1162_v22 = vstv %s3318_s1  ;;  %s3337_s1 = sld [smem:[#allocation3 + $0x7b]] }
 0x463   :  { %1152 = vrot.lane.b32.xlu1 %v3317_v50, %s3491_s10 }
 0x4b7   :  { %v4178_v57 = vpop.permute.xlu0 %1074 }
 0x4b8   :  { %6129 = vst [vmem:[#allocation79_spill] sm:$0xff] %v4178_v57 }
 0x4bc   :  { %v4180_v8 = vpop.permute.xlu0 %1078 }
 0x4bd   :  { %6130 = vst [vmem:[#allocation80_spill] sm:$0xff] %v4180_v8  ;;  %v4182_v59 = vpop.permute.xlu1 %1076 }
 0x4be   :  { %6131 = vst [vmem:[#allocation81_spill] sm:$0xff] %v4182_v59  ;;  %v1202_v59 = vstv %s3320_s25  ;;  %s3350_s25 = sld [smem:[#allocation3 + $0x12]] }
 0x4c0   :  { %v4184_v16 = vpop.permute.xlu0 %1096 }
 0x4c1   :  { %6132 = vst [vmem:[#allocation82_spill] sm:$0xff] %v4184_v16  ;;  %v4186_v62 = vpop.permute.xlu1 %1094 }
 0x4c2   :  { %6133 = vst [vmem:[#allocation83_spill] sm:$0xff] %v4186_v62 }
 0x4c4   :  { %v4188_v52 = vpop.permute.xlu0 %1114 }
 0x4c5   :  { %6134 = vst [vmem:[#allocation84_spill] sm:$0xff] %v4188_v52  ;;  %v4190_v58 = vpop.permute.xlu1 %1098 }
 0x4c6   :  { %6135 = vst [vmem:[#allocation85_spill] sm:$0xff] %v4190_v58 }
 0x4c8   :  { %v4192_v53 = vpop.permute.xlu0 %1118 }
 0x4c9   :  { %6136 = vst [vmem:[#allocation86_spill] sm:$0xff] %v4192_v53  ;;  %v4194_v63 = vpop.permute.xlu1 %1116 }
 0x4ca   :  { %6137 = vst [vmem:[#allocation87_spill] sm:$0xff] %v4194_v63 }
 0x4cc   :  { %v4196_v24 = vpop.permute.xlu0 %1136 }
 0x4cd   :  { %6138 = vst [vmem:[#allocation88_spill] sm:$0xff] %v4196_v24  ;;  %v4198_v54 = vpop.permute.xlu1 %1134 }
 0x4ce   :  { %6139 = vst [vmem:[#allocation89_spill] sm:$0xff] %v4198_v54  ;;  %v1182_v54 = vstv %s3319_s23  ;;  %s3379_s23 = sld [smem:[#allocation3 + $0x3b]] }
 0x4d0   :  { %v1151_v55 = vpop.permute.xlu0 %1150 }
 0x4d1   :  { %v1158_v50 = vmul.f32 0.0, %v1151_v55  ;;  %v4200_v8 = vpop.permute.xlu1 %1138 }
 0x4d2   :  { %6140 = vst [vmem:[#allocation90_spill] sm:$0xff] %v4200_v8 }
 0x4d3   :  { %v1163_v62 = vmul.f32 %v1162_v22, %v1158_v50  ;;  %v1183_v57 = vmul.f32 %v1182_v54, %v1158_v50 }
 0x4d5   :  { %v1153_v16 = vpop.permute.xlu1 %1152  ;;  %1169 = vrot.lane.b32.xlu0 %v1163_v62, %s3492_s15  ;;  %v1203_v62 = vmul.f32 %v1202_v59, %v1158_v50 }
 0x4d6   :  { %v1154_v53 = vsel %vm354_vm3, %v1151_v55, %v1153_v16  ;;  %v1160_v52 = vmul.f32 %v1153_v16, %v4054_v51 }
 0x4d7   :  { %v1159_v63 = vmul.f32 %v1154_v53, %v4059_v13 }
 0x4d8   :  { %v1165_v24 = vmul.f32 %v1162_v22, %v1160_v52  ;;  %v1185_v55 = vmul.f32 %v1182_v54, %v1160_v52  ;;  %v1205_v16 = vmul.f32 %v1202_v59, %v1160_v52 }
 0x4d9   :  { %v1164_v58 = vmul.f32 %v1162_v22, %v1159_v63  ;;  %v1184_v8 = vmul.f32 %v1182_v54, %v1159_v63  ;;  %v1204_v53 = vmul.f32 %v1202_v59, %v1159_v63  ;;  %v1222_v22 = vstv %s3321_s27  ;;  %v3327_v59 = vld [vmem:[%s5966_s3 + $0x58] sm:$0xff]  ;;  %s3351_s27 = sld [smem:[#allocation3 + $0x36]] }
 0x4da   :  { %1173 = vrot.lane.b32.xlu0 %v1165_v24, %s3492_s15  ;;  %v1223_v24 = vmul.f32 %v1222_v22, %v1158_v50 }
 0x4db   :  { %1171 = vrot.lane.b32.xlu1 %v1164_v58, %s3492_s15  ;;  %v1224_v58 = vmul.f32 %v1222_v22, %v1159_v63 }
 0x4de   :  { %1191 = vrot.lane.b32.xlu0 %v1184_v8, %s3492_s15  ;;  %v1225_v8 = vmul.f32 %v1222_v22, %v1160_v52 }
 0x4df   :  { %1189 = vrot.lane.b32.xlu1 %v1183_v57, %s3492_s15  ;;  %v3326_v57 = vld [vmem:[%s5966_s3 + $0x50] sm:$0xff] }
 0x4e2   :  { %1209 = vrot.lane.b32.xlu0 %v1203_v62, %s3492_s15 }
 0x4e3   :  { %1193 = vrot.lane.b32.xlu1 %v1185_v55, %s3492_s15 }
 0x4e6   :  { %1213 = vrot.lane.b32.xlu0 %v1205_v16, %s3492_s15 }
 0x4e7   :  { %1211 = vrot.lane.b32.xlu1 %v1204_v53, %s3492_s15 }
 0x4ea   :  { %1231 = vrot.lane.b32.xlu0 %v1224_v58, %s3492_s15 }
 0x4eb   :  { %1229 = vrot.lane.b32.xlu1 %v1223_v24, %s3492_s15 }
 0x4ee   :  { %1272 = vrot.lane.b32.xlu0 %v3326_v57, %s3492_s15 }
 0x4ef   :  { %1233 = vrot.lane.b32.xlu1 %v1225_v8, %s3492_s15  ;;  %v1284_v8 = vstv %s3328_s8  ;;  %s3343_s8 = sld [smem:[#allocation3 + $0x7c]] }
 0x4f3   :  { %1274 = vrot.lane.b32.xlu1 %v3327_v59, %s3492_s15 }
 0x547   :  { %v4225_v63 = vpop.permute.xlu0 %1169 }
 0x548   :  { %6141 = vst [vmem:[#allocation91_spill] sm:$0xff] %v4225_v63 }
 0x54c   :  { %v4227_v54 = vpop.permute.xlu0 %1173 }
 0x54d   :  { %6142 = vst [vmem:[#allocation92_spill] sm:$0xff] %v4227_v54  ;;  %v4229_v50 = vpop.permute.xlu1 %1171 }
 0x54e   :  { %6143 = vst [vmem:[#allocation93_spill] sm:$0xff] %v4229_v50  ;;  %v1324_v50 = vstv %s3330_s12  ;;  %s3386_s12 = sld [smem:[#allocation3 + $0x60]] }
 0x550   :  { %v4231_v62 = vpop.permute.xlu0 %1191 }
 0x551   :  { %6144 = vst [vmem:[#allocation94_spill] sm:$0xff] %v4231_v62  ;;  %v4233_v55 = vpop.permute.xlu1 %1189 }
 0x552   :  { %6145 = vst [vmem:[#allocation95_spill] sm:$0xff] %v4233_v55 }
 0x554   :  { %v4235_v52 = vpop.permute.xlu0 %1209 }
 0x555   :  { %6146 = vst [vmem:[#allocation96_spill] sm:$0xff] %v4235_v52  ;;  %v4237_v16 = vpop.permute.xlu1 %1193 }
 0x556   :  { %6147 = vst [vmem:[#allocation97_spill] sm:$0xff] %v4237_v16 }
 0x558   :  { %v4239_v53 = vpop.permute.xlu0 %1213 }
 0x559   :  { %6148 = vst [vmem:[#allocation98_spill] sm:$0xff] %v4239_v53  ;;  %v4241_v22 = vpop.permute.xlu1 %1211 }
 0x55a   :  { %6149 = vst [vmem:[#allocation99_spill] sm:$0xff] %v4241_v22 }
 0x55c   :  { %v4243_v58 = vpop.permute.xlu0 %1231 }
 0x55d   :  { %6150 = vst [vmem:[#allocation100_spill] sm:$0xff] %v4243_v58  ;;  %v4245_v24 = vpop.permute.xlu1 %1229 }
 0x55e   :  { %6151 = vst [vmem:[#allocation101_spill] sm:$0xff] %v4245_v24  ;;  %v1304_v24 = vstv %s3329_s9  ;;  %s3353_s9 = sld [smem:[#allocation3 + $0x7e]] }
 0x560   :  { %v1273_v57 = vpop.permute.xlu0 %1272 }
 0x561   :  { %v1280_v59 = vmul.f32 %v1273_v57, %v4059_v13  ;;  %v4248_v62 = vpop.permute.xlu1 %1233 }
 0x562   :  { %6152 = vst [vmem:[#allocation102_spill] sm:$0xff] %v4248_v62 }
 0x563   :  { %v1285_v55 = vmul.f32 %v1284_v8, %v1280_v59  ;;  %v1305_v62 = vmul.f32 %v1304_v24, %v1280_v59 }
 0x565   :  { %v1275_v52 = vpop.permute.xlu1 %1274  ;;  %1291 = vrot.lane.b32.xlu0 %v1285_v55, %s3491_s10  ;;  %v1325_v55 = vmul.f32 %v1324_v50, %v1280_v59 }
 0x566   :  { %v1276_v53 = vsel %vm376_vm4, %v1273_v57, %v1275_v52  ;;  %v1282_v16 = vmul.f32 0.0, %v1275_v52 }
 0x567   :  { %v1281_v22 = vmul.f32 %v1276_v53, %v4054_v51 }
 0x568   :  { %v1287_v58 = vmul.f32 %v1284_v8, %v1282_v16  ;;  %v1307_v57 = vmul.f32 %v1304_v24, %v1282_v16  ;;  %v1327_v52 = vmul.f32 %v1324_v50, %v1282_v16 }
 0x569   :  { %v1286_v54 = vmul.f32 %v1284_v8, %v1281_v22  ;;  %v1306_v63 = vmul.f32 %v1304_v24, %v1281_v22  ;;  %v1326_v53 = vmul.f32 %v1324_v50, %v1281_v22  ;;  %v1344_v8 = vstv %s3331_s13  ;;  %v3333_v50 = vld [vmem:[%s5966_s3 + $0x68] sm:$0xff]  ;;  %s3368_s13 = sld [smem:[#allocation3 + $0x15]] }
 0x56a   :  { %1295 = vrot.lane.b32.xlu0 %v1287_v58, %s3491_s10  ;;  %v1345_v58 = vmul.f32 %v1344_v8, %v1280_v59 }
 0x56b   :  { %1293 = vrot.lane.b32.xlu1 %v1286_v54, %s3491_s10  ;;  %v1346_v54 = vmul.f32 %v1344_v8, %v1281_v22 }
 0x56e   :  { %1313 = vrot.lane.b32.xlu0 %v1306_v63, %s3491_s10  ;;  %v3332_v63 = vld [vmem:[%s5966_s3 + $0x60] sm:$0xff] }
 0x56f   :  { %1311 = vrot.lane.b32.xlu1 %v1305_v62, %s3491_s10  ;;  %v1347_v62 = vmul.f32 %v1344_v8, %v1282_v16 }
 0x572   :  { %1331 = vrot.lane.b32.xlu0 %v1325_v55, %s3491_s10 }
 0x573   :  { %1315 = vrot.lane.b32.xlu1 %v1307_v57, %s3491_s10 }
 0x576   :  { %1335 = vrot.lane.b32.xlu0 %v1327_v52, %s3491_s10 }
 0x577   :  { %1333 = vrot.lane.b32.xlu1 %v1326_v53, %s3491_s10 }
 0x57a   :  { %1353 = vrot.lane.b32.xlu0 %v1346_v54, %s3491_s10 }
 0x57b   :  { %1351 = vrot.lane.b32.xlu1 %v1345_v58, %s3491_s10 }
 0x57e   :  { %1367 = vrot.lane.b32.xlu0 %v3332_v63, %s3495_s11 }
 0x57f   :  { %1355 = vrot.lane.b32.xlu1 %v1347_v62, %s3491_s10  ;;  %v1379_v62 = vstv %s3334_s19  ;;  %s3349_s19 = sld [smem:[#allocation3 + $0x7d]] }
 0x583   :  { %1369 = vrot.lane.b32.xlu1 %v3333_v50, %s3495_s11 }
 0x5d7   :  { %v4272_v22 = vpop.permute.xlu0 %1291 }
 0x5d8   :  { %6153 = vst [vmem:[#allocation103_spill] sm:$0xff] %v4272_v22 }
 0x5dc   :  { %v4274_v24 = vpop.permute.xlu0 %1295 }
 0x5dd   :  { %6154 = vst [vmem:[#allocation104_spill] sm:$0xff] %v4274_v24  ;;  %v4276_v59 = vpop.permute.xlu1 %1293 }
 0x5de   :  { %6155 = vst [vmem:[#allocation105_spill] sm:$0xff] %v4276_v59  ;;  %v1419_v59 = vstv %s3336_s21  ;;  %s3392_s21 = sld [smem:[#allocation3 + $0x61]] }
 0x5e0   :  { %v4278_v55 = vpop.permute.xlu0 %1313 }
 0x5e1   :  { %6156 = vst [vmem:[#allocation106_spill] sm:$0xff] %v4278_v55  ;;  %v4280_v57 = vpop.permute.xlu1 %1311 }
 0x5e2   :  { %6157 = vst [vmem:[#allocation107_spill] sm:$0xff] %v4280_v57 }
 0x5e4   :  { %v4282_v16 = vpop.permute.xlu0 %1331 }
 0x5e5   :  { %6158 = vst [vmem:[#allocation108_spill] sm:$0xff] %v4282_v16  ;;  %v4284_v52 = vpop.permute.xlu1 %1315 }
 0x5e6   :  { %6159 = vst [vmem:[#allocation109_spill] sm:$0xff] %v4284_v52 }
 0x5e8   :  { %v4286_v53 = vpop.permute.xlu0 %1335 }
 0x5e9   :  { %6160 = vst [vmem:[#allocation110_spill] sm:$0xff] %v4286_v53  ;;  %v4288_v8 = vpop.permute.xlu1 %1333 }
 0x5ea   :  { %6161 = vst [vmem:[#allocation111_spill] sm:$0xff] %v4288_v8 }
 0x5ec   :  { %v4290_v54 = vpop.permute.xlu0 %1353 }
 0x5ed   :  { %6162 = vst [vmem:[#allocation112_spill] sm:$0xff] %v4290_v54  ;;  %v4292_v58 = vpop.permute.xlu1 %1351 }
 0x5ee   :  { %6163 = vst [vmem:[#allocation113_spill] sm:$0xff] %v4292_v58  ;;  %v1399_v58 = vstv %s3335_s20  ;;  %s3359_s20 = sld [smem:[#allocation3 + $0x7f]] }
 0x5f0   :  { %v1368_v63 = vpop.permute.xlu0 %1367 }
 0x5f1   :  { %v1375_v50 = vmul.f32 %v1368_v63, %v4059_v13  ;;  %v4295_v55 = vpop.permute.xlu1 %1355 }
 0x5f2   :  { %6164 = vst [vmem:[#allocation114_spill] sm:$0xff] %v4295_v55 }
 0x5f3   :  { %v1380_v57 = vmul.f32 %v1379_v62, %v1375_v50  ;;  %v1400_v55 = vmul.f32 %v1399_v58, %v1375_v50 }
 0x5f5   :  { %v1370_v16 = vpop.permute.xlu1 %1369  ;;  %1386 = vrot.lane.b32.xlu0 %v1380_v57, %s3490_s5  ;;  %v1420_v57 = vmul.f32 %v1419_v59, %v1375_v50 }
 0x5f6   :  { %v1371_v53 = vsel %vm278_vm5, %v1368_v63, %v1370_v16  ;;  %v1377_v52 = vmul.f32 0.0, %v1370_v16 }
 0x5f7   :  { %v1376_v8 = vmul.f32 %v1371_v53, %v4054_v51 }
 0x5f8   :  { %v1382_v54 = vmul.f32 %v1379_v62, %v1377_v52  ;;  %v1402_v63 = vmul.f32 %v1399_v58, %v1377_v52  ;;  %v1422_v16 = vmul.f32 %v1419_v59, %v1377_v52 }
 0x5f9   :  { %v1381_v24 = vmul.f32 %v1379_v62, %v1376_v8  ;;  %v1401_v22 = vmul.f32 %v1399_v58, %v1376_v8  ;;  %v1421_v53 = vmul.f32 %v1419_v59, %v1376_v8  ;;  %v1439_v62 = vstv %s3337_s1  ;;  %v3339_v59 = vld [vmem:[%s5966_s3 + $0x78] sm:$0xff]  ;;  %s3378_s1 = sld [smem:[#allocation3 + $0x17]] }
 0x5fa   :  { %1390 = vrot.lane.b32.xlu0 %v1382_v54, %s3490_s5  ;;  %v1440_v54 = vmul.f32 %v1439_v62, %v1375_v50 }
 0x5fb   :  { %1388 = vrot.lane.b32.xlu1 %v1381_v24, %s3490_s5  ;;  %v1441_v24 = vmul.f32 %v1439_v62, %v1376_v8 }
 0x5fe   :  { %1408 = vrot.lane.b32.xlu0 %v1401_v22, %s3490_s5  ;;  %v3338_v22 = vld [vmem:[%s5966_s3 + $0x70] sm:$0xff] }
 0x5ff   :  { %1406 = vrot.lane.b32.xlu1 %v1400_v55, %s3490_s5  ;;  %v1442_v55 = vmul.f32 %v1439_v62, %v1377_v52 }
 0x602   :  { %1426 = vrot.lane.b32.xlu0 %v1420_v57, %s3490_s5 }
 0x603   :  { %1410 = vrot.lane.b32.xlu1 %v1402_v63, %s3490_s5 }
 0x606   :  { %1430 = vrot.lane.b32.xlu0 %v1422_v16, %s3490_s5 }
 0x607   :  { %1428 = vrot.lane.b32.xlu1 %v1421_v53, %s3490_s5 }
 0x60a   :  { %1448 = vrot.lane.b32.xlu0 %v1441_v24, %s3490_s5 }
 0x60b   :  { %1446 = vrot.lane.b32.xlu1 %v1440_v54, %s3490_s5 }
 0x60e   :  { %1462 = vrot.lane.b32.xlu0 %v3338_v22, %s3494_s30 }
 0x60f   :  { %1450 = vrot.lane.b32.xlu1 %v1442_v55, %s3490_s5  ;;  %v1474_v55 = vstv %s3340_s29  ;;  %s3364_s29 = sld [smem:[#allocation3 + $0x5c]] }
 0x613   :  { %1464 = vrot.lane.b32.xlu1 %v3339_v59, %s3494_s30 }
 0x667   :  { %v4319_v8 = vpop.permute.xlu0 %1386 }
 0x668   :  { %6165 = vst [vmem:[#allocation115_spill] sm:$0xff] %v4319_v8 }
 0x66c   :  { %v4321_v58 = vpop.permute.xlu0 %1390 }
 0x66d   :  { %6166 = vst [vmem:[#allocation116_spill] sm:$0xff] %v4321_v58  ;;  %v4323_v50 = vpop.permute.xlu1 %1388 }
 0x66e   :  { %6167 = vst [vmem:[#allocation117_spill] sm:$0xff] %v4323_v50  ;;  %v1514_v50 = vstv %s3342_s7  ;;  %s3398_s7 = sld [smem:[#allocation3 + $0x62]] }
 0x670   :  { %v4325_v57 = vpop.permute.xlu0 %1408 }
 0x671   :  { %6168 = vst [vmem:[#allocation118_spill] sm:$0xff] %v4325_v57  ;;  %v4327_v63 = vpop.permute.xlu1 %1406 }
 0x672   :  { %6169 = vst [vmem:[#allocation119_spill] sm:$0xff] %v4327_v63 }
 0x674   :  { %v4329_v52 = vpop.permute.xlu0 %1426 }
 0x675   :  { %6170 = vst [vmem:[#allocation120_spill] sm:$0xff] %v4329_v52  ;;  %v4331_v16 = vpop.permute.xlu1 %1410 }
 0x676   :  { %6171 = vst [vmem:[#allocation121_spill] sm:$0xff] %v4331_v16 }
 0x678   :  { %v4333_v53 = vpop.permute.xlu0 %1430 }
 0x679   :  { %6172 = vst [vmem:[#allocation122_spill] sm:$0xff] %v4333_v53  ;;  %v4335_v62 = vpop.permute.xlu1 %1428 }
 0x67a   :  { %6173 = vst [vmem:[#allocation123_spill] sm:$0xff] %v4335_v62 }
 0x67c   :  { %v4337_v24 = vpop.permute.xlu0 %1448 }
 0x67d   :  { %6174 = vst [vmem:[#allocation124_spill] sm:$0xff] %v4337_v24  ;;  %v4339_v54 = vpop.permute.xlu1 %1446 }
 0x67e   :  { %6175 = vst [vmem:[#allocation125_spill] sm:$0xff] %v4339_v54  ;;  %v1494_v54 = vstv %s3341_s6  ;;  %s3365_s6 = sld [smem:[#allocation3 + $0x80]] }
 0x680   :  { %v1463_v22 = vpop.permute.xlu0 %1462 }
 0x681   :  { %v1470_v59 = vmul.f32 %v1463_v22, %v4059_v13  ;;  %v4342_v57 = vpop.permute.xlu1 %1450 }
 0x682   :  { %6176 = vst [vmem:[#allocation126_spill] sm:$0xff] %v4342_v57 }
 0x683   :  { %v1475_v63 = vmul.f32 %v1474_v55, %v1470_v59  ;;  %v1495_v57 = vmul.f32 %v1494_v54, %v1470_v59 }
 0x685   :  { %v1465_v52 = vpop.permute.xlu1 %1464  ;;  %1481 = vrot.lane.b32.xlu0 %v1475_v63, %s3489_s26  ;;  %v1515_v63 = vmul.f32 %v1514_v50, %v1470_v59 }
 0x686   :  { %v1466_v53 = vsel %vm180_vm6, %v1463_v22, %v1465_v52  ;;  %v1472_v16 = vmul.f32 0.0, %v1465_v52 }
 0x687   :  { %v1471_v62 = vmul.f32 %v1466_v53, %v4054_v51 }
 0x688   :  { %v1477_v24 = vmul.f32 %v1474_v55, %v1472_v16  ;;  %v1497_v22 = vmul.f32 %v1494_v54, %v1472_v16  ;;  %v1517_v52 = vmul.f32 %v1514_v50, %v1472_v16 }
 0x689   :  { %v1476_v58 = vmul.f32 %v1474_v55, %v1471_v62  ;;  %v1496_v8 = vmul.f32 %v1494_v54, %v1471_v62  ;;  %v1516_v53 = vmul.f32 %v1514_v50, %v1471_v62  ;;  %v1534_v55 = vstv %s3343_s8  ;;  %v3345_v50 = vld [vmem:[%s5966_s3 + $0x88] sm:$0xff]  ;;  %s3352_s8 = sld [smem:[#allocation3 + $0x5a]] }
 0x68a   :  { %1485 = vrot.lane.b32.xlu0 %v1477_v24, %s3489_s26  ;;  %v1535_v24 = vmul.f32 %v1534_v55, %v1470_v59 }
 0x68b   :  { %1483 = vrot.lane.b32.xlu1 %v1476_v58, %s3489_s26  ;;  %v1536_v58 = vmul.f32 %v1534_v55, %v1471_v62 }
 0x68e   :  { %1503 = vrot.lane.b32.xlu0 %v1496_v8, %s3489_s26  ;;  %v3344_v8 = vld [vmem:[%s5966_s3 + $0x80] sm:$0xff] }
 0x68f   :  { %1501 = vrot.lane.b32.xlu1 %v1495_v57, %s3489_s26  ;;  %v1537_v57 = vmul.f32 %v1534_v55, %v1472_v16 }
 0x692   :  { %1521 = vrot.lane.b32.xlu0 %v1515_v63, %s3489_s26 }
 0x693   :  { %1505 = vrot.lane.b32.xlu1 %v1497_v22, %s3489_s26 }
 0x696   :  { %1525 = vrot.lane.b32.xlu0 %v1517_v52, %s3489_s26 }
 0x697   :  { %1523 = vrot.lane.b32.xlu1 %v1516_v53, %s3489_s26 }
 0x69a   :  { %1543 = vrot.lane.b32.xlu0 %v1536_v58, %s3489_s26 }
 0x69b   :  { %1541 = vrot.lane.b32.xlu1 %v1535_v24, %s3489_s26 }
 0x69e   :  { %1557 = vrot.lane.b32.xlu0 %v3344_v8, %s3493_s24 }
 0x69f   :  { %1545 = vrot.lane.b32.xlu1 %v1537_v57, %s3489_s26  ;;  %v1569_v57 = vstv %s3346_s16  ;;  %s3370_s16 = sld [smem:[#allocation3 + $0x5d]] }
 0x6a3   :  { %1559 = vrot.lane.b32.xlu1 %v3345_v50, %s3493_s24 }
 0x6f7   :  { %v4366_v62 = vpop.permute.xlu0 %1481 }
 0x6f8   :  { %6177 = vst [vmem:[#allocation127_spill] sm:$0xff] %v4366_v62  ;;  %v1609_v62 = vstv %s3348_s18  ;;  %s3357_s18 = sld [smem:[#allocation3 + $0x37]] }
 0x6fc   :  { %v4368_v54 = vpop.permute.xlu0 %1485 }
 0x6fd   :  { %6178 = vst [vmem:[#allocation128_spill] sm:$0xff] %v4368_v54  ;;  %v4370_v59 = vpop.permute.xlu1 %1483 }
 0x6fe   :  { %6179 = vst [vmem:[#allocation129_spill] sm:$0xff] %v4370_v59  ;;  %v1711_v59 = vstv %s3352_s8  ;;  %s3384_s8 = sld [smem:[#allocation3 + $0x18]] }
 0x700   :  { %v4372_v63 = vpop.permute.xlu0 %1503 }
 0x701   :  { %6180 = vst [vmem:[#allocation130_spill] sm:$0xff] %v4372_v63  ;;  %v4374_v22 = vpop.permute.xlu1 %1501 }
 0x702   :  { %6181 = vst [vmem:[#allocation131_spill] sm:$0xff] %v4374_v22 }
 0x704   :  { %v4376_v16 = vpop.permute.xlu0 %1521 }
 0x705   :  { %6182 = vst [vmem:[#allocation132_spill] sm:$0xff] %v4376_v16  ;;  %v4378_v52 = vpop.permute.xlu1 %1505 }
 0x706   :  { %6183 = vst [vmem:[#allocation133_spill] sm:$0xff] %v4378_v52 }
 0x708   :  { %v4380_v53 = vpop.permute.xlu0 %1525 }
 0x709   :  { %6184 = vst [vmem:[#allocation134_spill] sm:$0xff] %v4380_v53  ;;  %v4382_v55 = vpop.permute.xlu1 %1523 }
 0x70a   :  { %6185 = vst [vmem:[#allocation135_spill] sm:$0xff] %v4382_v55 }
 0x70c   :  { %v4384_v58 = vpop.permute.xlu0 %1543 }
 0x70d   :  { %6186 = vst [vmem:[#allocation136_spill] sm:$0xff] %v4384_v58  ;;  %v4386_v24 = vpop.permute.xlu1 %1541 }
 0x70e   :  { %6187 = vst [vmem:[#allocation137_spill] sm:$0xff] %v4386_v24  ;;  %v1589_v24 = vstv %s3347_s17  ;;  %s3356_s17 = sld [smem:[#allocation3 + $0x13]] }
 0x710   :  { %v1558_v8 = vpop.permute.xlu0 %1557 }
 0x711   :  { %v1565_v50 = vmul.f32 %v1558_v8, %v4059_v13  ;;  %v4389_v63 = vpop.permute.xlu1 %1545 }
 0x712   :  { %6188 = vst [vmem:[#allocation138_spill] sm:$0xff] %v4389_v63 }
 0x713   :  { %v1570_v22 = vmul.f32 %v1569_v57, %v1565_v50  ;;  %v1590_v63 = vmul.f32 %v1589_v24, %v1565_v50 }
 0x715   :  { %v1560_v16 = vpop.permute.xlu1 %1559  ;;  %1576 = vrot.lane.b32.xlu0 %v1570_v22, %s3488_s22  ;;  %v1610_v22 = vmul.f32 %v1609_v62, %v1565_v50 }
 0x716   :  { %v1561_v53 = vsel %vm82_vm7, %v1558_v8, %v1560_v16  ;;  %v1567_v52 = vmul.f32 0.0, %v1560_v16 }
 0x717   :  { %v1566_v55 = vmul.f32 %v1561_v53, %v4054_v51  ;;  %v1629_v53 = vstv %s3349_s19  ;;  %s3358_s19 = sld [smem:[#allocation3 + $0x5b]] }
 0x718   :  { %v1572_v58 = vmul.f32 %v1569_v57, %v1567_v52  ;;  %v1592_v8 = vmul.f32 %v1589_v24, %v1567_v52  ;;  %v1612_v51 = vmul.f32 %v1609_v62, %v1567_v52 }
 0x719   :  { %v1571_v54 = vmul.f32 %v1569_v57, %v1566_v55  ;;  %v1591_v13 = vmul.f32 %v1589_v24, %v1566_v55  ;;  %v1611_v16 = vmul.f32 %v1609_v62, %v1566_v55  ;;  %v1632_v24 = vmul.f32 %v1629_v53, %v1567_v52  ;;  %v1656_v62 = vld [vmem:[%s5966_s3 + $0x8] sm:$0xff] }
 0x71a   :  { %1580 = vrot.lane.b32.xlu0 %v1572_v58, %s3488_s22  ;;  %v1630_v58 = vmul.f32 %v1629_v53, %v1565_v50 }
 0x71b   :  { %1578 = vrot.lane.b32.xlu1 %v1571_v54, %s3488_s22  ;;  %v1631_v54 = vmul.f32 %v1629_v53, %v1566_v55 }
 0x71e   :  { %1598 = vrot.lane.b32.xlu0 %v1591_v13, %s3488_s22 }
 0x71f   :  { %1596 = vrot.lane.b32.xlu1 %v1590_v63, %s3488_s22  ;;  %v1655_v63 = vld [vmem:[%s5966_s3] sm:$0xff] }
 0x722   :  { %1616 = vrot.lane.b32.xlu0 %v1610_v22, %s3488_s22 }
 0x723   :  { %1600 = vrot.lane.b32.xlu1 %v1592_v8, %s3488_s22 }
 0x726   :  { %1620 = vrot.lane.b32.xlu0 %v1612_v51, %s3488_s22 }
 0x727   :  { %1618 = vrot.lane.b32.xlu1 %v1611_v16, %s3488_s22 }
 0x72a   :  { %1638 = vrot.lane.b32.xlu0 %v1631_v54, %s3488_s22 }
 0x72b   :  { %1636 = vrot.lane.b32.xlu1 %v1630_v58, %s3488_s22 }
 0x72e   :  { %1659 = vrot.lane.b32.xlu0 %v1655_v63, %s3488_s22  ;;  %v1671_v63 = vstv %s3350_s25  ;;  %s3380_s25 = sld [smem:[#allocation3 + $0x5f]] }
 0x72f   :  { %1640 = vrot.lane.b32.xlu1 %v1632_v24, %s3488_s22 }
 0x733   :  { %1661 = vrot.lane.b32.xlu1 %v1656_v62, %s3488_s22 }
 0x787   :  { %v4413_v55 = vpop.permute.xlu0 %1576 }
 0x788   :  { %6189 = vst [vmem:[#allocation139_spill] sm:$0xff] %v4413_v55 }
 0x78c   :  { %v4415_v57 = vpop.permute.xlu0 %1580 }
 0x78d   :  { %6190 = vst [vmem:[#allocation140_spill] sm:$0xff] %v4415_v57  ;;  %v4417_v50 = vpop.permute.xlu1 %1578  ;;  %v1691_v57 = vstv %s3351_s27  ;;  %s3362_s27 = sld [smem:[#allocation3 + $0x14]] }
 0x78e   :  { %6191 = vst [vmem:[#allocation141_spill] sm:$0xff] %v4417_v50 }
 0x790   :  { %v4419_v13 = vpop.permute.xlu0 %1598 }
 0x791   :  { %6192 = vst [vmem:[#allocation142_spill] sm:$0xff] %v4419_v13  ;;  %v4421_v22 = vpop.permute.xlu1 %1596 }
 0x792   :  { %6193 = vst [vmem:[#allocation143_spill] sm:$0xff] %v4421_v22 }
 0x794   :  { %v4423_v52 = vpop.permute.xlu0 %1616 }
 0x795   :  { %6194 = vst [vmem:[#allocation144_spill] sm:$0xff] %v4423_v52  ;;  %v4425_v8 = vpop.permute.xlu1 %1600  ;;  %v4440_v52 = vld [vmem:[%s5963_s0 + $0x28] sm:$0xff] }
 0x796   :  { %6195 = vst [vmem:[#allocation145_spill] sm:$0xff] %v4425_v8 }
 0x798   :  { %v4427_v51 = vpop.permute.xlu0 %1620 }
 0x799   :  { %6196 = vst [vmem:[#allocation146_spill] sm:$0xff] %v4427_v51  ;;  %v4429_v16 = vpop.permute.xlu1 %1618  ;;  %v4445_v51 = vld [vmem:[%s5963_s0 + $0x20] sm:$0xff] }
 0x79a   :  { %6197 = vst [vmem:[#allocation147_spill] sm:$0xff] %v4429_v16 }
 0x79c   :  { %v4431_v53 = vpop.permute.xlu0 %1638 }
 0x79d   :  { %6198 = vst [vmem:[#allocation148_spill] sm:$0xff] %v4431_v53  ;;  %v4433_v54 = vpop.permute.xlu1 %1636 }
 0x79e   :  { %6199 = vst [vmem:[#allocation149_spill] sm:$0xff] %v4433_v54 }
 0x7a0   :  { %v1660_v58 = vpop.permute.xlu0 %1659 }
 0x7a1   :  { %v1667_v24 = vmul.f32 0.0, %v1660_v58  ;;  %v4435_v62 = vpop.permute.xlu1 %1640 }
 0x7a2   :  { %6200 = vst [vmem:[#allocation150_spill] sm:$0xff] %v4435_v62 }
 0x7a3   :  { %v1672_v8 = vmul.f32 %v1671_v63, %v1667_v24  ;;  %v1692_v50 = vmul.f32 %v1691_v57, %v1667_v24 }
 0x7a5   :  { %v1662_v53 = vpop.permute.xlu1 %1661  ;;  %1678 = vrot.lane.b32.xlu0 %v1672_v8, %s3493_s24  ;;  %v1712_v8 = vmul.f32 %v1711_v59, %v1667_v24 }
 0x7a6   :  { %v1663_v54 = vsel %vm60_vm0, %v1660_v58, %v1662_v53  ;;  %v1669_v62 = vmul.f32 %v1662_v53, %v4440_v52 }
 0x7a7   :  { %v1668_v16 = vmul.f32 %v1663_v54, %v4445_v51 }
 0x7a8   :  { %v1674_v22 = vmul.f32 %v1671_v63, %v1669_v62  ;;  %v1694_v58 = vmul.f32 %v1691_v57, %v1669_v62  ;;  %v1714_v53 = vmul.f32 %v1711_v59, %v1669_v62 }
 0x7a9   :  { %v1673_v13 = vmul.f32 %v1671_v63, %v1668_v16  ;;  %v1693_v55 = vmul.f32 %v1691_v57, %v1668_v16  ;;  %v1713_v54 = vmul.f32 %v1711_v59, %v1668_v16  ;;  %v1731_v63 = vstv %s3353_s9  ;;  %v3355_v59 = vld [vmem:[%s5966_s3 + $0x18] sm:$0xff]  ;;  %s3385_s9 = sld [smem:[#allocation3 + $0x3c]] }
 0x7aa   :  { %1682 = vrot.lane.b32.xlu0 %v1674_v22, %s3493_s24  ;;  %v1732_v22 = vmul.f32 %v1731_v63, %v1667_v24  ;;  %v1734_v57 = vmul.f32 %v1731_v63, %v1669_v62 }
 0x7ab   :  { %1680 = vrot.lane.b32.xlu1 %v1673_v13, %s3493_s24  ;;  %v1733_v13 = vmul.f32 %v1731_v63, %v1668_v16 }
 0x7ae   :  { %1700 = vrot.lane.b32.xlu0 %v1693_v55, %s3493_s24  ;;  %v3354_v55 = vld [vmem:[%s5966_s3 + $0x10] sm:$0xff] }
 0x7af   :  { %1698 = vrot.lane.b32.xlu1 %v1692_v50, %s3493_s24 }
 0x7b2   :  { %1718 = vrot.lane.b32.xlu0 %v1712_v8, %s3493_s24 }
 0x7b3   :  { %1702 = vrot.lane.b32.xlu1 %v1694_v58, %s3493_s24 }
 0x7b6   :  { %1722 = vrot.lane.b32.xlu0 %v1714_v53, %s3493_s24 }
 0x7b7   :  { %1720 = vrot.lane.b32.xlu1 %v1713_v54, %s3493_s24 }
 0x7ba   :  { %1740 = vrot.lane.b32.xlu0 %v1733_v13, %s3493_s24 }
 0x7bb   :  { %1738 = vrot.lane.b32.xlu1 %v1732_v22, %s3493_s24 }
 0x7be   :  { %1754 = vrot.lane.b32.xlu0 %v3354_v55, %s3489_s26 }
 0x7bf   :  { %1742 = vrot.lane.b32.xlu1 %v1734_v57, %s3493_s24  ;;  %v1766_v57 = vstv %s3356_s17  ;;  %s3371_s17 = sld [smem:[#allocation3 + $0x81]] }
 0x7c3   :  { %1756 = vrot.lane.b32.xlu1 %v3355_v59, %s3489_s26 }
 0x817   :  { %v4470_v50 = vpop.permute.xlu0 %1678 }
 0x818   :  { %6201 = vst [vmem:[#allocation151_spill] sm:$0xff] %v4470_v50 }
 0x81c   :  { %v4472_v16 = vpop.permute.xlu0 %1682 }
 0x81d   :  { %6202 = vst [vmem:[#allocation152_spill] sm:$0xff] %v4472_v16  ;;  %v4474_v24 = vpop.permute.xlu1 %1680 }
 0x81e   :  { %6203 = vst [vmem:[#allocation153_spill] sm:$0xff] %v4474_v24  ;;  %v1806_v24 = vstv %s3358_s19  ;;  %s3390_s19 = sld [smem:[#allocation3 + $0x19]] }
 0x820   :  { %v4476_v8 = vpop.permute.xlu0 %1700 }
 0x821   :  { %6204 = vst [vmem:[#allocation154_spill] sm:$0xff] %v4476_v8  ;;  %v4478_v58 = vpop.permute.xlu1 %1698 }
 0x822   :  { %6205 = vst [vmem:[#allocation155_spill] sm:$0xff] %v4478_v58 }
 0x824   :  { %v4480_v62 = vpop.permute.xlu0 %1718 }
 0x825   :  { %6206 = vst [vmem:[#allocation156_spill] sm:$0xff] %v4480_v62  ;;  %v4482_v53 = vpop.permute.xlu1 %1702 }
 0x826   :  { %6207 = vst [vmem:[#allocation157_spill] sm:$0xff] %v4482_v53 }
 0x828   :  { %v4484_v54 = vpop.permute.xlu0 %1722 }
 0x829   :  { %6208 = vst [vmem:[#allocation158_spill] sm:$0xff] %v4484_v54  ;;  %v4486_v63 = vpop.permute.xlu1 %1720 }
 0x82a   :  { %6209 = vst [vmem:[#allocation159_spill] sm:$0xff] %v4486_v63 }
 0x82c   :  { %v4488_v13 = vpop.permute.xlu0 %1740 }
 0x82d   :  { %6210 = vst [vmem:[#allocation160_spill] sm:$0xff] %v4488_v13  ;;  %v4490_v22 = vpop.permute.xlu1 %1738 }
 0x82e   :  { %6211 = vst [vmem:[#allocation161_spill] sm:$0xff] %v4490_v22  ;;  %v1786_v22 = vstv %s3357_s18  ;;  %s3413_s18 = sld [smem:[#allocation3 + $0x41]] }
 0x830   :  { %v1755_v55 = vpop.permute.xlu0 %1754 }
 0x831   :  { %v1762_v59 = vmul.f32 0.0, %v1755_v55  ;;  %v4492_v16 = vpop.permute.xlu1 %1742 }
 0x832   :  { %6212 = vst [vmem:[#allocation162_spill] sm:$0xff] %v4492_v16 }
 0x833   :  { %v1767_v58 = vmul.f32 %v1766_v57, %v1762_v59  ;;  %v1787_v50 = vmul.f32 %v1786_v22, %v1762_v59 }
 0x835   :  { %v1757_v8 = vpop.permute.xlu1 %1756  ;;  %1773 = vrot.lane.b32.xlu0 %v1767_v58, %s3494_s30  ;;  %v1807_v58 = vmul.f32 %v1806_v24, %v1762_v59 }
 0x836   :  { %v1758_v54 = vsel %vm158_vm1, %v1755_v55, %v1757_v8  ;;  %v1764_v62 = vmul.f32 %v1757_v8, %v4440_v52 }
 0x837   :  { %v1763_v63 = vmul.f32 %v1758_v54, %v4445_v51 }
 0x838   :  { %v1769_v13 = vmul.f32 %v1766_v57, %v1764_v62  ;;  %v1789_v55 = vmul.f32 %v1786_v22, %v1764_v62  ;;  %v1809_v8 = vmul.f32 %v1806_v24, %v1764_v62 }
 0x839   :  { %v1768_v53 = vmul.f32 %v1766_v57, %v1763_v63  ;;  %v1788_v16 = vmul.f32 %v1786_v22, %v1763_v63  ;;  %v1808_v54 = vmul.f32 %v1806_v24, %v1763_v63  ;;  %v1826_v57 = vstv %s3359_s20  ;;  %v3361_v24 = vld [vmem:[%s5966_s3 + $0x28] sm:$0xff]  ;;  %s3391_s20 = sld [smem:[#allocation3 + $0x3d]] }
 0x83a   :  { %1777 = vrot.lane.b32.xlu0 %v1769_v13, %s3494_s30  ;;  %v1827_v13 = vmul.f32 %v1826_v57, %v1762_v59 }
 0x83b   :  { %1775 = vrot.lane.b32.xlu1 %v1768_v53, %s3494_s30  ;;  %v1828_v53 = vmul.f32 %v1826_v57, %v1763_v63 }
 0x83e   :  { %1795 = vrot.lane.b32.xlu0 %v1788_v16, %s3494_s30  ;;  %v1829_v16 = vmul.f32 %v1826_v57, %v1764_v62 }
 0x83f   :  { %1793 = vrot.lane.b32.xlu1 %v1787_v50, %s3494_s30  ;;  %v3360_v50 = vld [vmem:[%s5966_s3 + $0x20] sm:$0xff] }
 0x842   :  { %1813 = vrot.lane.b32.xlu0 %v1807_v58, %s3494_s30 }
 0x843   :  { %1797 = vrot.lane.b32.xlu1 %v1789_v55, %s3494_s30 }
 0x846   :  { %1817 = vrot.lane.b32.xlu0 %v1809_v8, %s3494_s30 }
 0x847   :  { %1815 = vrot.lane.b32.xlu1 %v1808_v54, %s3494_s30 }
 0x84a   :  { %1835 = vrot.lane.b32.xlu0 %v1828_v53, %s3494_s30 }
 0x84b   :  { %1833 = vrot.lane.b32.xlu1 %v1827_v13, %s3494_s30 }
 0x84e   :  { %1849 = vrot.lane.b32.xlu0 %v3360_v50, %s3490_s5 }
 0x84f   :  { %1837 = vrot.lane.b32.xlu1 %v1829_v16, %s3494_s30  ;;  %v1861_v16 = vstv %s3362_s27  ;;  %s3381_s27 = sld [smem:[#allocation3 + $0x83]] }
 0x853   :  { %1851 = vrot.lane.b32.xlu1 %v3361_v24, %s3490_s5 }
 0x8a7   :  { %v4517_v63 = vpop.permute.xlu0 %1773 }
 0x8a8   :  { %6213 = vst [vmem:[#allocation163_spill] sm:$0xff] %v4517_v63 }
 0x8ac   :  { %v4519_v22 = vpop.permute.xlu0 %1777 }
 0x8ad   :  { %6214 = vst [vmem:[#allocation164_spill] sm:$0xff] %v4519_v22  ;;  %v4521_v59 = vpop.permute.xlu1 %1775 }
 0x8ae   :  { %6215 = vst [vmem:[#allocation165_spill] sm:$0xff] %v4521_v59  ;;  %v1901_v59 = vstv %s3364_s29  ;;  %s3396_s29 = sld [smem:[#allocation3 + $0x1a]] }
 0x8b0   :  { %v4523_v58 = vpop.permute.xlu0 %1795 }
 0x8b1   :  { %6216 = vst [vmem:[#allocation166_spill] sm:$0xff] %v4523_v58  ;;  %v4525_v55 = vpop.permute.xlu1 %1793 }
 0x8b2   :  { %6217 = vst [vmem:[#allocation167_spill] sm:$0xff] %v4525_v55 }
 0x8b4   :  { %v4527_v62 = vpop.permute.xlu0 %1813 }
 0x8b5   :  { %6218 = vst [vmem:[#allocation168_spill] sm:$0xff] %v4527_v62  ;;  %v4529_v8 = vpop.permute.xlu1 %1797 }
 0x8b6   :  { %6219 = vst [vmem:[#allocation169_spill] sm:$0xff] %v4529_v8 }
 0x8b8   :  { %v4531_v54 = vpop.permute.xlu0 %1817 }
 0x8b9   :  { %6220 = vst [vmem:[#allocation170_spill] sm:$0xff] %v4531_v54  ;;  %v4533_v57 = vpop.permute.xlu1 %1815 }
 0x8ba   :  { %6221 = vst [vmem:[#allocation171_spill] sm:$0xff] %v4533_v57 }
 0x8bc   :  { %v4535_v53 = vpop.permute.xlu0 %1835 }
 0x8bd   :  { %6222 = vst [vmem:[#allocation172_spill] sm:$0xff] %v4535_v53  ;;  %v4537_v13 = vpop.permute.xlu1 %1833 }
 0x8be   :  { %6223 = vst [vmem:[#allocation173_spill] sm:$0xff] %v4537_v13  ;;  %v1881_v13 = vstv %s3363_s28 }
 0x8c0   :  { %v1850_v50 = vpop.permute.xlu0 %1849 }
 0x8c1   :  { %v1857_v24 = vmul.f32 0.0, %v1850_v50  ;;  %v4539_v22 = vpop.permute.xlu1 %1837 }
 0x8c2   :  { %6224 = vst [vmem:[#allocation174_spill] sm:$0xff] %v4539_v22 }
 0x8c3   :  { %v1862_v55 = vmul.f32 %v1861_v16, %v1857_v24  ;;  %v1882_v63 = vmul.f32 %v1881_v13, %v1857_v24 }
 0x8c5   :  { %v1852_v58 = vpop.permute.xlu1 %1851  ;;  %1868 = vrot.lane.b32.xlu0 %v1862_v55, %s3495_s11  ;;  %v1902_v55 = vmul.f32 %v1901_v59, %v1857_v24 }
 0x8c6   :  { %v1853_v54 = vsel %vm256_vm2, %v1850_v50, %v1852_v58  ;;  %v1859_v62 = vmul.f32 %v1852_v58, %v4440_v52 }
 0x8c7   :  { %v1858_v57 = vmul.f32 %v1853_v54, %v4445_v51 }
 0x8c8   :  { %v1864_v53 = vmul.f32 %v1861_v16, %v1859_v62  ;;  %v1884_v50 = vmul.f32 %v1881_v13, %v1859_v62  ;;  %v1904_v58 = vmul.f32 %v1901_v59, %v1859_v62 }
 0x8c9   :  { %v1863_v8 = vmul.f32 %v1861_v16, %v1858_v57  ;;  %v1883_v22 = vmul.f32 %v1881_v13, %v1858_v57  ;;  %v1903_v54 = vmul.f32 %v1901_v59, %v1858_v57  ;;  %v1921_v16 = vstv %s3365_s6  ;;  %v3367_v59 = vld [vmem:[%s5966_s3 + $0x38] sm:$0xff]  ;;  %s3397_s6 = sld [smem:[#allocation3 + $0x3e]] }
 0x8ca   :  { %1872 = vrot.lane.b32.xlu0 %v1864_v53, %s3495_s11  ;;  %v1922_v53 = vmul.f32 %v1921_v16, %v1857_v24 }
 0x8cb   :  { %1870 = vrot.lane.b32.xlu1 %v1863_v8, %s3495_s11  ;;  %v1923_v8 = vmul.f32 %v1921_v16, %v1858_v57 }
 0x8ce   :  { %1890 = vrot.lane.b32.xlu0 %v1883_v22, %s3495_s11  ;;  %v1924_v22 = vmul.f32 %v1921_v16, %v1859_v62 }
 0x8cf   :  { %1888 = vrot.lane.b32.xlu1 %v1882_v63, %s3495_s11  ;;  %v3366_v63 = vld [vmem:[%s5966_s3 + $0x30] sm:$0xff] }
 0x8d2   :  { %1908 = vrot.lane.b32.xlu0 %v1902_v55, %s3495_s11 }
 0x8d3   :  { %1892 = vrot.lane.b32.xlu1 %v1884_v50, %s3495_s11 }
 0x8d6   :  { %1912 = vrot.lane.b32.xlu0 %v1904_v58, %s3495_s11 }
 0x8d7   :  { %1910 = vrot.lane.b32.xlu1 %v1903_v54, %s3495_s11 }
 0x8da   :  { %1930 = vrot.lane.b32.xlu0 %v1923_v8, %s3495_s11 }
 0x8db   :  { %1928 = vrot.lane.b32.xlu1 %v1922_v53, %s3495_s11 }
 0x8de   :  { %1944 = vrot.lane.b32.xlu0 %v3366_v63, %s3491_s10 }
 0x8df   :  { %1932 = vrot.lane.b32.xlu1 %v1924_v22, %s3495_s11  ;;  %v1956_v22 = vstv %s3368_s13  ;;  %s3387_s13 = sld [smem:[#allocation3 + $0x84]] }
 0x8e3   :  { %1946 = vrot.lane.b32.xlu1 %v3367_v59, %s3491_s10 }
 0x937   :  { %v4564_v57 = vpop.permute.xlu0 %1868 }
 0x938   :  { %6225 = vst [vmem:[#allocation175_spill] sm:$0xff] %v4564_v57 }
 0x93c   :  { %v4566_v13 = vpop.permute.xlu0 %1872 }
 0x93d   :  { %6226 = vst [vmem:[#allocation176_spill] sm:$0xff] %v4566_v13  ;;  %v4568_v24 = vpop.permute.xlu1 %1870 }
 0x93e   :  { %6227 = vst [vmem:[#allocation177_spill] sm:$0xff] %v4568_v24  ;;  %v1996_v24 = vstv %s3370_s16  ;;  %s3400_s16 = sld [smem:[#allocation3 + $0x1b]] }
 0x940   :  { %v4570_v55 = vpop.permute.xlu0 %1890 }
 0x941   :  { %6228 = vst [vmem:[#allocation178_spill] sm:$0xff] %v4570_v55  ;;  %v4572_v50 = vpop.permute.xlu1 %1888 }
 0x942   :  { %6229 = vst [vmem:[#allocation179_spill] sm:$0xff] %v4572_v50 }
 0x944   :  { %v4574_v62 = vpop.permute.xlu0 %1908 }
 0x945   :  { %6230 = vst [vmem:[#allocation180_spill] sm:$0xff] %v4574_v62  ;;  %v4576_v58 = vpop.permute.xlu1 %1892 }
 0x946   :  { %6231 = vst [vmem:[#allocation181_spill] sm:$0xff] %v4576_v58 }
 0x948   :  { %v4578_v54 = vpop.permute.xlu0 %1912 }
 0x949   :  { %6232 = vst [vmem:[#allocation182_spill] sm:$0xff] %v4578_v54  ;;  %v4580_v16 = vpop.permute.xlu1 %1910 }
 0x94a   :  { %6233 = vst [vmem:[#allocation183_spill] sm:$0xff] %v4580_v16 }
 0x94c   :  { %v4582_v8 = vpop.permute.xlu0 %1930 }
 0x94d   :  { %6234 = vst [vmem:[#allocation184_spill] sm:$0xff] %v4582_v8  ;;  %v4584_v53 = vpop.permute.xlu1 %1928 }
 0x94e   :  { %6235 = vst [vmem:[#allocation185_spill] sm:$0xff] %v4584_v53  ;;  %v1976_v53 = vstv %s3369_s14  ;;  %s3448_s14 = sld [smem:[#allocation3 + $0x6b]] }
 0x950   :  { %v1945_v63 = vpop.permute.xlu0 %1944 }
 0x951   :  { %v1952_v59 = vmul.f32 0.0, %v1945_v63  ;;  %v4586_v13 = vpop.permute.xlu1 %1932 }
 0x952   :  { %6236 = vst [vmem:[#allocation186_spill] sm:$0xff] %v4586_v13 }
 0x953   :  { %v1957_v50 = vmul.f32 %v1956_v22, %v1952_v59  ;;  %v1977_v57 = vmul.f32 %v1976_v53, %v1952_v59 }
 0x955   :  { %v1947_v55 = vpop.permute.xlu1 %1946  ;;  %1963 = vrot.lane.b32.xlu0 %v1957_v50, %s3492_s15  ;;  %v1997_v50 = vmul.f32 %v1996_v24, %v1952_v59 }
 0x956   :  { %v1948_v54 = vsel %vm354_vm3, %v1945_v63, %v1947_v55  ;;  %v1954_v62 = vmul.f32 %v1947_v55, %v4440_v52 }
 0x957   :  { %v1953_v16 = vmul.f32 %v1948_v54, %v4445_v51 }
 0x958   :  { %v1959_v8 = vmul.f32 %v1956_v22, %v1954_v62  ;;  %v1979_v63 = vmul.f32 %v1976_v53, %v1954_v62  ;;  %v1999_v55 = vmul.f32 %v1996_v24, %v1954_v62 }
 0x959   :  { %v1958_v58 = vmul.f32 %v1956_v22, %v1953_v16  ;;  %v1978_v13 = vmul.f32 %v1976_v53, %v1953_v16  ;;  %v1998_v54 = vmul.f32 %v1996_v24, %v1953_v16  ;;  %v2016_v22 = vstv %s3371_s17  ;;  %v3377_v24 = vld [vmem:[%s5966_s3 + $0x58] sm:$0xff]  ;;  %s3401_s17 = sld [smem:[#allocation3 + $0x3f]] }
 0x95a   :  { %1967 = vrot.lane.b32.xlu0 %v1959_v8, %s3492_s15  ;;  %v2017_v8 = vmul.f32 %v2016_v22, %v1952_v59 }
 0x95b   :  { %1965 = vrot.lane.b32.xlu1 %v1958_v58, %s3492_s15  ;;  %v2018_v58 = vmul.f32 %v2016_v22, %v1953_v16 }
 0x95e   :  { %1985 = vrot.lane.b32.xlu0 %v1978_v13, %s3492_s15  ;;  %v2019_v13 = vmul.f32 %v2016_v22, %v1954_v62 }
 0x95f   :  { %1983 = vrot.lane.b32.xlu1 %v1977_v57, %s3492_s15  ;;  %v3376_v57 = vld [vmem:[%s5966_s3 + $0x50] sm:$0xff] }
 0x962   :  { %2003 = vrot.lane.b32.xlu0 %v1997_v50, %s3492_s15 }
 0x963   :  { %1987 = vrot.lane.b32.xlu1 %v1979_v63, %s3492_s15 }
 0x966   :  { %2007 = vrot.lane.b32.xlu0 %v1999_v55, %s3492_s15 }
 0x967   :  { %2005 = vrot.lane.b32.xlu1 %v1998_v54, %s3492_s15 }
 0x96a   :  { %2025 = vrot.lane.b32.xlu0 %v2018_v58, %s3492_s15 }
 0x96b   :  { %2023 = vrot.lane.b32.xlu1 %v2017_v8, %s3492_s15 }
 0x96e   :  { %2066 = vrot.lane.b32.xlu0 %v3376_v57, %s3492_s15 }
 0x96f   :  { %2027 = vrot.lane.b32.xlu1 %v2019_v13, %s3492_s15  ;;  %v2078_v13 = vstv %s3378_s1  ;;  %s3393_s1 = sld [smem:[#allocation3 + $0x85]] }
 0x973   :  { %2068 = vrot.lane.b32.xlu1 %v3377_v24, %s3492_s15 }
 0x9c7   :  { %v4611_v16 = vpop.permute.xlu0 %1963 }
 0x9c8   :  { %6237 = vst [vmem:[#allocation187_spill] sm:$0xff] %v4611_v16 }
 0x9cc   :  { %v4613_v53 = vpop.permute.xlu0 %1967 }
 0x9cd   :  { %6238 = vst [vmem:[#allocation188_spill] sm:$0xff] %v4613_v53  ;;  %v4615_v59 = vpop.permute.xlu1 %1965 }
 0x9ce   :  { %6239 = vst [vmem:[#allocation189_spill] sm:$0xff] %v4615_v59  ;;  %v2118_v59 = vstv %s3380_s25  ;;  %s3415_s25 = sld [smem:[#allocation3 + $0x89]] }
 0x9d0   :  { %v4617_v50 = vpop.permute.xlu0 %1985 }
 0x9d1   :  { %6240 = vst [vmem:[#allocation190_spill] sm:$0xff] %v4617_v50  ;;  %v4619_v63 = vpop.permute.xlu1 %1983 }
 0x9d2   :  { %6241 = vst [vmem:[#allocation191_spill] sm:$0xff] %v4619_v63 }
 0x9d4   :  { %v4621_v62 = vpop.permute.xlu0 %2003 }
 0x9d5   :  { %6242 = vst [vmem:[#allocation192_spill] sm:$0xff] %v4621_v62  ;;  %v4623_v55 = vpop.permute.xlu1 %1987 }
 0x9d6   :  { %6243 = vst [vmem:[#allocation193_spill] sm:$0xff] %v4623_v55 }
 0x9d8   :  { %v4625_v54 = vpop.permute.xlu0 %2007 }
 0x9d9   :  { %6244 = vst [vmem:[#allocation194_spill] sm:$0xff] %v4625_v54  ;;  %v4627_v22 = vpop.permute.xlu1 %2005 }
 0x9da   :  { %6245 = vst [vmem:[#allocation195_spill] sm:$0xff] %v4627_v22 }
 0x9dc   :  { %v4629_v58 = vpop.permute.xlu0 %2025 }
 0x9dd   :  { %6246 = vst [vmem:[#allocation196_spill] sm:$0xff] %v4629_v58  ;;  %v4631_v8 = vpop.permute.xlu1 %2023 }
 0x9de   :  { %6247 = vst [vmem:[#allocation197_spill] sm:$0xff] %v4631_v8  ;;  %v2098_v8 = vstv %s3379_s23  ;;  %s3403_s23 = sld [smem:[#allocation3 + $0x87]] }
 0x9e0   :  { %v2067_v57 = vpop.permute.xlu0 %2066 }
 0x9e1   :  { %v2074_v24 = vmul.f32 %v2067_v57, %v4445_v51  ;;  %v4634_v50 = vpop.permute.xlu1 %2027 }
 0x9e2   :  { %6248 = vst [vmem:[#allocation198_spill] sm:$0xff] %v4634_v50 }
 0x9e3   :  { %v2079_v63 = vmul.f32 %v2078_v13, %v2074_v24  ;;  %v2099_v50 = vmul.f32 %v2098_v8, %v2074_v24 }
 0x9e5   :  { %v2069_v62 = vpop.permute.xlu1 %2068  ;;  %2085 = vrot.lane.b32.xlu0 %v2079_v63, %s3491_s10  ;;  %v2119_v63 = vmul.f32 %v2118_v59, %v2074_v24 }
 0x9e6   :  { %v2070_v54 = vsel %vm376_vm4, %v2067_v57, %v2069_v62  ;;  %v2076_v55 = vmul.f32 0.0, %v2069_v62 }
 0x9e7   :  { %v2075_v22 = vmul.f32 %v2070_v54, %v4440_v52 }
 0x9e8   :  { %v2081_v58 = vmul.f32 %v2078_v13, %v2076_v55  ;;  %v2101_v57 = vmul.f32 %v2098_v8, %v2076_v55  ;;  %v2121_v62 = vmul.f32 %v2118_v59, %v2076_v55 }
 0x9e9   :  { %v2080_v53 = vmul.f32 %v2078_v13, %v2075_v22  ;;  %v2100_v16 = vmul.f32 %v2098_v8, %v2075_v22  ;;  %v2120_v54 = vmul.f32 %v2118_v59, %v2075_v22  ;;  %v2138_v13 = vstv %s3381_s27  ;;  %v3383_v59 = vld [vmem:[%s5966_s3 + $0x68] sm:$0xff] }
 0x9ea   :  { %2089 = vrot.lane.b32.xlu0 %v2081_v58, %s3491_s10  ;;  %v2139_v58 = vmul.f32 %v2138_v13, %v2074_v24 }
 0x9eb   :  { %2087 = vrot.lane.b32.xlu1 %v2080_v53, %s3491_s10  ;;  %v2140_v53 = vmul.f32 %v2138_v13, %v2075_v22 }
 0x9ee   :  { %2107 = vrot.lane.b32.xlu0 %v2100_v16, %s3491_s10  ;;  %v3382_v16 = vld [vmem:[%s5966_s3 + $0x60] sm:$0xff] }
 0x9ef   :  { %2105 = vrot.lane.b32.xlu1 %v2099_v50, %s3491_s10  ;;  %v2141_v50 = vmul.f32 %v2138_v13, %v2076_v55 }
 0x9f2   :  { %2125 = vrot.lane.b32.xlu0 %v2119_v63, %s3491_s10 }
 0x9f3   :  { %2109 = vrot.lane.b32.xlu1 %v2101_v57, %s3491_s10 }
 0x9f6   :  { %2129 = vrot.lane.b32.xlu0 %v2121_v62, %s3491_s10 }
 0x9f7   :  { %2127 = vrot.lane.b32.xlu1 %v2120_v54, %s3491_s10 }
 0x9fa   :  { %2147 = vrot.lane.b32.xlu0 %v2140_v53, %s3491_s10 }
 0x9fb   :  { %2145 = vrot.lane.b32.xlu1 %v2139_v58, %s3491_s10 }
 0x9fe   :  { %2161 = vrot.lane.b32.xlu0 %v3382_v16, %s3495_s11 }
 0x9ff   :  { %2149 = vrot.lane.b32.xlu1 %v2141_v50, %s3491_s10  ;;  %v2173_v50 = vstv %s3384_s8  ;;  %s3399_s8 = sld [smem:[#allocation3 + $0x86]] }
 0xa03   :  { %2163 = vrot.lane.b32.xlu1 %v3383_v59, %s3495_s11 }
 0xa57   :  { %v4658_v22 = vpop.permute.xlu0 %2085 }
 0xa58   :  { %6249 = vst [vmem:[#allocation199_spill] sm:$0xff] %v4658_v22 }
 0xa5c   :  { %v4660_v8 = vpop.permute.xlu0 %2089 }
 0xa5d   :  { %6250 = vst [vmem:[#allocation200_spill] sm:$0xff] %v4660_v8  ;;  %v4662_v24 = vpop.permute.xlu1 %2087 }
 0xa5e   :  { %6251 = vst [vmem:[#allocation201_spill] sm:$0xff] %v4662_v24  ;;  %v2213_v24 = vstv %s3386_s12  ;;  %s5273_s12 = sld [smem:[#allocation3 + $0x79]] }
 0xa60   :  { %v4664_v63 = vpop.permute.xlu0 %2107 }
 0xa61   :  { %6252 = vst [vmem:[#allocation202_spill] sm:$0xff] %v4664_v63  ;;  %v4666_v57 = vpop.permute.xlu1 %2105 }
 0xa62   :  { %6253 = vst [vmem:[#allocation203_spill] sm:$0xff] %v4666_v57 }
 0xa64   :  { %v4668_v55 = vpop.permute.xlu0 %2125 }
 0xa65   :  { %6254 = vst [vmem:[#allocation204_spill] sm:$0xff] %v4668_v55  ;;  %v4670_v62 = vpop.permute.xlu1 %2109 }
 0xa66   :  { %6255 = vst [vmem:[#allocation205_spill] sm:$0xff] %v4670_v62 }
 0xa68   :  { %v4672_v54 = vpop.permute.xlu0 %2129 }
 0xa69   :  { %6256 = vst [vmem:[#allocation206_spill] sm:$0xff] %v4672_v54  ;;  %v4674_v13 = vpop.permute.xlu1 %2127 }
 0xa6a   :  { %6257 = vst [vmem:[#allocation207_spill] sm:$0xff] %v4674_v13 }
 0xa6c   :  { %v4676_v53 = vpop.permute.xlu0 %2147 }
 0xa6d   :  { %6258 = vst [vmem:[#allocation208_spill] sm:$0xff] %v4676_v53  ;;  %v4678_v58 = vpop.permute.xlu1 %2145 }
 0xa6e   :  { %6259 = vst [vmem:[#allocation209_spill] sm:$0xff] %v4678_v58  ;;  %v2193_v58 = vstv %s3385_s9  ;;  %s3409_s9 = sld [smem:[#allocation3 + $0x88]] }
 0xa70   :  { %v2162_v16 = vpop.permute.xlu0 %2161 }
 0xa71   :  { %v2169_v59 = vmul.f32 %v2162_v16, %v4445_v51  ;;  %v4681_v63 = vpop.permute.xlu1 %2149 }
 0xa72   :  { %6260 = vst [vmem:[#allocation210_spill] sm:$0xff] %v4681_v63 }
 0xa73   :  { %v2174_v57 = vmul.f32 %v2173_v50, %v2169_v59  ;;  %v2194_v63 = vmul.f32 %v2193_v58, %v2169_v59 }
 0xa75   :  { %v2164_v55 = vpop.permute.xlu1 %2163  ;;  %2180 = vrot.lane.b32.xlu0 %v2174_v57, %s3490_s5  ;;  %v2214_v57 = vmul.f32 %v2213_v24, %v2169_v59 }
 0xa76   :  { %v2165_v54 = vsel %vm278_vm5, %v2162_v16, %v2164_v55  ;;  %v2171_v62 = vmul.f32 0.0, %v2164_v55 }
 0xa77   :  { %v2170_v13 = vmul.f32 %v2165_v54, %v4440_v52 }
 0xa78   :  { %v2176_v53 = vmul.f32 %v2173_v50, %v2171_v62  ;;  %v2196_v16 = vmul.f32 %v2193_v58, %v2171_v62  ;;  %v2216_v55 = vmul.f32 %v2213_v24, %v2171_v62 }
 0xa79   :  { %v2175_v8 = vmul.f32 %v2173_v50, %v2170_v13  ;;  %v2195_v22 = vmul.f32 %v2193_v58, %v2170_v13  ;;  %v2215_v54 = vmul.f32 %v2213_v24, %v2170_v13  ;;  %v2233_v50 = vstv %s3387_s13  ;;  %v3389_v24 = vld [vmem:[%s5966_s3 + $0x78] sm:$0xff]  ;;  %s3443_s13 = sld [smem:[#allocation3 + $0x8e]] }
 0xa7a   :  { %2184 = vrot.lane.b32.xlu0 %v2176_v53, %s3490_s5  ;;  %v2234_v53 = vmul.f32 %v2233_v50, %v2169_v59 }
 0xa7b   :  { %2182 = vrot.lane.b32.xlu1 %v2175_v8, %s3490_s5  ;;  %v2235_v8 = vmul.f32 %v2233_v50, %v2170_v13 }
 0xa7e   :  { %2202 = vrot.lane.b32.xlu0 %v2195_v22, %s3490_s5  ;;  %v3388_v22 = vld [vmem:[%s5966_s3 + $0x70] sm:$0xff] }
 0xa7f   :  { %2200 = vrot.lane.b32.xlu1 %v2194_v63, %s3490_s5  ;;  %v2236_v63 = vmul.f32 %v2233_v50, %v2171_v62 }
 0xa82   :  { %2220 = vrot.lane.b32.xlu0 %v2214_v57, %s3490_s5 }
 0xa83   :  { %2204 = vrot.lane.b32.xlu1 %v2196_v16, %s3490_s5 }
 0xa86   :  { %2224 = vrot.lane.b32.xlu0 %v2216_v55, %s3490_s5 }
 0xa87   :  { %2222 = vrot.lane.b32.xlu1 %v2215_v54, %s3490_s5 }
 0xa8a   :  { %2242 = vrot.lane.b32.xlu0 %v2235_v8, %s3490_s5 }
 0xa8b   :  { %2240 = vrot.lane.b32.xlu1 %v2234_v53, %s3490_s5 }
 0xa8e   :  { %2256 = vrot.lane.b32.xlu0 %v3388_v22, %s3494_s30 }
 0xa8f   :  { %2244 = vrot.lane.b32.xlu1 %v2236_v63, %s3490_s5  ;;  %v2268_v63 = vstv %s3390_s19  ;;  %s3414_s19 = sld [smem:[#allocation3 + $0x65]] }
 0xa93   :  { %2258 = vrot.lane.b32.xlu1 %v3389_v24, %s3494_s30 }
 0xae7   :  { %v4705_v13 = vpop.permute.xlu0 %2180 }
 0xae8   :  { %6261 = vst [vmem:[#allocation211_spill] sm:$0xff] %v4705_v13 }
 0xaec   :  { %v4707_v58 = vpop.permute.xlu0 %2184 }
 0xaed   :  { %6262 = vst [vmem:[#allocation212_spill] sm:$0xff] %v4707_v58  ;;  %v4709_v59 = vpop.permute.xlu1 %2182 }
 0xaee   :  { %6263 = vst [vmem:[#allocation213_spill] sm:$0xff] %v4709_v59  ;;  %v2308_v59 = vstv %s3392_s21  ;;  %s3272_s21 = sld [smem:[#allocation3 + $0x4]] }
 0xaf0   :  { %v4711_v57 = vpop.permute.xlu0 %2202 }
 0xaf1   :  { %6264 = vst [vmem:[#allocation214_spill] sm:$0xff] %v4711_v57  ;;  %v4713_v16 = vpop.permute.xlu1 %2200 }
 0xaf2   :  { %6265 = vst [vmem:[#allocation215_spill] sm:$0xff] %v4713_v16 }
 0xaf4   :  { %v4715_v62 = vpop.permute.xlu0 %2220 }
 0xaf5   :  { %6266 = vst [vmem:[#allocation216_spill] sm:$0xff] %v4715_v62  ;;  %v4717_v55 = vpop.permute.xlu1 %2204 }
 0xaf6   :  { %6267 = vst [vmem:[#allocation217_spill] sm:$0xff] %v4717_v55 }
 0xaf8   :  { %v4719_v54 = vpop.permute.xlu0 %2224 }
 0xaf9   :  { %6268 = vst [vmem:[#allocation218_spill] sm:$0xff] %v4719_v54  ;;  %v4721_v50 = vpop.permute.xlu1 %2222 }
 0xafa   :  { %6269 = vst [vmem:[#allocation219_spill] sm:$0xff] %v4721_v50 }
 0xafc   :  { %v4723_v8 = vpop.permute.xlu0 %2242 }
 0xafd   :  { %6270 = vst [vmem:[#allocation220_spill] sm:$0xff] %v4723_v8  ;;  %v4725_v53 = vpop.permute.xlu1 %2240 }
 0xafe   :  { %6271 = vst [vmem:[#allocation221_spill] sm:$0xff] %v4725_v53  ;;  %v2288_v53 = vstv %s3391_s20  ;;  %s3273_s20 = sld [smem:[#allocation3 + $0x28]] }
 0xb00   :  { %v2257_v22 = vpop.permute.xlu0 %2256 }
 0xb01   :  { %v2264_v24 = vmul.f32 %v2257_v22, %v4445_v51  ;;  %v4728_v57 = vpop.permute.xlu1 %2244 }
 0xb02   :  { %6272 = vst [vmem:[#allocation222_spill] sm:$0xff] %v4728_v57 }
 0xb03   :  { %v2269_v16 = vmul.f32 %v2268_v63, %v2264_v24  ;;  %v2289_v57 = vmul.f32 %v2288_v53, %v2264_v24 }
 0xb05   :  { %v2259_v62 = vpop.permute.xlu1 %2258  ;;  %2275 = vrot.lane.b32.xlu0 %v2269_v16, %s3489_s26  ;;  %v2309_v16 = vmul.f32 %v2308_v59, %v2264_v24 }
 0xb06   :  { %v2260_v54 = vsel %vm180_vm6, %v2257_v22, %v2259_v62  ;;  %v2266_v55 = vmul.f32 0.0, %v2259_v62 }
 0xb07   :  { %v2265_v50 = vmul.f32 %v2260_v54, %v4440_v52 }
 0xb08   :  { %v2271_v8 = vmul.f32 %v2268_v63, %v2266_v55  ;;  %v2291_v22 = vmul.f32 %v2288_v53, %v2266_v55  ;;  %v2311_v62 = vmul.f32 %v2308_v59, %v2266_v55 }
 0xb09   :  { %v2270_v58 = vmul.f32 %v2268_v63, %v2265_v50  ;;  %v2290_v13 = vmul.f32 %v2288_v53, %v2265_v50  ;;  %v2310_v54 = vmul.f32 %v2308_v59, %v2265_v50  ;;  %v2328_v63 = vstv %s3393_s1  ;;  %v3395_v59 = vld [vmem:[%s5966_s3 + $0x88] sm:$0xff]  ;;  %s3402_s1 = sld [smem:[#allocation3 + $0x63]] }
 0xb0a   :  { %2279 = vrot.lane.b32.xlu0 %v2271_v8, %s3489_s26  ;;  %v2329_v8 = vmul.f32 %v2328_v63, %v2264_v24 }
 0xb0b   :  { %2277 = vrot.lane.b32.xlu1 %v2270_v58, %s3489_s26  ;;  %v2330_v58 = vmul.f32 %v2328_v63, %v2265_v50 }
 0xb0e   :  { %2297 = vrot.lane.b32.xlu0 %v2290_v13, %s3489_s26  ;;  %v3394_v13 = vld [vmem:[%s5966_s3 + $0x80] sm:$0xff] }
 0xb0f   :  { %2295 = vrot.lane.b32.xlu1 %v2289_v57, %s3489_s26  ;;  %v2331_v57 = vmul.f32 %v2328_v63, %v2266_v55 }
 0xb12   :  { %2315 = vrot.lane.b32.xlu0 %v2309_v16, %s3489_s26 }
 0xb13   :  { %2299 = vrot.lane.b32.xlu1 %v2291_v22, %s3489_s26 }
 0xb16   :  { %2319 = vrot.lane.b32.xlu0 %v2311_v62, %s3489_s26 }
 0xb17   :  { %2317 = vrot.lane.b32.xlu1 %v2310_v54, %s3489_s26 }
 0xb1a   :  { %2337 = vrot.lane.b32.xlu0 %v2330_v58, %s3489_s26 }
 0xb1b   :  { %2335 = vrot.lane.b32.xlu1 %v2329_v8, %s3489_s26 }
 0xb1e   :  { %2351 = vrot.lane.b32.xlu0 %v3394_v13, %s3493_s24 }
 0xb1f   :  { %2339 = vrot.lane.b32.xlu1 %v2331_v57, %s3489_s26  ;;  %v2363_v57 = vstv %s3396_s29 }
 0xb23   :  { %2353 = vrot.lane.b32.xlu1 %v3395_v59, %s3493_s24 }
 0xb77   :  { %v4752_v50 = vpop.permute.xlu0 %2275 }
 0xb78   :  { %6273 = vst [vmem:[#allocation223_spill] sm:$0xff] %v4752_v50  ;;  %v2403_v50 = vstv %s3398_s7  ;;  %s3407_s7 = sld [smem:[#allocation3 + $0x40]] }
 0xb7c   :  { %v4754_v53 = vpop.permute.xlu0 %2279 }
 0xb7d   :  { %6274 = vst [vmem:[#allocation224_spill] sm:$0xff] %v4754_v53  ;;  %v4756_v24 = vpop.permute.xlu1 %2277 }
 0xb7e   :  { %6275 = vst [vmem:[#allocation225_spill] sm:$0xff] %v4756_v24  ;;  %v2505_v24 = vstv %s3402_s1  ;;  %s4939_s1 = sld [smem:[#allocation3 + $0x4c]] }
 0xb80   :  { %v4758_v16 = vpop.permute.xlu0 %2297 }
 0xb81   :  { %6276 = vst [vmem:[#allocation226_spill] sm:$0xff] %v4758_v16  ;;  %v4760_v22 = vpop.permute.xlu1 %2295 }
 0xb82   :  { %6277 = vst [vmem:[#allocation227_spill] sm:$0xff] %v4760_v22 }
 0xb84   :  { %v4762_v55 = vpop.permute.xlu0 %2315 }
 0xb85   :  { %6278 = vst [vmem:[#allocation228_spill] sm:$0xff] %v4762_v55  ;;  %v4764_v62 = vpop.permute.xlu1 %2299 }
 0xb86   :  { %6279 = vst [vmem:[#allocation229_spill] sm:$0xff] %v4764_v62 }
 0xb88   :  { %v4766_v54 = vpop.permute.xlu0 %2319 }
 0xb89   :  { %6280 = vst [vmem:[#allocation230_spill] sm:$0xff] %v4766_v54  ;;  %v4768_v63 = vpop.permute.xlu1 %2317 }
 0xb8a   :  { %6281 = vst [vmem:[#allocation231_spill] sm:$0xff] %v4768_v63 }
 0xb8c   :  { %v4770_v58 = vpop.permute.xlu0 %2337 }
 0xb8d   :  { %6282 = vst [vmem:[#allocation232_spill] sm:$0xff] %v4770_v58  ;;  %v4772_v8 = vpop.permute.xlu1 %2335 }
 0xb8e   :  { %6283 = vst [vmem:[#allocation233_spill] sm:$0xff] %v4772_v8  ;;  %v2383_v8 = vstv %s3397_s6  ;;  %s3406_s6 = sld [smem:[#allocation3 + $0x1c]] }
 0xb90   :  { %v2352_v13 = vpop.permute.xlu0 %2351 }
 0xb91   :  { %v2359_v59 = vmul.f32 %v2352_v13, %v4445_v51  ;;  %v4775_v16 = vpop.permute.xlu1 %2339 }
 0xb92   :  { %6284 = vst [vmem:[#allocation234_spill] sm:$0xff] %v4775_v16 }
 0xb93   :  { %v2364_v22 = vmul.f32 %v2363_v57, %v2359_v59  ;;  %v2384_v16 = vmul.f32 %v2383_v8, %v2359_v59 }
 0xb95   :  { %v2354_v55 = vpop.permute.xlu1 %2353  ;;  %2370 = vrot.lane.b32.xlu0 %v2364_v22, %s3488_s22  ;;  %v2404_v22 = vmul.f32 %v2403_v50, %v2359_v59 }
 0xb96   :  { %v2355_v54 = vsel %vm82_vm7, %v2352_v13, %v2354_v55  ;;  %v2361_v62 = vmul.f32 0.0, %v2354_v55 }
 0xb97   :  { %v2360_v63 = vmul.f32 %v2355_v54, %v4440_v52  ;;  %v2423_v54 = vstv %s3399_s8  ;;  %s3408_s8 = sld [smem:[#allocation3 + $0x64]] }
 0xb98   :  { %v2366_v58 = vmul.f32 %v2363_v57, %v2361_v62  ;;  %v2386_v13 = vmul.f32 %v2383_v8, %v2361_v62  ;;  %v2406_v52 = vmul.f32 %v2403_v50, %v2361_v62 }
 0xb99   :  { %v2365_v53 = vmul.f32 %v2363_v57, %v2360_v63  ;;  %v2385_v51 = vmul.f32 %v2383_v8, %v2360_v63  ;;  %v2405_v55 = vmul.f32 %v2403_v50, %v2360_v63  ;;  %v2426_v8 = vmul.f32 %v2423_v54, %v2361_v62  ;;  %v2450_v50 = vld [vmem:[%s5966_s3 + $0x8] sm:$0xff] }
 0xb9a   :  { %2374 = vrot.lane.b32.xlu0 %v2366_v58, %s3488_s22  ;;  %v2424_v58 = vmul.f32 %v2423_v54, %v2359_v59 }
 0xb9b   :  { %2372 = vrot.lane.b32.xlu1 %v2365_v53, %s3488_s22  ;;  %v2425_v53 = vmul.f32 %v2423_v54, %v2360_v63 }
 0xb9e   :  { %2392 = vrot.lane.b32.xlu0 %v2385_v51, %s3488_s22 }
 0xb9f   :  { %2390 = vrot.lane.b32.xlu1 %v2384_v16, %s3488_s22  ;;  %v2449_v16 = vld [vmem:[%s5966_s3] sm:$0xff] }
 0xba2   :  { %2410 = vrot.lane.b32.xlu0 %v2404_v22, %s3488_s22 }
 0xba3   :  { %2394 = vrot.lane.b32.xlu1 %v2386_v13, %s3488_s22 }
 0xba6   :  { %2414 = vrot.lane.b32.xlu0 %v2406_v52, %s3488_s22 }
 0xba7   :  { %2412 = vrot.lane.b32.xlu1 %v2405_v55, %s3488_s22 }
 0xbaa   :  { %2432 = vrot.lane.b32.xlu0 %v2425_v53, %s3488_s22 }
 0xbab   :  { %2430 = vrot.lane.b32.xlu1 %v2424_v58, %s3488_s22 }
 0xbae   :  { %2453 = vrot.lane.b32.xlu0 %v2449_v16, %s3488_s22  ;;  %v2465_v16 = vstv %s3400_s16  ;;  %s3419_s16 = sld [smem:[#allocation3 + $0x42]] }
 0xbaf   :  { %2434 = vrot.lane.b32.xlu1 %v2426_v8, %s3488_s22 }
 0xbb3   :  { %2455 = vrot.lane.b32.xlu1 %v2450_v50, %s3488_s22 }
 0xc07   :  { %v4799_v63 = vpop.permute.xlu0 %2370 }
 0xc08   :  { %6285 = vst [vmem:[#allocation235_spill] sm:$0xff] %v4799_v63 }
 0xc0c   :  { %v4801_v57 = vpop.permute.xlu0 %2374 }
 0xc0d   :  { %6286 = vst [vmem:[#allocation236_spill] sm:$0xff] %v4801_v57  ;;  %v4803_v59 = vpop.permute.xlu1 %2372  ;;  %v2485_v57 = vstv %s3401_s17  ;;  %s3412_s17 = sld [smem:[#allocation3 + $0x1d]] }
 0xc0e   :  { %6287 = vst [vmem:[#allocation237_spill] sm:$0xff] %v4803_v59 }
 0xc10   :  { %v4805_v51 = vpop.permute.xlu0 %2392 }
 0xc11   :  { %6288 = vst [vmem:[#allocation238_spill] sm:$0xff] %v4805_v51  ;;  %v4807_v22 = vpop.permute.xlu1 %2390 }
 0xc12   :  { %6289 = vst [vmem:[#allocation239_spill] sm:$0xff] %v4807_v22 }
 0xc14   :  { %v4809_v62 = vpop.permute.xlu0 %2410 }
 0xc15   :  { %6290 = vst [vmem:[#allocation240_spill] sm:$0xff] %v4809_v62  ;;  %v4811_v13 = vpop.permute.xlu1 %2394  ;;  %v4826_v62 = vld [vmem:[%s5963_s0 + $0x38] sm:$0xff] }
 0xc16   :  { %6291 = vst [vmem:[#allocation241_spill] sm:$0xff] %v4811_v13 }
 0xc18   :  { %v4813_v52 = vpop.permute.xlu0 %2414 }
 0xc19   :  { %6292 = vst [vmem:[#allocation242_spill] sm:$0xff] %v4813_v52  ;;  %v4815_v55 = vpop.permute.xlu1 %2412  ;;  %v4831_v52 = vld [vmem:[%s5963_s0 + $0x30] sm:$0xff] }
 0xc1a   :  { %6293 = vst [vmem:[#allocation243_spill] sm:$0xff] %v4815_v55 }
 0xc1c   :  { %v4817_v54 = vpop.permute.xlu0 %2432 }
 0xc1d   :  { %6294 = vst [vmem:[#allocation244_spill] sm:$0xff] %v4817_v54  ;;  %v4819_v53 = vpop.permute.xlu1 %2430 }
 0xc1e   :  { %6295 = vst [vmem:[#allocation245_spill] sm:$0xff] %v4819_v53 }
 0xc20   :  { %v2454_v58 = vpop.permute.xlu0 %2453 }
 0xc21   :  { %v2461_v8 = vmul.f32 0.0, %v2454_v58  ;;  %v4821_v50 = vpop.permute.xlu1 %2434 }
 0xc22   :  { %6296 = vst [vmem:[#allocation246_spill] sm:$0xff] %v4821_v50 }
 0xc23   :  { %v2466_v13 = vmul.f32 %v2465_v16, %v2461_v8  ;;  %v2486_v59 = vmul.f32 %v2485_v57, %v2461_v8 }
 0xc25   :  { %v2456_v54 = vpop.permute.xlu1 %2455  ;;  %2472 = vrot.lane.b32.xlu0 %v2466_v13, %s3493_s24  ;;  %v2506_v13 = vmul.f32 %v2505_v24, %v2461_v8 }
 0xc26   :  { %v2457_v53 = vsel %vm60_vm0, %v2454_v58, %v2456_v54  ;;  %v2463_v50 = vmul.f32 %v2456_v54, %v4826_v62 }
 0xc27   :  { %v2462_v55 = vmul.f32 %v2457_v53, %v4831_v52 }
 0xc28   :  { %v2468_v22 = vmul.f32 %v2465_v16, %v2463_v50  ;;  %v2488_v58 = vmul.f32 %v2485_v57, %v2463_v50  ;;  %v2508_v54 = vmul.f32 %v2505_v24, %v2463_v50 }
 0xc29   :  { %v2467_v51 = vmul.f32 %v2465_v16, %v2462_v55  ;;  %v2487_v63 = vmul.f32 %v2485_v57, %v2462_v55  ;;  %v2507_v53 = vmul.f32 %v2505_v24, %v2462_v55  ;;  %v2525_v16 = vstv %s3403_s23  ;;  %v3405_v24 = vld [vmem:[%s5966_s3 + $0x18] sm:$0xff]  ;;  %s4942_s23 = sld [smem:[#allocation3 + $0x70]] }
 0xc2a   :  { %2476 = vrot.lane.b32.xlu0 %v2468_v22, %s3493_s24  ;;  %v2526_v22 = vmul.f32 %v2525_v16, %v2461_v8  ;;  %v2528_v57 = vmul.f32 %v2525_v16, %v2463_v50 }
 0xc2b   :  { %2474 = vrot.lane.b32.xlu1 %v2467_v51, %s3493_s24  ;;  %v2527_v51 = vmul.f32 %v2525_v16, %v2462_v55 }
 0xc2e   :  { %2494 = vrot.lane.b32.xlu0 %v2487_v63, %s3493_s24  ;;  %v3404_v63 = vld [vmem:[%s5966_s3 + $0x10] sm:$0xff] }
 0xc2f   :  { %2492 = vrot.lane.b32.xlu1 %v2486_v59, %s3493_s24 }
 0xc32   :  { %2512 = vrot.lane.b32.xlu0 %v2506_v13, %s3493_s24 }
 0xc33   :  { %2496 = vrot.lane.b32.xlu1 %v2488_v58, %s3493_s24 }
 0xc36   :  { %2516 = vrot.lane.b32.xlu0 %v2508_v54, %s3493_s24 }
 0xc37   :  { %2514 = vrot.lane.b32.xlu1 %v2507_v53, %s3493_s24 }
 0xc3a   :  { %2534 = vrot.lane.b32.xlu0 %v2527_v51, %s3493_s24 }
 0xc3b   :  { %2532 = vrot.lane.b32.xlu1 %v2526_v22, %s3493_s24 }
 0xc3e   :  { %2548 = vrot.lane.b32.xlu0 %v3404_v63, %s3489_s26 }
 0xc3f   :  { %2536 = vrot.lane.b32.xlu1 %v2528_v57, %s3493_s24  ;;  %v2560_v57 = vstv %s3406_s6 }
 0xc43   :  { %2550 = vrot.lane.b32.xlu1 %v3405_v24, %s3489_s26 }
 0xc97   :  { %v4856_v59 = vpop.permute.xlu0 %2472 }
 0xc98   :  { %6297 = vst [vmem:[#allocation247_spill] sm:$0xff] %v4856_v59 }
 0xc9c   :  { %v4858_v55 = vpop.permute.xlu0 %2476 }
 0xc9d   :  { %6298 = vst [vmem:[#allocation248_spill] sm:$0xff] %v4858_v55  ;;  %v4860_v8 = vpop.permute.xlu1 %2474 }
 0xc9e   :  { %6299 = vst [vmem:[#allocation249_spill] sm:$0xff] %v4860_v8  ;;  %v2600_v8 = vstv %s3408_s8  ;;  %s3435_s8 = sld [smem:[#allocation3 + $0x45]] }
 0xca0   :  { %v4862_v13 = vpop.permute.xlu0 %2494 }
 0xca1   :  { %6300 = vst [vmem:[#allocation250_spill] sm:$0xff] %v4862_v13  ;;  %v4864_v58 = vpop.permute.xlu1 %2492 }
 0xca2   :  { %6301 = vst [vmem:[#allocation251_spill] sm:$0xff] %v4864_v58 }
 0xca4   :  { %v4866_v50 = vpop.permute.xlu0 %2512 }
 0xca5   :  { %6302 = vst [vmem:[#allocation252_spill] sm:$0xff] %v4866_v50  ;;  %v4868_v54 = vpop.permute.xlu1 %2496 }
 0xca6   :  { %6303 = vst [vmem:[#allocation253_spill] sm:$0xff] %v4868_v54 }
 0xca8   :  { %v4870_v53 = vpop.permute.xlu0 %2516 }
 0xca9   :  { %6304 = vst [vmem:[#allocation254_spill] sm:$0xff] %v4870_v53  ;;  %v4872_v16 = vpop.permute.xlu1 %2514 }
 0xcaa   :  { %6305 = vst [vmem:[#allocation255_spill] sm:$0xff] %v4872_v16 }
 0xcac   :  { %v4874_v51 = vpop.permute.xlu0 %2534 }
 0xcad   :  { %6306 = vst [vmem:[#allocation256_spill] sm:$0xff] %v4874_v51  ;;  %v4876_v22 = vpop.permute.xlu1 %2532 }
 0xcae   :  { %6307 = vst [vmem:[#allocation257_spill] sm:$0xff] %v4876_v22  ;;  %v2580_v22 = vstv %s3407_s7  ;;  %s3434_s7 = sld [smem:[#allocation3 + $0x21]] }
 0xcb0   :  { %v2549_v63 = vpop.permute.xlu0 %2548 }
 0xcb1   :  { %v2556_v24 = vmul.f32 0.0, %v2549_v63  ;;  %v4878_v55 = vpop.permute.xlu1 %2536 }
 0xcb2   :  { %6308 = vst [vmem:[#allocation258_spill] sm:$0xff] %v4878_v55 }
 0xcb3   :  { %v2561_v58 = vmul.f32 %v2560_v57, %v2556_v24  ;;  %v2581_v59 = vmul.f32 %v2580_v22, %v2556_v24 }
 0xcb5   :  { %v2551_v13 = vpop.permute.xlu1 %2550  ;;  %2567 = vrot.lane.b32.xlu0 %v2561_v58, %s3494_s30  ;;  %v2601_v58 = vmul.f32 %v2600_v8, %v2556_v24 }
 0xcb6   :  { %v2552_v53 = vsel %vm158_vm1, %v2549_v63, %v2551_v13  ;;  %v2558_v50 = vmul.f32 %v2551_v13, %v4826_v62 }
 0xcb7   :  { %v2557_v16 = vmul.f32 %v2552_v53, %v4831_v52 }
 0xcb8   :  { %v2563_v51 = vmul.f32 %v2560_v57, %v2558_v50  ;;  %v2583_v63 = vmul.f32 %v2580_v22, %v2558_v50  ;;  %v2603_v13 = vmul.f32 %v2600_v8, %v2558_v50 }
 0xcb9   :  { %v2562_v54 = vmul.f32 %v2560_v57, %v2557_v16  ;;  %v2582_v55 = vmul.f32 %v2580_v22, %v2557_v16  ;;  %v2602_v53 = vmul.f32 %v2600_v8, %v2557_v16  ;;  %v3411_v8 = vld [vmem:[%s5966_s3 + $0x28] sm:$0xff] }
 0xcba   :  { %2571 = vrot.lane.b32.xlu0 %v2563_v51, %s3494_s30  ;;  %v2620_v51 = vstv %s3409_s9  ;;  %s5271_s9 = sld [smem:[#allocation3 + $0x55]] }
 0xcbb   :  { %2569 = vrot.lane.b32.xlu1 %v2562_v54, %s3494_s30  ;;  %v2622_v54 = vmul.f32 %v2620_v51, %v2557_v16  ;;  %v2621_v57 = vmul.f32 %v2620_v51, %v2556_v24 }
 0xcbe   :  { %2589 = vrot.lane.b32.xlu0 %v2582_v55, %s3494_s30  ;;  %v2623_v55 = vmul.f32 %v2620_v51, %v2558_v50 }
 0xcbf   :  { %2587 = vrot.lane.b32.xlu1 %v2581_v59, %s3494_s30  ;;  %v3410_v59 = vld [vmem:[%s5966_s3 + $0x20] sm:$0xff] }
 0xcc2   :  { %2607 = vrot.lane.b32.xlu0 %v2601_v58, %s3494_s30 }
 0xcc3   :  { %2591 = vrot.lane.b32.xlu1 %v2583_v63, %s3494_s30 }
 0xcc6   :  { %2611 = vrot.lane.b32.xlu0 %v2603_v13, %s3494_s30 }
 0xcc7   :  { %2609 = vrot.lane.b32.xlu1 %v2602_v53, %s3494_s30 }
 0xcca   :  { %2629 = vrot.lane.b32.xlu0 %v2622_v54, %s3494_s30 }
 0xccb   :  { %2627 = vrot.lane.b32.xlu1 %v2621_v57, %s3494_s30 }
 0xcce   :  { %2643 = vrot.lane.b32.xlu0 %v3410_v59, %s3490_s5 }
 0xccf   :  { %2631 = vrot.lane.b32.xlu1 %v2623_v55, %s3494_s30 }
 0xcd3   :  { %2645 = vrot.lane.b32.xlu1 %v3411_v8, %s3490_s5 }
 0xd27   :  { %v2568_v16 = vpop.permute.xlu0 %2567 }
 0xd2c   :  { %v2572_v22 = vpop.permute.xlu0 %2571 }
 0xd2d   :  { %v2570_v24 = vpop.permute.xlu1 %2569 }
 0xd2e   :  { %v4904_v58 = vsel %vm180_vm6, %v2568_v16, %v2570_v24  ;;  %v4907_v63 = vsel %vm180_vm6, %v2570_v24, %v2572_v22 }
 0xd2f   :  { %6309 = vst [vmem:[#allocation259_spill] sm:$0xff] %v4904_v58  ;;  %6310 = vst [vmem:[#allocation260_spill] sm:$0xff] %v4907_v63 }
 0xd30   :  { %v2590_v50 = vpop.permute.xlu0 %2589 }
 0xd31   :  { %v2588_v13 = vpop.permute.xlu1 %2587 }
 0xd32   :  { %v4910_v53 = vsel %vm180_vm6, %v2588_v13, %v2590_v50 }
 0xd33   :  { %6311 = vst [vmem:[#allocation261_spill] sm:$0xff] %v4910_v53  ;;  %v2655_v53 = vstv %s3412_s17  ;;  %s3423_s17 = sld [smem:[#allocation3 + $0x43]] }
 0xd34   :  { %v2608_v51 = vpop.permute.xlu0 %2607 }
 0xd35   :  { %v2592_v54 = vpop.permute.xlu1 %2591 }
 0xd36   :  { %v4913_v57 = vsel %vm180_vm6, %v2590_v50, %v2592_v54 }
 0xd37   :  { %6312 = vst [vmem:[#allocation262_spill] sm:$0xff] %v4913_v57  ;;  %v104_v57 = vsel %vm82_vm7, %v3860_v20, %v3795_v0  ;;  %v40_v0 = vld [vmem:[%s5965_s2 + $0x30] sm:$0xff] }
 0xd38   :  { %v2612_v59 = vpop.permute.xlu0 %2611 }
 0xd39   :  { %v2610_v55 = vpop.permute.xlu1 %2609 }
 0xd3a   :  { %v4916_v8 = vsel %vm180_vm6, %v2608_v51, %v2610_v55  ;;  %v4919_v16 = vsel %vm180_vm6, %v2610_v55, %v2612_v59 }
 0xd3b   :  { %6313 = vst [vmem:[#allocation263_spill] sm:$0xff] %v4916_v8  ;;  %6314 = vst [vmem:[#allocation264_spill] sm:$0xff] %v4919_v16 }
 0xd3c   :  { %v2630_v22 = vpop.permute.xlu0 %2629 }
 0xd3d   :  { %v2628_v24 = vpop.permute.xlu1 %2627 }
 0xd3e   :  { %v4922_v63 = vsel %vm180_vm6, %v2628_v24, %v2630_v22 }
 0xd3f   :  { %6315 = vst [vmem:[#allocation265_spill] sm:$0xff] %v4922_v63 }
 0xd40   :  { %v2644_v13 = vpop.permute.xlu0 %2643 }
 0xd41   :  { %v4924_v58 = vmul.f32 0.0, %v2644_v13  ;;  %v2632_v50 = vpop.permute.xlu1 %2631 }
 0xd42   :  { %v4927_v54 = vsel %vm180_vm6, %v2630_v22, %v2632_v50  ;;  %v2675_v50 = vstv %s3413_s18  ;;  %s5450_s18 = sld [smem:[#allocation3 + $0x16]] }
 0xd43   :  { %6316 = vst [vmem:[#allocation266_spill] sm:$0xff] %v4927_v54  ;;  %v2656_v51 = vmul.f32 %v2655_v53, %v4924_v58 }
 0xd45   :  { %v2646_v8 = vpop.permute.xlu1 %2645  ;;  %2662 = vrot.lane.b32.xlu0 %v2656_v51, %s3495_s11  ;;  %v2695_v51 = vstv %s3414_s19  ;;  %s5470_s19 = sld [smem:[#allocation3 + $0x3a]] }
 0xd46   :  { %v2647_v59 = vsel %vm256_vm2, %v2644_v13, %v2646_v8  ;;  %v4933_v55 = vmul.f32 %v2646_v8, %v4826_v62  ;;  %v2676_v13 = vmul.f32 %v2675_v50, %v4924_v58  ;;  %v450_v62 = vstv %s3273_s20  ;;  %v36_v8 = vld [vmem:[%s5965_s2 + $0x10] sm:$0xff]  ;;  %s5472_s20 = sld [smem:[#allocation3 + $0x5e]] }
 0xd47   :  { %v2652_v24 = vmul.f32 %v2647_v59, %v4831_v52  ;;  %v2696_v52 = vmul.f32 %v2695_v51, %v4924_v58  ;;  %v4958_v59 = vld [vmem:[%s5963_s0] sm:$0xff] }
 0xd48   :  { %v2658_v63 = vmul.f32 %v2655_v53, %v4933_v55  ;;  %6317 = vst [vmem:[#allocation267_spill] sm:$0xff] %v4958_v59  ;;  %v2698_v16 = vmul.f32 %v2695_v51, %v4933_v55 }
 0xd49   :  { %v2657_v22 = vmul.f32 %v2655_v53, %v2652_v24  ;;  %v2677_v54 = vmul.f32 %v2675_v50, %v2652_v24  ;;  %v2678_v53 = vmul.f32 %v2675_v50, %v4933_v55 }
 0xd4a   :  { %2666 = vrot.lane.b32.xlu0 %v2658_v63, %s3495_s11  ;;  %v444_v63 = vstv %s3272_s21  ;;  %s5480_s21 = sld [smem:[#allocation3 + $0x82]] }
 0xd4b   :  { %2664 = vrot.lane.b32.xlu1 %v2657_v22, %s3495_s11  ;;  %v4961_v22 = vmul.f32 %v4958_v59, %v450_v62  ;;  %v4965_v50 = vmul.f32 %v4958_v59, %v444_v63  ;;  %v2715_v59 = vstv %s3415_s25  ;;  %s3421_s25 = sld [smem:[#allocation3 + $0x8a]] }
 0xd4d   :  { %6318 = vst [vmem:[#allocation268_spill] sm:$0xff] %v4961_v22  ;;  %6319 = vst [vmem:[#allocation269_spill] sm:$0xff] %v4965_v50  ;;  %v34_v50 = vld [vmem:[%s5965_s2] sm:$0xff] }
 0xd4e   :  { %2684 = vrot.lane.b32.xlu0 %v2677_v54, %s3495_s11  ;;  %v103_v54 = vsel %vm82_vm7, %v3785_v60, %v3860_v20 }
 0xd4f   :  { %2682 = vrot.lane.b32.xlu1 %v2676_v13, %s3495_s11  ;;  %v4970_v13 = vld [vmem:[%s5963_s0 + $0x8] sm:$0xff]  ;;  %v107_v22 = vadd.f32 %v103_v54, %v36_v8  ;;  %v2717_v54 = vmul.f32 %v2715_v59, %v2652_v24 }
 0xd50   :  { %6320 = vst [vmem:[#allocation270_spill] sm:$0xff] %v4970_v13  ;;  %v4973_v60 = vmul.f32 %v4970_v13, %v444_v63  ;;  %v35_v63 = vld [vmem:[%s5965_s2 + $0x8] sm:$0xff] }
 0xd52   :  { %2702 = vrot.lane.b32.xlu0 %v2696_v52, %s3495_s11  ;;  %6321 = vst [vmem:[#allocation271_spill] sm:$0xff] %v4973_v60  ;;  %v4976_v52 = vmul.f32 %v4970_v13, %v450_v62  ;;  %v83_v62 = vsel %vm82_vm7, %v3777_v56, %v3862_v26  ;;  %v2697_v60 = vmul.f32 %v2695_v51, %v2652_v24 }
 0xd53   :  { %2686 = vrot.lane.b32.xlu1 %v2678_v53, %s3495_s11  ;;  %v37_v53 = vld [vmem:[%s5965_s2 + $0x18] sm:$0xff]  ;;  %v84_v13 = vsel %vm82_vm7, %v3862_v26, %v3787_v61  ;;  %v143_v56 = vsel %vm82_vm7, %v3800_v2, %v3864_v27  ;;  %v144_v61 = vsel %vm82_vm7, %v3864_v27, %v3804_v4  ;;  %v38_v26 = vld [vmem:[%s5965_s2 + $0x20] sm:$0xff]  ;;  %v123_v51 = vsel %vm82_vm7, %v3797_v1, %v3866_v32 }
 0xd54   :  { %6322 = vst [vmem:[#allocation272_spill] sm:$0xff] %v4976_v52  ;;  %v124_v2 = vsel %vm82_vm7, %v3866_v32, %v3802_v3  ;;  %v108_v8 = vadd.f32 %v104_v57, %v37_v53  ;;  %v87_v4 = vadd.f32 %v83_v62, %v34_v50  ;;  %v201_v27 = vsel %vm180_vm6, %v3808_v6, %v3868_v38 }
 0xd55   :  { %v88_v20 = vadd.f32 %v84_v13, %v35_v63  ;;  %v202_v52 = vsel %vm180_vm6, %v3868_v38, %v3812_v9  ;;  %v181_v1 = vsel %vm180_vm6, %v3806_v5, %v3870_v40  ;;  %v2716_v3 = vmul.f32 %v2715_v59, %v4924_v58 }
 0xd56   :  { %2706 = vrot.lane.b32.xlu0 %v2698_v16, %s3495_s11  ;;  %v39_v16 = vld [vmem:[%s5965_s2 + $0x28] sm:$0xff]  ;;  %v147_v32 = vadd.f32 %v143_v56, %v40_v0  ;;  %v127_v57 = vadd.f32 %v123_v51, %v38_v26  ;;  %v205_v53 = vadd.f32 %v201_v27, %v107_v22  ;;  %v182_v6 = vsel %vm180_vm6, %v3870_v40, %v3810_v7  ;;  %s3418_s2 = sld [smem:[#allocation3 + $0x1e]] }
 0xd57   :  { %2704 = vrot.lane.b32.xlu1 %v2697_v60, %s3495_s11  ;;  %v148_v60 = vadd.f32 %v144_v61, %v41_v11  ;;  %v128_v50 = vadd.f32 %v124_v2, %v39_v16  ;;  %v241_v9 = vsel %vm180_vm6, %v3816_v14, %v3872_v36  ;;  %v242_v5 = vsel %vm180_vm6, %v3872_v36, %v3820_v18  ;;  %v3416_v11 = vld [vmem:[%s5966_s3 + $0x30] sm:$0xff]  ;;  %v6325_v26 = vld [vmem:[#allocation267_spill] sm:$0xff]  ;;  %v6327_v51 = vld [vmem:[#allocation270_spill] sm:$0xff] }
 0xd58   :  { %v206_v38 = vadd.f32 %v202_v52, %v108_v8  ;;  %v185_v58 = vadd.f32 %v181_v1, %v87_v4  ;;  %v221_v7 = vsel %vm180_vm6, %v3814_v12, %v3874_v41  ;;  %v222_v14 = vsel %vm180_vm6, %v3874_v41, %v3818_v17  ;;  %v6329_v1 = vld [vmem:[#allocation268_spill] sm:$0xff] }
 0xd59   :  { %v299_v18 = vsel %vm278_vm5, %v3824_v21, %v3876_v42  ;;  %v300_v40 = vsel %vm278_vm5, %v3876_v42, %v3828_v25  ;;  %v279_v36 = vsel %vm278_vm5, %v3822_v19, %v3878_v43  ;;  %v2718_v24 = vmul.f32 %v2715_v59, %v4933_v55 }
 0xd5a   :  { %2724 = vrot.lane.b32.xlu0 %v2717_v54, %s3495_s11  ;;  %v186_v22 = vadd.f32 %v182_v6, %v88_v20  ;;  %v245_v12 = vadd.f32 %v241_v9, %v147_v32  ;;  %v246_v13 = vadd.f32 %v242_v5, %v148_v60  ;;  %v280_v17 = vsel %vm278_vm5, %v3878_v43, %v3826_v23  ;;  %v3417_v43 = vld [vmem:[%s5966_s3 + $0x38] sm:$0xff]  ;;  %v6334_v9 = vld [vmem:[#allocation271_spill] sm:$0xff] }
 0xd5b   :  { %2722 = vrot.lane.b32.xlu1 %v2716_v3, %s3495_s11  ;;  %v225_v21 = vadd.f32 %v221_v7, %v127_v57  ;;  %v226_v41 = vadd.f32 %v222_v14, %v128_v50  ;;  %v339_v25 = vsel %vm278_vm5, %v3832_v29, %v3880_v44  ;;  %v397_v19 = vsel %vm376_vm4, %v3840_v34, %v3884_v46  ;;  %v6330_v32 = vld [vmem:[#allocation269_spill] sm:$0xff]  ;;  %v6332_v50 = vld [vmem:[#allocation10_spill] sm:$0xff] }
 0xd5c   :  { %v303_v42 = vadd.f32 %v299_v18, %v205_v53  ;;  %v304_v55 = vadd.f32 %v300_v40, %v206_v38  ;;  %v283_v59 = vadd.f32 %v279_v36, %v185_v58  ;;  %v377_v23 = vsel %vm376_vm4, %v3838_v33, %v3886_v47  ;;  %v6333_v53 = vld [vmem:[#allocation8_spill] sm:$0xff]  ;;  %v6336_v38 = vld [vmem:[#allocation7_spill] sm:$0xff]  ;;  %v6337_v7 = vld [vmem:[#allocation9_spill] sm:$0xff] }
 0xd5d   :  { %v284_v52 = vadd.f32 %v280_v17, %v186_v22  ;;  %v319_v29 = vsel %vm278_vm5, %v3830_v28, %v3882_v45  ;;  %v320_v34 = vsel %vm278_vm5, %v3882_v45, %v3834_v30  ;;  %v378_v63 = vsel %vm376_vm4, %v3886_v47, %v3842_v10  ;;  %v6338_v18 = vld [vmem:[#allocation272_spill] sm:$0xff]  ;;  %v6339_v36 = vld [vmem:[#allocation13_spill] sm:$0xff]  ;;  %v6340_v22 = vld [vmem:[#allocation15_spill] sm:$0xff] }
 0xd5e   :  { %2738 = vrot.lane.b32.xlu0 %v3416_v11, %s3491_s10  ;;  %v340_v33 = vsel %vm278_vm5, %v3880_v44, %v3836_v31  ;;  %v343_v62 = vadd.f32 %v339_v25, %v245_v12  ;;  %v398_v0 = vsel %vm376_vm4, %v3884_v46, %v3844_v15  ;;  %v401_v28 = vadd.f32 %v397_v19, %v303_v42  ;;  %v6323_v46 = vld [vmem:[#allocation6_spill] sm:$0xff]  ;;  %v6335_v11 = vld [vmem:[#allocation11_spill] sm:$0xff]  ;;  %v6341_v12 = vld [vmem:[#allocation12_spill] sm:$0xff] }
 0xd5f   :  { %2726 = vrot.lane.b32.xlu1 %v2718_v24, %s3495_s11  ;;  %v381_v20 = vadd.f32 %v377_v23, %v283_v59  ;;  %v437_v30 = vsel %vm376_vm4, %v3848_v37, %v3888_v48  ;;  %v417_v10 = vsel %vm376_vm4, %v3846_v35, %v3890_v49  ;;  %v418_v31 = vsel %vm376_vm4, %v3890_v49, %v3850_v39  ;;  %v6342_v17 = vld [vmem:[#allocation14_spill] sm:$0xff]  ;;  %v6343_v42 = vld [vmem:[#allocation16_spill] sm:$0xff] }
 0xd60   :  { %v323_v44 = vadd.f32 %v319_v29, %v225_v21  ;;  %v324_v15 = vadd.f32 %v320_v34, %v226_v41  ;;  %v382_v45 = vadd.f32 %v378_v63, %v284_v52  ;;  %v438_v47 = vsel %vm376_vm4, %v3888_v48, %v6323_v46 }
 0xd61   :  { %v344_v56 = vadd.f32 %v340_v33, %v246_v13  ;;  %v402_v37 = vadd.f32 %v398_v0, %v304_v55  ;;  %v6324_v61 = vstv %s4939_s1  ;;  %v441_v8 = vadd.f32 %v437_v30, %v343_v62  ;;  %v6344_v55 = vld [vmem:[#allocation17_spill] sm:$0xff]  ;;  %v6345_v62 = vld [vmem:[#allocation18_spill] sm:$0xff]  ;;  %v6347_v30 = vld [vmem:[#allocation19_spill] sm:$0xff]  ;;  %s5243_s1 = sld [smem:[#allocation3 + $0xd]] }
 0xd62   :  { %v457_v16 = vmul.f32 %v6325_v26, %v6324_v61  ;;  %v6326_v35 = vmov %v6324_v61  ;;  %v421_v39 = vadd.f32 %v417_v10, %v323_v44  ;;  %v422_v49 = vadd.f32 %v418_v31, %v324_v15  ;;  %v6348_v31 = vld [vmem:[#allocation20_spill] sm:$0xff]  ;;  %v6349_v15 = vld [vmem:[#allocation22_spill] sm:$0xff] }
 0xd63   :  { %2740 = vrot.lane.b32.xlu1 %v3417_v43, %s3491_s10  ;;  %v458_v2 = vmul.f32 %v6327_v51, %v6326_v35  ;;  %v6328_v4 = vstv %s4942_s23  ;;  %v442_v54 = vadd.f32 %v438_v47, %v344_v56  ;;  %v453_v3 = vadd.f32 %v6329_v1, %v401_v28  ;;  %v6351_v47 = vld [vmem:[#allocation25_spill] sm:$0xff]  ;;  %v6353_v61 = vld [vmem:[#allocation24_spill] sm:$0xff]  ;;  %s5257_s23 = sld [smem:[#allocation3 + $0x31]] }
 0xd64   :  { %v463_v27 = vmul.f32 %v6325_v26, %v6328_v4  ;;  %v447_v60 = vadd.f32 %v6330_v32, %v381_v20  ;;  %v6331_v48 = vmov %v6328_v4  ;;  %v520_v6 = vsel %vm354_vm3, %v6333_v53, %v6332_v50  ;;  %v6346_v20 = vld [vmem:[#allocation21_spill] sm:$0xff]  ;;  %v6362_v53 = vld [vmem:[#allocation35_spill] sm:$0xff] }
 0xd65   :  { %v464_v57 = vmul.f32 %v6327_v51, %v6331_v48  ;;  %v448_v5 = vadd.f32 %v6334_v9, %v382_v45  ;;  %v500_v58 = vsel %vm354_vm3, %v6336_v38, %v6335_v11  ;;  %v501_v14 = vsel %vm354_vm3, %v6335_v11, %v6337_v7  ;;  %v6350_v45 = vld [vmem:[#allocation23_spill] sm:$0xff]  ;;  %v6355_v51 = vld [vmem:[#allocation28_spill] sm:$0xff] }
 0xd66   :  { %v454_v40 = vadd.f32 %v6338_v18, %v402_v37  ;;  %v521_v24 = vsel %vm354_vm3, %v6332_v50, %v6339_v36  ;;  %v540_v13 = vsel %vm354_vm3, %v6341_v12, %v6340_v22  ;;  %v541_v21 = vsel %vm354_vm3, %v6340_v22, %v6342_v17  ;;  %v6352_v37 = vld [vmem:[#allocation27_spill] sm:$0xff]  ;;  %v6361_v50 = vld [vmem:[#allocation34_spill] sm:$0xff]  ;;  %v6363_v18 = vld [vmem:[#allocation37_spill] sm:$0xff] }
 0xd67   :  { %v459_v41 = vadd.f32 %v457_v16, %v421_v39  ;;  %v460_v25 = vadd.f32 %v458_v2, %v422_v49  ;;  %v465_v19 = vadd.f32 %v463_v27, %v441_v8  ;;  %v560_v59 = vsel %vm354_vm3, %v6344_v55, %v6343_v42  ;;  %v6354_v16 = vld [vmem:[#allocation26_spill] sm:$0xff]  ;;  %v6356_v2 = vld [vmem:[#allocation29_spill] sm:$0xff]  ;;  %v6365_v22 = vld [vmem:[#allocation36_spill] sm:$0xff] }
 0xd68   :  { %v524_v23 = vadd.f32 %v520_v6, %v453_v3  ;;  %v504_v43 = vadd.f32 %v500_v58, %v447_v60  ;;  %v505_v52 = vadd.f32 %v501_v14, %v448_v5  ;;  %v466_v29 = vadd.f32 %v464_v57, %v442_v54  ;;  %v6357_v49 = vld [vmem:[#allocation30_spill] sm:$0xff]  ;;  %v6358_v27 = vld [vmem:[#allocation33_spill] sm:$0xff]  ;;  %v6359_v54 = vld [vmem:[#allocation31_spill] sm:$0xff] }
 0xd69   :  { %v525_v34 = vadd.f32 %v521_v24, %v454_v40  ;;  %v544_v63 = vadd.f32 %v540_v13, %v459_v41  ;;  %v545_v33 = vadd.f32 %v541_v21, %v460_v25  ;;  %v561_v0 = vsel %vm354_vm3, %v6343_v42, %v6345_v62  ;;  %v6360_v3 = vld [vmem:[#allocation32_spill] sm:$0xff]  ;;  %v6364_v24 = vld [vmem:[#allocation39_spill] sm:$0xff]  ;;  %v6366_v13 = vld [vmem:[#allocation38_spill] sm:$0xff] }
 0xd6a   :  { %v564_v28 = vadd.f32 %v560_v59, %v465_v19  ;;  %v596_v10 = vsel %vm256_vm2, %v6347_v30, %v6346_v20  ;;  %v597_v44 = vsel %vm256_vm2, %v6346_v20, %v6348_v31  ;;  %v616_v46 = vsel %vm256_vm2, %v6350_v45, %v6349_v15  ;;  %v6367_v21 = vld [vmem:[#allocation40_spill] sm:$0xff]  ;;  %v6368_v41 = vld [vmem:[#allocation41_spill] sm:$0xff]  ;;  %v6369_v19 = vld [vmem:[#allocation42_spill] sm:$0xff] }
 0xd6b   :  { %v617_v56 = vsel %vm256_vm2, %v6349_v15, %v6351_v47  ;;  %v636_v26 = vsel %vm256_vm2, %v6353_v61, %v6352_v37  ;;  %v637_v35 = vsel %vm256_vm2, %v6352_v37, %v6354_v16  ;;  %v656_v8 = vsel %vm256_vm2, %v6356_v2, %v6355_v51  ;;  %v6370_v55 = vld [vmem:[#allocation45_spill] sm:$0xff]  ;;  %v6371_v59 = vld [vmem:[#allocation43_spill] sm:$0xff]  ;;  %v6377_v20 = vld [vmem:[#allocation48_spill] sm:$0xff] }
 0xd6c   :  { %v565_v39 = vadd.f32 %v561_v0, %v466_v29  ;;  %v657_v4 = vsel %vm256_vm2, %v6355_v51, %v6357_v49  ;;  %v692_v1 = vsel %vm158_vm1, %v6359_v54, %v6358_v27  ;;  %v693_v32 = vsel %vm158_vm1, %v6358_v27, %v6360_v3  ;;  %v6373_v29 = vld [vmem:[#allocation46_spill] sm:$0xff]  ;;  %v6375_v62 = vld [vmem:[#allocation49_spill] sm:$0xff]  ;;  %v6383_v27 = vld [vmem:[#allocation55_spill] sm:$0xff] }
 0xd6d   :  { %v600_v60 = vadd.f32 %v596_v10, %v504_v43  ;;  %v601_v48 = vadd.f32 %v597_v44, %v505_v52  ;;  %v620_v57 = vadd.f32 %v616_v46, %v524_v23  ;;  %v712_v6 = vsel %vm158_vm1, %v6362_v53, %v6361_v50  ;;  %v6372_v43 = vld [vmem:[#allocation44_spill] sm:$0xff]  ;;  %v6378_v10 = vld [vmem:[#allocation50_spill] sm:$0xff]  ;;  %v6380_v47 = vld [vmem:[#allocation53_spill] sm:$0xff] }
 0xd6e   :  { %v621_v9 = vadd.f32 %v617_v56, %v525_v34  ;;  %v640_v5 = vadd.f32 %v636_v26, %v544_v63  ;;  %v641_v11 = vadd.f32 %v637_v35, %v545_v33  ;;  %v660_v38 = vadd.f32 %v656_v8, %v564_v28  ;;  %v6374_v34 = vld [vmem:[#allocation47_spill] sm:$0xff]  ;;  %v6379_v46 = vld [vmem:[#allocation52_spill] sm:$0xff]  ;;  %v6381_v8 = vld [vmem:[#allocation54_spill] sm:$0xff] }
 0xd6f   :  { %v661_v58 = vadd.f32 %v657_v4, %v565_v39  ;;  %v696_v7 = vadd.f32 %v692_v1, %v600_v60  ;;  %v697_v14 = vadd.f32 %v693_v32, %v601_v48  ;;  %v713_v40 = vsel %vm158_vm1, %v6361_v50, %v6363_v18  ;;  %v6376_v28 = vld [vmem:[#allocation51_spill] sm:$0xff]  ;;  %v6382_v4 = vld [vmem:[#allocation57_spill] sm:$0xff]  ;;  %v6384_v1 = vld [vmem:[#allocation56_spill] sm:$0xff] }
 0xd70   :  { %v716_v36 = vadd.f32 %v712_v6, %v620_v57  ;;  %v732_v12 = vsel %vm158_vm1, %v6365_v22, %v6364_v24  ;;  %v733_v17 = vsel %vm158_vm1, %v6364_v24, %v6366_v13  ;;  %v752_v25 = vsel %vm158_vm1, %v6368_v41, %v6367_v21  ;;  %v6385_v32 = vld [vmem:[#allocation58_spill] sm:$0xff]  ;;  %v6386_v60 = vld [vmem:[#allocation59_spill] sm:$0xff]  ;;  %v6387_v57 = vld [vmem:[#allocation61_spill] sm:$0xff] }
 0xd71   :  { %v753_v42 = vsel %vm158_vm1, %v6367_v21, %v6369_v19  ;;  %v788_v23 = vsel %vm60_vm0, %v6371_v59, %v6370_v55  ;;  %v789_v52 = vsel %vm60_vm0, %v6370_v55, %v6372_v43  ;;  %v808_v63 = vsel %vm60_vm0, %v6374_v34, %v6373_v29  ;;  %v6388_v53 = vld [vmem:[#allocation63_spill] sm:$0xff]  ;;  %v6389_v6 = vld [vmem:[#allocation60_spill] sm:$0xff]  ;;  %v6393_v18 = vld [vmem:[#allocation66_spill] sm:$0xff] }
 0xd72   :  { %v717_v33 = vadd.f32 %v713_v40, %v621_v9  ;;  %v809_v0 = vsel %vm60_vm0, %v6373_v29, %v6375_v62  ;;  %v828_v30 = vsel %vm60_vm0, %v6377_v20, %v6376_v28  ;;  %v829_v31 = vsel %vm60_vm0, %v6376_v28, %v6378_v10  ;;  %v6395_v24 = vld [vmem:[#allocation67_spill] sm:$0xff]  ;;  %v6401_v28 = vld [vmem:[#allocation72_spill] sm:$0xff] }
 0xd73   :  { %v736_v44 = vadd.f32 %v732_v12, %v640_v5  ;;  %v737_v15 = vadd.f32 %v733_v17, %v641_v11  ;;  %v756_v45 = vadd.f32 %v752_v25, %v660_v38  ;;  %v848_v56 = vsel %vm60_vm0, %v6380_v47, %v6379_v46  ;;  %v6390_v5 = vld [vmem:[#allocation62_spill] sm:$0xff]  ;;  %v6391_v38 = vld [vmem:[#allocation64_spill] sm:$0xff]  ;;  %v6398_v19 = vld [vmem:[#allocation71_spill] sm:$0xff] }
 0xd74   :  { %v757_v37 = vadd.f32 %v753_v42, %v661_v58  ;;  %v792_v61 = vadd.f32 %v788_v23, %v696_v7  ;;  %v793_v26 = vadd.f32 %v789_v52, %v697_v14  ;;  %v812_v16 = vadd.f32 %v808_v63, %v716_v36  ;;  %v6392_v58 = vld [vmem:[#allocation65_spill] sm:$0xff]  ;;  %v6396_v12 = vld [vmem:[#allocation68_spill] sm:$0xff]  ;;  %v6397_v25 = vld [vmem:[#allocation70_spill] sm:$0xff] }
 0xd75   :  { %v813_v35 = vadd.f32 %v809_v0, %v717_v33  ;;  %v832_v51 = vadd.f32 %v828_v30, %v736_v44  ;;  %v833_v2 = vadd.f32 %v829_v31, %v737_v15  ;;  %v849_v39 = vsel %vm60_vm0, %v6379_v46, %v6381_v8  ;;  %v6394_v36 = vld [vmem:[#allocation69_spill] sm:$0xff]  ;;  %v6400_v0 = vld [vmem:[#allocation75_spill] sm:$0xff]  ;;  %v6402_v30 = vld [vmem:[#allocation74_spill] sm:$0xff] }
 0xd76   :  { %v852_v49 = vadd.f32 %v848_v56, %v756_v45  ;;  %v890_v54 = vsel %vm82_vm7, %v6383_v27, %v6382_v4  ;;  %v891_v3 = vsel %vm82_vm7, %v6382_v4, %v6384_v1  ;;  %v910_v48 = vsel %vm82_vm7, %v6386_v60, %v6385_v32  ;;  %v6399_v63 = vld [vmem:[#allocation73_spill] sm:$0xff]  ;;  %v6403_v31 = vld [vmem:[#allocation76_spill] sm:$0xff]  ;;  %v6405_v45 = vld [vmem:[#allocation78_spill] sm:$0xff] }
 0xd77   :  { %v911_v50 = vsel %vm82_vm7, %v6385_v32, %v6387_v57  ;;  %v930_v9 = vsel %vm82_vm7, %v6389_v6, %v6388_v53  ;;  %v931_v11 = vsel %vm82_vm7, %v6388_v53, %v6390_v5  ;;  %v950_v7 = vsel %vm82_vm7, %v6392_v58, %v6391_v38  ;;  %v6404_v44 = vld [vmem:[#allocation77_spill] sm:$0xff]  ;;  %v6407_v56 = vld [vmem:[#allocation79_spill] sm:$0xff]  ;;  %v6413_v4 = vld [vmem:[#allocation84_spill] sm:$0xff] }
 0xd78   :  { %v853_v14 = vadd.f32 %v849_v39, %v757_v37  ;;  %v951_v40 = vsel %vm82_vm7, %v6391_v38, %v6393_v18  ;;  %v985_v22 = vsel %vm180_vm6, %v6395_v24, %v6394_v36  ;;  %v986_v13 = vsel %vm180_vm6, %v6394_v36, %v6396_v12  ;;  %v6406_v47 = vld [vmem:[#allocation81_spill] sm:$0xff]  ;;  %v6415_v58 = vld [vmem:[#allocation88_spill] sm:$0xff] }
 0xd79   :  { %v894_v17 = vadd.f32 %v890_v54, %v792_v61  ;;  %v895_v21 = vadd.f32 %v891_v3, %v793_v26  ;;  %v914_v41 = vadd.f32 %v910_v48, %v812_v16  ;;  %v1005_v42 = vsel %vm180_vm6, %v6398_v19, %v6397_v25  ;;  %v6408_v61 = vld [vmem:[#allocation80_spill] sm:$0xff]  ;;  %v6409_v16 = vld [vmem:[#allocation82_spill] sm:$0xff]  ;;  %v6411_v8 = vld [vmem:[#allocation85_spill] sm:$0xff] }
 0xd7a   :  { %v915_v55 = vadd.f32 %v911_v50, %v813_v35  ;;  %v934_v59 = vadd.f32 %v930_v9, %v832_v51  ;;  %v935_v23 = vadd.f32 %v931_v11, %v833_v2  ;;  %v954_v43 = vadd.f32 %v950_v7, %v852_v49  ;;  %v6410_v35 = vld [vmem:[#allocation83_spill] sm:$0xff]  ;;  %v6414_v54 = vld [vmem:[#allocation86_spill] sm:$0xff]  ;;  %v6416_v7 = vld [vmem:[#allocation89_spill] sm:$0xff] }
 0xd7b   :  { %v955_v52 = vadd.f32 %v951_v40, %v853_v14  ;;  %v989_v29 = vadd.f32 %v985_v22, %v894_v17  ;;  %v990_v34 = vadd.f32 %v986_v13, %v895_v21  ;;  %v1006_v33 = vsel %vm180_vm6, %v6397_v25, %v6399_v63  ;;  %v6412_v49 = vld [vmem:[#allocation87_spill] sm:$0xff]  ;;  %v6417_v18 = vld [vmem:[#allocation93_spill] sm:$0xff]  ;;  %v6419_v24 = vld [vmem:[#allocation92_spill] sm:$0xff] }
 0xd7c   :  { %v1009_v62 = vadd.f32 %v1005_v42, %v914_v41  ;;  %v1025_v20 = vsel %vm180_vm6, %v6401_v28, %v6400_v0  ;;  %v1026_v10 = vsel %vm180_vm6, %v6400_v0, %v6402_v30  ;;  %v1045_v15 = vsel %vm180_vm6, %v6404_v44, %v6403_v31  ;;  %v6418_v40 = vld [vmem:[#allocation91_spill] sm:$0xff]  ;;  %v3461_v12 = vld [vmem:[%s5963_s0 + $0x10] sm:$0xff]  ;;  %v6420_v17 = vld [vmem:[#allocation90_spill] sm:$0xff] }
 0xd7d   :  { %v1046_v46 = vsel %vm180_vm6, %v6403_v31, %v6405_v45  ;;  %v1080_v37 = vsel %vm278_vm5, %v6407_v56, %v6406_v47  ;;  %v1081_v26 = vsel %vm278_vm5, %v6406_v47, %v6408_v61  ;;  %v1100_v51 = vsel %vm278_vm5, %v6410_v35, %v6409_v16  ;;  %v6421_v41 = vld [vmem:[#allocation94_spill] sm:$0xff]  ;;  %v6422_v25 = vld [vmem:[#allocation95_spill] sm:$0xff]  ;;  %v6423_v42 = vld [vmem:[#allocation97_spill] sm:$0xff] }
 0xd7e   :  { %v1010_v2 = vadd.f32 %v1006_v33, %v915_v55  ;;  %v1101_v39 = vsel %vm278_vm5, %v6409_v16, %v6411_v8  ;;  %v1120_v27 = vsel %vm278_vm5, %v6413_v4, %v6412_v49  ;;  %v1121_v1 = vsel %vm278_vm5, %v6412_v49, %v6414_v54  ;;  %v6425_v0 = vld [vmem:[#allocation96_spill] sm:$0xff]  ;;  %v6431_v54 = vld [vmem:[#allocation103_spill] sm:$0xff] }
 0xd7f   :  { %v1029_v3 = vadd.f32 %v1025_v20, %v934_v59  ;;  %v1030_v32 = vadd.f32 %v1026_v10, %v935_v23  ;;  %v1049_v60 = vadd.f32 %v1045_v15, %v954_v43  ;;  %v1242_v48 = vstv %s5243_s1  ;;  %v3462_v59 = vld [vmem:[%s5963_s0 + $0x18] sm:$0xff]  ;;  %v6426_v20 = vld [vmem:[#allocation98_spill] sm:$0xff]  ;;  %v6427_v44 = vld [vmem:[#allocation100_spill] sm:$0xff]  ;;  %s3436_s1 = sld [smem:[#allocation3 + $0x69]] }
 0xd80   :  { %v1050_v57 = vadd.f32 %v1046_v46, %v955_v52  ;;  %v1084_v50 = vadd.f32 %v1080_v37, %v989_v29  ;;  %v1085_v53 = vadd.f32 %v1081_v26, %v990_v34  ;;  %v1104_v6 = vadd.f32 %v1100_v51, %v1009_v62  ;;  %v6424_v62 = vld [vmem:[#allocation99_spill] sm:$0xff]  ;;  %v6428_v15 = vld [vmem:[#allocation101_spill] sm:$0xff]  ;;  %v6429_v46 = vld [vmem:[#allocation102_spill] sm:$0xff] }
 0xd81   :  { %v1105_v9 = vadd.f32 %v1101_v39, %v1010_v2  ;;  %v1124_v5 = vadd.f32 %v1120_v27, %v1029_v3  ;;  %v1125_v11 = vadd.f32 %v1121_v1, %v1030_v32  ;;  %v1248_v38 = vstv %s5257_s23  ;;  %v6430_v27 = vld [vmem:[#allocation105_spill] sm:$0xff]  ;;  %v6432_v3 = vld [vmem:[#allocation104_spill] sm:$0xff]  ;;  %s3440_s23 = sld [smem:[#allocation3 + $0x22]] }
 0xd82   :  { %v1140_v14 = vsel %vm278_vm5, %v6416_v7, %v6415_v58  ;;  %v1175_v36 = vsel %vm376_vm4, %v6418_v40, %v6417_v18  ;;  %v1176_v22 = vsel %vm376_vm4, %v6417_v18, %v6419_v24  ;;  %v1243_v13 = vmul.f32 %v3461_v12, %v1242_v48  ;;  %v6439_v40 = vld [vmem:[#allocation112_spill] sm:$0xff] }
 0xd83   :  { %v1141_v21 = vsel %vm278_vm5, %v6415_v58, %v6420_v17  ;;  %v1195_v19 = vsel %vm376_vm4, %v6422_v25, %v6421_v41  ;;  %v1196_v55 = vsel %vm376_vm4, %v6421_v41, %v6423_v42  ;;  %v1244_v23 = vmul.f32 %v3462_v59, %v1242_v48  ;;  %v6438_v58 = vld [vmem:[#allocation110_spill] sm:$0xff] }
 0xd84   :  { %v1249_v43 = vmul.f32 %v3461_v12, %v1248_v38  ;;  %v1250_v52 = vmul.f32 %v3462_v59, %v1248_v38  ;;  %v1254_v29 = vstv %s5271_s9  ;;  %v1260_v34 = vstv %s5273_s12  ;;  %s3441_s9 = sld [smem:[#allocation3 + $0x46]]  ;;  %s3442_s12 = sld [smem:[#allocation3 + $0x6a]] }
 0xd85   :  { %v1179_v63 = vadd.f32 %v1175_v36, %v1084_v50  ;;  %v1180_v33 = vadd.f32 %v1176_v22, %v1085_v53  ;;  %v1215_v28 = vsel %vm376_vm4, %v6425_v0, %v6424_v62  ;;  %v1216_v30 = vsel %vm376_vm4, %v6424_v62, %v6426_v20  ;;  %v6434_v50 = vld [vmem:[#allocation107_spill] sm:$0xff]  ;;  %v6440_v36 = vld [vmem:[#allocation113_spill] sm:$0xff]  ;;  %v6441_v22 = vld [vmem:[#allocation114_spill] sm:$0xff] }
 0xd86   :  { %v1199_v10 = vadd.f32 %v1195_v19, %v1104_v6  ;;  %v1200_v31 = vadd.f32 %v1196_v55, %v1105_v9  ;;  %v1235_v45 = vsel %vm376_vm4, %v6428_v15, %v6427_v44  ;;  %v1236_v47 = vsel %vm376_vm4, %v6427_v44, %v6429_v46  ;;  %v6435_v6 = vld [vmem:[#allocation109_spill] sm:$0xff]  ;;  %v6446_v62 = vld [vmem:[#allocation119_spill] sm:$0xff]  ;;  %v6450_v44 = vld [vmem:[#allocation122_spill] sm:$0xff] }
 0xd87   :  { %v1144_v56 = vadd.f32 %v1140_v14, %v1049_v60  ;;  %v1145_v37 = vadd.f32 %v1141_v21, %v1050_v57  ;;  %v1255_v61 = vmul.f32 %v3461_v12, %v1254_v29  ;;  %v1256_v26 = vmul.f32 %v3462_v59, %v1254_v29  ;;  %v6433_v57 = vld [vmem:[#allocation106_spill] sm:$0xff]  ;;  %v6452_v46 = vld [vmem:[#allocation125_spill] sm:$0xff] }
 0xd88   :  { %v1219_v16 = vadd.f32 %v1215_v28, %v1124_v5  ;;  %v1220_v35 = vadd.f32 %v1216_v30, %v1125_v11  ;;  %v1261_v51 = vmul.f32 %v3461_v12, %v1260_v34  ;;  %v1262_v2 = vmul.f32 %v3462_v59, %v1260_v34  ;;  %v6436_v5 = vld [vmem:[#allocation111_spill] sm:$0xff]  ;;  %v6437_v11 = vld [vmem:[#allocation108_spill] sm:$0xff]  ;;  %v6447_v28 = vld [vmem:[#allocation121_spill] sm:$0xff] }
 0xd89   :  { %v1239_v8 = vadd.f32 %v1235_v45, %v1144_v56  ;;  %v1240_v39 = vadd.f32 %v1236_v47, %v1145_v37  ;;  %v1245_v49 = vadd.f32 %v1243_v13, %v1179_v63  ;;  %v1246_v4 = vadd.f32 %v1244_v23, %v1180_v33  ;;  %v6444_v34 = vld [vmem:[#allocation116_spill] sm:$0xff]  ;;  %v6445_v33 = vld [vmem:[#allocation118_spill] sm:$0xff]  ;;  %v6448_v30 = vld [vmem:[#allocation123_spill] sm:$0xff] }
 0xd8a   :  { %v1297_v1 = vsel %vm354_vm3, %v6431_v54, %v6430_v27  ;;  %v1298_v32 = vsel %vm354_vm3, %v6430_v27, %v6432_v3  ;;  %v1251_v60 = vadd.f32 %v1249_v43, %v1199_v10  ;;  %v1252_v48 = vadd.f32 %v1250_v52, %v1200_v31  ;;  %v6442_v43 = vld [vmem:[#allocation117_spill] sm:$0xff]  ;;  %v6443_v52 = vld [vmem:[#allocation115_spill] sm:$0xff]  ;;  %v6449_v10 = vld [vmem:[#allocation120_spill] sm:$0xff] }
 0xd8b   :  { %v1317_v53 = vsel %vm354_vm3, %v6434_v50, %v6433_v57  ;;  %v1318_v9 = vsel %vm354_vm3, %v6433_v57, %v6435_v6  ;;  %v1337_v38 = vsel %vm354_vm3, %v6437_v11, %v6436_v5  ;;  %v1338_v7 = vsel %vm354_vm3, %v6436_v5, %v6438_v58  ;;  %v6451_v45 = vld [vmem:[#allocation124_spill] sm:$0xff]  ;;  %v6453_v56 = vld [vmem:[#allocation126_spill] sm:$0xff]  ;;  %v6459_v27 = vld [vmem:[#allocation133_spill] sm:$0xff] }
 0xd8c   :  { %v1257_v14 = vadd.f32 %v1255_v61, %v1219_v16  ;;  %v1258_v18 = vadd.f32 %v1256_v26, %v1220_v35  ;;  %v1357_v24 = vsel %vm354_vm3, %v6440_v36, %v6439_v40  ;;  %v1358_v12 = vsel %vm354_vm3, %v6439_v40, %v6441_v22  ;;  %v6454_v61 = vld [vmem:[#allocation129_spill] sm:$0xff]  ;;  %v6455_v26 = vld [vmem:[#allocation127_spill] sm:$0xff]  ;;  %v6456_v35 = vld [vmem:[#allocation128_spill] sm:$0xff] }
 0xd8d   :  { %v1301_v13 = vadd.f32 %v1297_v1, %v1245_v49  ;;  %v1302_v17 = vadd.f32 %v1298_v32, %v1246_v4  ;;  %v1263_v21 = vadd.f32 %v1261_v51, %v1239_v8  ;;  %v1264_v41 = vadd.f32 %v1262_v2, %v1240_v39  ;;  %v6457_v39 = vld [vmem:[#allocation130_spill] sm:$0xff]  ;;  %v6458_v49 = vld [vmem:[#allocation131_spill] sm:$0xff]  ;;  %v6461_v11 = vld [vmem:[#allocation132_spill] sm:$0xff] }
 0xd8e   :  { %v1321_v25 = vadd.f32 %v1317_v53, %v1251_v60  ;;  %v1322_v19 = vadd.f32 %v1318_v9, %v1252_v48  ;;  %v1341_v42 = vadd.f32 %v1337_v38, %v1257_v14  ;;  %v1342_v55 = vadd.f32 %v1338_v7, %v1258_v18  ;;  %v6460_v5 = vld [vmem:[#allocation135_spill] sm:$0xff]  ;;  %v6462_v58 = vld [vmem:[#allocation134_spill] sm:$0xff]  ;;  %v6463_v14 = vld [vmem:[#allocation136_spill] sm:$0xff] }
 0xd8f   :  { %v1361_v59 = vadd.f32 %v1357_v24, %v1263_v21  ;;  %v1362_v23 = vadd.f32 %v1358_v12, %v1264_v41  ;;  %v1392_v29 = vsel %vm256_vm2, %v6443_v52, %v6442_v43  ;;  %v1393_v63 = vsel %vm256_vm2, %v6442_v43, %v6444_v34  ;;  %v6464_v18 = vld [vmem:[#allocation137_spill] sm:$0xff]  ;;  %v6465_v36 = vld [vmem:[#allocation138_spill] sm:$0xff]  ;;  %v6467_v12 = vld [vmem:[#allocation139_spill] sm:$0xff] }
 0xd90   :  { %v1412_v0 = vsel %vm256_vm2, %v6446_v62, %v6445_v33  ;;  %v1413_v20 = vsel %vm256_vm2, %v6445_v33, %v6447_v28  ;;  %v1432_v31 = vsel %vm256_vm2, %v6449_v10, %v6448_v30  ;;  %v1433_v15 = vsel %vm256_vm2, %v6448_v30, %v6450_v44  ;;  %v6466_v22 = vld [vmem:[#allocation141_spill] sm:$0xff]  ;;  %v6469_v41 = vld [vmem:[#allocation142_spill] sm:$0xff]  ;;  %v6475_v33 = vld [vmem:[#allocation148_spill] sm:$0xff] }
 0xd91   :  { %v1452_v47 = vsel %vm256_vm2, %v6452_v46, %v6451_v45  ;;  %v1453_v37 = vsel %vm256_vm2, %v6451_v45, %v6453_v56  ;;  %v1487_v16 = vsel %vm158_vm1, %v6455_v26, %v6454_v61  ;;  %v1488_v51 = vsel %vm158_vm1, %v6454_v61, %v6456_v35  ;;  %v6474_v52 = vld [vmem:[#allocation146_spill] sm:$0xff]  ;;  %v6476_v62 = vld [vmem:[#allocation149_spill] sm:$0xff]  ;;  %v6479_v26 = vld [vmem:[#allocation151_spill] sm:$0xff] }
 0xd92   :  { %v1396_v2 = vadd.f32 %v1392_v29, %v1301_v13  ;;  %v1397_v8 = vadd.f32 %v1393_v63, %v1302_v17  ;;  %v1507_v4 = vsel %vm158_vm1, %v6458_v49, %v6457_v39  ;;  %v1508_v54 = vsel %vm158_vm1, %v6457_v39, %v6459_v27  ;;  %v6468_v17 = vld [vmem:[#allocation140_spill] sm:$0xff]  ;;  %v6477_v28 = vld [vmem:[#allocation150_spill] sm:$0xff]  ;;  %v6478_v61 = vld [vmem:[#allocation153_spill] sm:$0xff] }
 0xd93   :  { %v1416_v1 = vadd.f32 %v1412_v0, %v1321_v25  ;;  %v1417_v3 = vadd.f32 %v1413_v20, %v1322_v19  ;;  %v1436_v32 = vadd.f32 %v1432_v31, %v1341_v42  ;;  %v1437_v60 = vadd.f32 %v1433_v15, %v1342_v55  ;;  %v6470_v25 = vld [vmem:[#allocation143_spill] sm:$0xff]  ;;  %v6471_v42 = vld [vmem:[#allocation145_spill] sm:$0xff]  ;;  %v6480_v35 = vld [vmem:[#allocation152_spill] sm:$0xff] }
 0xd94   :  { %v1456_v48 = vadd.f32 %v1452_v47, %v1361_v59  ;;  %v1457_v57 = vadd.f32 %v1453_v37, %v1362_v23  ;;  %v1491_v50 = vadd.f32 %v1487_v16, %v1396_v2  ;;  %v1492_v53 = vadd.f32 %v1488_v51, %v1397_v8  ;;  %v6472_v59 = vld [vmem:[#allocation147_spill] sm:$0xff]  ;;  %v6473_v23 = vld [vmem:[#allocation144_spill] sm:$0xff]  ;;  %v6481_v2 = vld [vmem:[#allocation154_spill] sm:$0xff] }
 0xd95   :  { %v1511_v6 = vadd.f32 %v1507_v4, %v1416_v1  ;;  %v1512_v9 = vadd.f32 %v1508_v54, %v1417_v3  ;;  %v1527_v38 = vsel %vm158_vm1, %v6461_v11, %v6460_v5  ;;  %v1528_v7 = vsel %vm158_vm1, %v6460_v5, %v6462_v58  ;;  %v6482_v8 = vld [vmem:[#allocation155_spill] sm:$0xff]  ;;  %v6483_v49 = vld [vmem:[#allocation157_spill] sm:$0xff]  ;;  %v6485_v54 = vld [vmem:[#allocation156_spill] sm:$0xff] }
 0xd96   :  { %v1547_v40 = vsel %vm158_vm1, %v6464_v18, %v6463_v14  ;;  %v1548_v24 = vsel %vm158_vm1, %v6463_v14, %v6465_v36  ;;  %v1582_v13 = vsel %vm60_vm0, %v6467_v12, %v6466_v22  ;;  %v1583_v21 = vsel %vm60_vm0, %v6466_v22, %v6468_v17  ;;  %v6484_v27 = vld [vmem:[#allocation159_spill] sm:$0xff]  ;;  %v6486_v3 = vld [vmem:[#allocation158_spill] sm:$0xff]  ;;  %v6492_v11 = vld [vmem:[#allocation164_spill] sm:$0xff] }
 0xd97   :  { %v1602_v19 = vsel %vm60_vm0, %v6470_v25, %v6469_v41  ;;  %v1603_v55 = vsel %vm60_vm0, %v6469_v41, %v6471_v42  ;;  %v1622_v43 = vsel %vm60_vm0, %v6473_v23, %v6472_v59  ;;  %v1623_v29 = vsel %vm60_vm0, %v6472_v59, %v6474_v52  ;;  %v6493_v14 = vld [vmem:[#allocation166_spill] sm:$0xff]  ;;  %v6494_v18 = vld [vmem:[#allocation167_spill] sm:$0xff]  ;;  %v6495_v36 = vld [vmem:[#allocation169_spill] sm:$0xff] }
 0xd98   :  { %v1531_v34 = vadd.f32 %v1527_v38, %v1436_v32  ;;  %v1532_v63 = vadd.f32 %v1528_v7, %v1437_v60  ;;  %v1642_v0 = vsel %vm60_vm0, %v6476_v62, %v6475_v33  ;;  %v1643_v20 = vsel %vm60_vm0, %v6475_v33, %v6477_v28  ;;  %v6487_v60 = vld [vmem:[#allocation160_spill] sm:$0xff]  ;;  %v6496_v59 = vld [vmem:[#allocation171_spill] sm:$0xff]  ;;  %v6498_v52 = vld [vmem:[#allocation170_spill] sm:$0xff] }
 0xd99   :  { %v1551_v30 = vadd.f32 %v1547_v40, %v1456_v48  ;;  %v1552_v10 = vadd.f32 %v1548_v24, %v1457_v57  ;;  %v1586_v31 = vadd.f32 %v1582_v13, %v1491_v50  ;;  %v1587_v44 = vadd.f32 %v1583_v21, %v1492_v53  ;;  %v6488_v48 = vld [vmem:[#allocation161_spill] sm:$0xff]  ;;  %v6489_v50 = vld [vmem:[#allocation162_spill] sm:$0xff]  ;;  %v6497_v23 = vld [vmem:[#allocation168_spill] sm:$0xff] }
 0xd9a   :  { %v1606_v15 = vadd.f32 %v1602_v19, %v1511_v6  ;;  %v1607_v45 = vadd.f32 %v1603_v55, %v1512_v9  ;;  %v1626_v46 = vadd.f32 %v1622_v43, %v1531_v34  ;;  %v1627_v47 = vadd.f32 %v1623_v29, %v1532_v63  ;;  %v6490_v6 = vld [vmem:[#allocation165_spill] sm:$0xff]  ;;  %v6491_v9 = vld [vmem:[#allocation163_spill] sm:$0xff]  ;;  %v6499_v34 = vld [vmem:[#allocation172_spill] sm:$0xff] }
 0xd9b   :  { %v1646_v56 = vadd.f32 %v1642_v0, %v1551_v30  ;;  %v1647_v37 = vadd.f32 %v1643_v20, %v1552_v10  ;;  %v1684_v16 = vsel %vm82_vm7, %v6479_v26, %v6478_v61  ;;  %v1685_v51 = vsel %vm82_vm7, %v6478_v61, %v6480_v35  ;;  %v6500_v63 = vld [vmem:[#allocation173_spill] sm:$0xff]  ;;  %v6501_v62 = vld [vmem:[#allocation174_spill] sm:$0xff]  ;;  %v6503_v20 = vld [vmem:[#allocation175_spill] sm:$0xff] }
 0xd9c   :  { %v1704_v39 = vsel %vm82_vm7, %v6482_v8, %v6481_v2  ;;  %v1705_v4 = vsel %vm82_vm7, %v6481_v2, %v6483_v49  ;;  %v1724_v1 = vsel %vm82_vm7, %v6485_v54, %v6484_v27  ;;  %v1725_v32 = vsel %vm82_vm7, %v6484_v27, %v6486_v3  ;;  %v6502_v28 = vld [vmem:[#allocation177_spill] sm:$0xff]  ;;  %v6504_v10 = vld [vmem:[#allocation176_spill] sm:$0xff]  ;;  %v6510_v26 = vld [vmem:[#allocation182_spill] sm:$0xff] }
 0xd9d   :  { %v1744_v57 = vsel %vm82_vm7, %v6488_v48, %v6487_v60  ;;  %v1745_v53 = vsel %vm82_vm7, %v6487_v60, %v6489_v50  ;;  %v1779_v5 = vsel %vm180_vm6, %v6491_v9, %v6490_v6  ;;  %v1780_v38 = vsel %vm180_vm6, %v6490_v6, %v6492_v11  ;;  %v6511_v2 = vld [vmem:[#allocation184_spill] sm:$0xff]  ;;  %v6512_v8 = vld [vmem:[#allocation185_spill] sm:$0xff]  ;;  %v3463_v11 = vld [vmem:[%s5963_s0 + $0x20] sm:$0xff] }
 0xd9e   :  { %v1688_v58 = vadd.f32 %v1684_v16, %v1586_v31  ;;  %v1689_v7 = vadd.f32 %v1685_v51, %v1587_v44  ;;  %v1799_v40 = vsel %vm180_vm6, %v6494_v18, %v6493_v14  ;;  %v1800_v24 = vsel %vm180_vm6, %v6493_v14, %v6495_v36  ;;  %v6505_v44 = vld [vmem:[#allocation178_spill] sm:$0xff]  ;;  %v6513_v50 = vld [vmem:[#allocation189_spill] sm:$0xff]  ;;  %v6515_v9 = vld [vmem:[#allocation188_spill] sm:$0xff] }
 0xd9f   :  { %v1708_v22 = vadd.f32 %v1704_v39, %v1606_v15  ;;  %v1709_v12 = vadd.f32 %v1705_v4, %v1607_v45  ;;  %v1728_v13 = vadd.f32 %v1724_v1, %v1626_v46  ;;  %v1729_v17 = vadd.f32 %v1725_v32, %v1627_v47  ;;  %v6506_v15 = vld [vmem:[#allocation179_spill] sm:$0xff]  ;;  %v6507_v46 = vld [vmem:[#allocation181_spill] sm:$0xff] }
 0xda0   :  { %v1748_v21 = vadd.f32 %v1744_v57, %v1646_v56  ;;  %v1749_v41 = vadd.f32 %v1745_v53, %v1647_v37  ;;  %v1783_v25 = vadd.f32 %v1779_v5, %v1688_v58  ;;  %v1784_v19 = vadd.f32 %v1780_v38, %v1689_v7  ;;  %v6508_v56 = vld [vmem:[#allocation183_spill] sm:$0xff]  ;;  %v6509_v37 = vld [vmem:[#allocation180_spill] sm:$0xff]  ;;  %v6516_v58 = vld [vmem:[#allocation190_spill] sm:$0xff] }
 0xda1   :  { %v1803_v42 = vadd.f32 %v1799_v40, %v1708_v22  ;;  %v1804_v55 = vadd.f32 %v1800_v24, %v1709_v12  ;;  %v1819_v43 = vsel %vm180_vm6, %v6497_v23, %v6496_v59  ;;  %v1820_v29 = vsel %vm180_vm6, %v6496_v59, %v6498_v52  ;;  %v6514_v53 = vld [vmem:[#allocation187_spill] sm:$0xff]  ;;  %v6518_v22 = vld [vmem:[#allocation186_spill] sm:$0xff]  ;;  %v6524_v52 = vld [vmem:[#allocation197_spill] sm:$0xff] }
 0xda2   :  { %v1839_v33 = vsel %vm180_vm6, %v6500_v63, %v6499_v34  ;;  %v1840_v0 = vsel %vm180_vm6, %v6499_v34, %v6501_v62  ;;  %v1874_v30 = vsel %vm278_vm5, %v6503_v20, %v6502_v28  ;;  %v1875_v31 = vsel %vm278_vm5, %v6502_v28, %v6504_v10  ;;  %v6517_v7 = vld [vmem:[#allocation191_spill] sm:$0xff]  ;;  %v6522_v59 = vld [vmem:[#allocation194_spill] sm:$0xff] }
 0xda3   :  { %v1894_v45 = vsel %vm278_vm5, %v6506_v15, %v6505_v44  ;;  %v1895_v47 = vsel %vm278_vm5, %v6505_v44, %v6507_v46  ;;  %v1914_v61 = vsel %vm278_vm5, %v6509_v37, %v6508_v56  ;;  %v1915_v16 = vsel %vm278_vm5, %v6508_v56, %v6510_v26  ;;  %v3464_v18 = vld [vmem:[%s5963_s0 + $0x28] sm:$0xff]  ;;  %v6525_v44 = vld [vmem:[#allocation201_spill] sm:$0xff]  ;;  %v6527_v46 = vld [vmem:[#allocation200_spill] sm:$0xff] }
 0xda4   :  { %v1823_v35 = vadd.f32 %v1819_v43, %v1728_v13  ;;  %v1824_v51 = vadd.f32 %v1820_v29, %v1729_v17  ;;  %v1934_v39 = vsel %vm278_vm5, %v6512_v8, %v6511_v2  ;;  %v2036_v49 = vstv %s5450_s18  ;;  %v6519_v13 = vld [vmem:[#allocation193_spill] sm:$0xff]  ;;  %v6523_v43 = vld [vmem:[#allocation196_spill] sm:$0xff]  ;;  %v6526_v15 = vld [vmem:[#allocation199_spill] sm:$0xff]  ;;  %s3424_s18 = sld [smem:[#allocation3 + $0x67]] }
 0xda5   :  { %v1843_v4 = vadd.f32 %v1839_v33, %v1748_v21  ;;  %v1844_v27 = vadd.f32 %v1840_v0, %v1749_v41  ;;  %v1878_v54 = vadd.f32 %v1874_v30, %v1783_v25  ;;  %v1879_v1 = vadd.f32 %v1875_v31, %v1784_v19  ;;  %v6520_v21 = vld [vmem:[#allocation195_spill] sm:$0xff]  ;;  %v6521_v41 = vld [vmem:[#allocation192_spill] sm:$0xff]  ;;  %v6530_v8 = vld [vmem:[#allocation213_spill] sm:$0xff] }
 0xda6   :  { %v1898_v3 = vadd.f32 %v1894_v45, %v1803_v42  ;;  %v1899_v32 = vadd.f32 %v1895_v47, %v1804_v55  ;;  %v1918_v60 = vadd.f32 %v1914_v61, %v1823_v35  ;;  %v1919_v48 = vadd.f32 %v1915_v16, %v1824_v51  ;;  %v6528_v35 = vld [vmem:[#allocation202_spill] sm:$0xff]  ;;  %v6529_v51 = vld [vmem:[#allocation203_spill] sm:$0xff] }
 0xda7   :  { %v1938_v57 = vadd.f32 %v1934_v39, %v1843_v4  ;;  %v1969_v6 = vsel %vm376_vm4, %v6514_v53, %v6513_v50  ;;  %v1970_v5 = vsel %vm376_vm4, %v6513_v50, %v6515_v9  ;;  %v2037_v38 = vmul.f32 %v3463_v11, %v2036_v49  ;;  %v6531_v39 = vld [vmem:[#allocation211_spill] sm:$0xff]  ;;  %v6532_v4 = vld [vmem:[#allocation212_spill] sm:$0xff] }
 0xda8   :  { %v1989_v14 = vsel %vm376_vm4, %v6517_v7, %v6516_v58  ;;  %v2038_v40 = vmul.f32 %v3464_v18, %v2036_v49  ;;  %v2042_v36 = vstv %s5470_s19  ;;  %v2048_v24 = vstv %s5472_s20  ;;  %v6534_v50 = vld [vmem:[#allocation223_spill] sm:$0xff]  ;;  %s3420_s19 = sld [smem:[#allocation3 + $0x66]] }
 0xda9   :  { %v1935_v12 = vsel %vm278_vm5, %v6511_v2, %v6518_v22  ;;  %v1990_v17 = vsel %vm376_vm4, %v6516_v58, %v6519_v13  ;;  %v2009_v25 = vsel %vm376_vm4, %v6521_v41, %v6520_v21  ;;  %v2054_v19 = vstv %s5480_s21  ;;  %v6540_v22 = vld [vmem:[#allocation237_spill] sm:$0xff]  ;;  %v6543_v41 = vld [vmem:[#allocation207_spill] sm:$0xff] }
 0xdaa   :  { %v1973_v42 = vadd.f32 %v1969_v6, %v1878_v54  ;;  %v1974_v55 = vadd.f32 %v1970_v5, %v1879_v1  ;;  %v2010_v23 = vsel %vm376_vm4, %v6520_v21, %v6522_v59  ;;  %v2029_v29 = vsel %vm376_vm4, %v6524_v52, %v6523_v43  ;;  %v6535_v6 = vld [vmem:[#allocation224_spill] sm:$0xff]  ;;  %v6536_v5 = vld [vmem:[#allocation198_spill] sm:$0xff] }
 0xdab   :  { %v1993_v34 = vadd.f32 %v1989_v14, %v1898_v3  ;;  %v2043_v63 = vmul.f32 %v3463_v11, %v2042_v36  ;;  %v2044_v33 = vmul.f32 %v3464_v18, %v2042_v36  ;;  %v2049_v62 = vmul.f32 %v3463_v11, %v2048_v24  ;;  %v6537_v14 = vld [vmem:[#allocation205_spill] sm:$0xff]  ;;  %v6539_v36 = vld [vmem:[#allocation215_spill] sm:$0xff]  ;;  %v6546_v52 = vld [vmem:[#allocation208_spill] sm:$0xff] }
 0xdac   :  { %v1994_v0 = vadd.f32 %v1990_v17, %v1899_v32  ;;  %v2013_v28 = vadd.f32 %v2009_v25, %v1918_v60  ;;  %v2050_v20 = vmul.f32 %v3464_v18, %v2048_v24  ;;  %v2055_v30 = vmul.f32 %v3463_v11, %v2054_v19  ;;  %v6542_v17 = vld [vmem:[#allocation236_spill] sm:$0xff] }
 0xdad   :  { %v2014_v10 = vadd.f32 %v2010_v23, %v1919_v48  ;;  %v2033_v31 = vadd.f32 %v2029_v29, %v1938_v57  ;;  %v2091_v45 = vsel %vm354_vm3, %v6526_v15, %v6525_v44  ;;  %v2092_v47 = vsel %vm354_vm3, %v6525_v44, %v6527_v46  ;;  %v6533_v57 = vld [vmem:[#allocation225_spill] sm:$0xff]  ;;  %v6544_v25 = vld [vmem:[#allocation204_spill] sm:$0xff] }
 0xdae   :  { %v1939_v56 = vadd.f32 %v1935_v12, %v1844_v27  ;;  %v2039_v37 = vadd.f32 %v2037_v38, %v1973_v42  ;;  %v2040_v61 = vadd.f32 %v2038_v40, %v1974_v55  ;;  %v5549_v26 = vmul.f32 %v3464_v18, %v2054_v19  ;;  %v6538_v40 = vld [vmem:[#allocation214_spill] sm:$0xff]  ;;  %v6541_v12 = vld [vmem:[#allocation235_spill] sm:$0xff]  ;;  %v6547_v29 = vld [vmem:[#allocation209_spill] sm:$0xff] }
 0xdaf   :  { %v2045_v16 = vadd.f32 %v2043_v63, %v1993_v34  ;;  %v2111_v2 = vsel %vm354_vm3, %v6529_v51, %v6528_v35  ;;  %v2186_v49 = vsel %vm256_vm2, %v6531_v39, %v6530_v8  ;;  %v2187_v54 = vsel %vm256_vm2, %v6530_v8, %v6532_v4  ;;  %v6545_v42 = vld [vmem:[#allocation206_spill] sm:$0xff]  ;;  %v6553_v44 = vld [vmem:[#allocation217_spill] sm:$0xff] }
 0xdb0   :  { %v2095_v1 = vadd.f32 %v2091_v45, %v2039_v37  ;;  %v2096_v3 = vadd.f32 %v2092_v47, %v2040_v61  ;;  %v2046_v27 = vadd.f32 %v2044_v33, %v1994_v0  ;;  %v2051_v32 = vadd.f32 %v2049_v62, %v2013_v28  ;;  %v6548_v63 = vld [vmem:[#allocation226_spill] sm:$0xff]  ;;  %v6549_v33 = vld [vmem:[#allocation227_spill] sm:$0xff]  ;;  %v6550_v0 = vld [vmem:[#allocation249_spill] sm:$0xff] }
 0xdb1   :  { %v2052_v60 = vadd.f32 %v2050_v20, %v2014_v10  ;;  %v2057_v48 = vadd.f32 %v2055_v30, %v2033_v31  ;;  %v2281_v53 = vsel %vm158_vm1, %v6534_v50, %v6533_v57  ;;  %v2282_v9 = vsel %vm158_vm1, %v6533_v57, %v6535_v6  ;;  %v6551_v28 = vld [vmem:[#allocation247_spill] sm:$0xff]  ;;  %v6552_v30 = vld [vmem:[#allocation248_spill] sm:$0xff]  ;;  %v6557_v57 = vld [vmem:[#allocation250_spill] sm:$0xff] }
 0xdb2   :  { %v2030_v11 = vsel %vm376_vm4, %v6523_v43, %v6536_v5  ;;  %v2115_v38 = vadd.f32 %v2111_v2, %v2045_v16  ;;  %v2190_v58 = vadd.f32 %v2186_v49, %v2095_v1  ;;  %v2191_v7 = vadd.f32 %v2187_v54, %v2096_v3  ;;  %v6554_v16 = vld [vmem:[#allocation238_spill] sm:$0xff]  ;;  %v6556_v1 = vld [vmem:[#allocation229_spill] sm:$0xff]  ;;  %v6558_v50 = vld [vmem:[#allocation251_spill] sm:$0xff] }
 0xdb3   :  { %v2112_v18 = vsel %vm354_vm3, %v6528_v35, %v6537_v14  ;;  %v2206_v24 = vsel %vm256_vm2, %v6539_v36, %v6538_v40  ;;  %v2376_v13 = vsel %vm60_vm0, %v6541_v12, %v6540_v22  ;;  %v2377_v21 = vsel %vm60_vm0, %v6540_v22, %v6542_v17  ;;  %v6555_v35 = vld [vmem:[#allocation239_spill] sm:$0xff]  ;;  %v6564_v14 = vld [vmem:[#allocation241_spill] sm:$0xff]  ;;  %v6565_v17 = vld [vmem:[#allocation210_spill] sm:$0xff] }
 0xdb4   :  { %v2131_v19 = vsel %vm354_vm3, %v6544_v25, %v6543_v41  ;;  %v2132_v55 = vsel %vm354_vm3, %v6543_v41, %v6545_v42  ;;  %v2285_v59 = vadd.f32 %v2281_v53, %v2190_v58  ;;  %v2286_v23 = vadd.f32 %v2282_v9, %v2191_v7  ;;  %v6560_v53 = vld [vmem:[#allocation216_spill] sm:$0xff]  ;;  %v6563_v58 = vld [vmem:[#allocation218_spill] sm:$0xff]  ;;  %v6566_v41 = vld [vmem:[#allocation231_spill] sm:$0xff] }
 0xdb5   :  { %v2151_v34 = vsel %vm354_vm3, %v6547_v29, %v6546_v52  ;;  %v2301_v62 = vsel %vm158_vm1, %v6549_v33, %v6548_v63  ;;  %v2478_v20 = vsel %vm82_vm7, %v6551_v28, %v6550_v0  ;;  %v2479_v10 = vsel %vm82_vm7, %v6550_v0, %v6552_v30  ;;  %v6567_v25 = vld [vmem:[#allocation228_spill] sm:$0xff]  ;;  %v6568_v42 = vld [vmem:[#allocation230_spill] sm:$0xff]  ;;  %v6570_v33 = vld [vmem:[#allocation261_spill] sm:$0xff] }
 0xdb6   :  { %v2210_v31 = vadd.f32 %v2206_v24, %v2115_v38  ;;  %v2207_v15 = vsel %vm256_vm2, %v6538_v40, %v6553_v44  ;;  %v2380_v45 = vadd.f32 %v2376_v13, %v2285_v59  ;;  %v2381_v46 = vadd.f32 %v2377_v21, %v2286_v23  ;;  %v6569_v59 = vld [vmem:[#allocation253_spill] sm:$0xff]  ;;  %v6573_v30 = vld [vmem:[#allocation243_spill] sm:$0xff]  ;;  %v6575_v44 = vld [vmem:[#allocation242_spill] sm:$0xff] }
 0xdb7   :  { %v2663_v43 = vpop.permute.xlu0 %2662  ;;  %v2034_v47 = vadd.f32 %v2030_v11, %v1939_v56  ;;  %v2116_v37 = vadd.f32 %v2112_v18, %v2046_v27  ;;  %v2135_v61 = vadd.f32 %v2131_v19, %v2051_v32  ;;  %v2396_v51 = vsel %vm60_vm0, %v6555_v35, %v6554_v16  ;;  %v6559_v32 = vld [vmem:[#allocation219_spill] sm:$0xff]  ;;  %v6562_v11 = vld [vmem:[#allocation260_spill] sm:$0xff]  ;;  %v6572_v28 = vld [vmem:[#allocation221_spill] sm:$0xff] }
 0xdb8   :  { %v2136_v2 = vadd.f32 %v2132_v55, %v2052_v60  ;;  %v2305_v8 = vadd.f32 %v2301_v62, %v2210_v31  ;;  %v2482_v39 = vadd.f32 %v2478_v20, %v2380_v45  ;;  %v2483_v49 = vadd.f32 %v2479_v10, %v2381_v46  ;;  %v6561_v60 = vld [vmem:[#allocation259_spill] sm:$0xff]  ;;  %v6574_v10 = vld [vmem:[#allocation240_spill] sm:$0xff] }
 0xdb9   :  { %v2155_v4 = vadd.f32 %v2151_v34, %v2057_v48  ;;  %v2211_v54 = vadd.f32 %v2207_v15, %v2116_v37  ;;  %v2302_v3 = vsel %vm158_vm1, %v6548_v63, %v6556_v1  ;;  %v2498_v56 = vsel %vm82_vm7, %v6558_v50, %v6557_v57  ;;  %v6580_v1 = vld [vmem:[#allocation254_spill] sm:$0xff] }
 0xdba   :  { %v2226_v6 = vsel %vm256_vm2, %v6560_v53, %v6559_v32  ;;  %v2400_v9 = vadd.f32 %v2396_v51, %v2305_v8  ;;  %v2577_v5 = vadd.f32 %v6561_v60, %v2482_v39  ;;  %v2578_v38 = vadd.f32 %v6562_v11, %v2483_v49  ;;  %v6576_v51 = vld [vmem:[#allocation232_spill] sm:$0xff]  ;;  %v6578_v39 = vld [vmem:[#allocation255_spill] sm:$0xff] }
 0xdbb   :  { %v2227_v7 = vsel %vm256_vm2, %v6559_v32, %v6563_v58  ;;  %v2397_v18 = vsel %vm60_vm0, %v6554_v16, %v6564_v14  ;;  %v2306_v24 = vadd.f32 %v2302_v3, %v2211_v54  ;;  %v2152_v21 = vsel %vm354_vm3, %v6546_v52, %v6565_v17  ;;  %v6571_v52 = vld [vmem:[#allocation220_spill] sm:$0xff]  ;;  %v6581_v32 = vld [vmem:[#allocation262_spill] sm:$0xff] }
 0xdbc   :  { %v2667_v27 = vpop.permute.xlu0 %2666  ;;  %v2502_v22 = vadd.f32 %v2498_v56, %v2400_v9  ;;  %v2321_v19 = vsel %vm158_vm1, %v6567_v25, %v6566_v41  ;;  %v2322_v55 = vsel %vm158_vm1, %v6566_v41, %v6568_v42  ;;  %v2499_v23 = vsel %vm82_vm7, %v6557_v57, %v6569_v59  ;;  %v6579_v49 = vld [vmem:[#allocation252_spill] sm:$0xff]  ;;  %v6585_v14 = vld [vmem:[#allocation234_spill] sm:$0xff]  ;;  %v6588_v41 = vld [vmem:[#allocation263_spill] sm:$0xff] }
 0xdbd   :  { %v2665_v48 = vpop.permute.xlu1 %2664  ;;  %v2230_v29 = vadd.f32 %v2226_v6, %v2135_v61  ;;  %v2231_v34 = vadd.f32 %v2227_v7, %v2136_v2  ;;  %v2401_v63 = vadd.f32 %v2397_v18, %v2306_v24  ;;  %v2246_v20 = vsel %vm256_vm2, %v6572_v28, %v6571_v52  ;;  %v6577_v2 = vld [vmem:[#allocation233_spill] sm:$0xff]  ;;  %v6583_v60 = vld [vmem:[#allocation244_spill] sm:$0xff]  ;;  %v6590_v59 = vld [vmem:[#allocation246_spill] sm:$0xff] }
 0xdbe   :  { %v2668_v40 = vsel %vm278_vm5, %v2663_v43, %v2665_v48  ;;  %v2669_v36 = vsel %vm278_vm5, %v2665_v48, %v2667_v27  ;;  %v2597_v62 = vadd.f32 %v6570_v33, %v2502_v22  ;;  %v2416_v31 = vsel %vm60_vm0, %v6574_v10, %v6573_v30 }
 0xdbf   :  { %v5624_v12 = vadd.f32 %v2668_v40, %v2577_v5  ;;  %v5626_v13 = vadd.f32 %v2669_v36, %v2578_v38  ;;  %v2417_v15 = vsel %vm60_vm0, %v6573_v30, %v6575_v44  ;;  %v2325_v46 = vadd.f32 %v2321_v19, %v2230_v29  ;;  %v6584_v5 = vld [vmem:[#allocation245_spill] sm:$0xff]  ;;  %v6586_v40 = vld [vmem:[#allocation256_spill] sm:$0xff] }
 0xdc0   :  { %v2685_v43 = vpop.permute.xlu0 %2684  ;;  %v2326_v37 = vadd.f32 %v2322_v55, %v2231_v34  ;;  %v2503_v61 = vadd.f32 %v2499_v23, %v2401_v63  ;;  %v2058_v35 = vadd.f32 %v5549_v26, %v2034_v47  ;;  %v2341_v8 = vsel %vm158_vm1, %v6577_v2, %v6576_v51  ;;  %v6582_v47 = vld [vmem:[#allocation222_spill] sm:$0xff]  ;;  %v6587_v36 = vld [vmem:[#allocation257_spill] sm:$0xff]  ;;  %v6589_v19 = vld [vmem:[#allocation264_spill] sm:$0xff] }
 0xdc1   :  { %v2683_v0 = vpop.permute.xlu1 %2682  ;;  %v2518_v54 = vsel %vm82_vm7, %v6579_v49, %v6578_v39  ;;  %v2519_v3 = vsel %vm82_vm7, %v6578_v39, %v6580_v1  ;;  %v2250_v50 = vadd.f32 %v2246_v20, %v2155_v4  ;;  %v2420_v56 = vadd.f32 %v2416_v31, %v2325_v46  ;;  %v6592_v30 = vld [vmem:[#allocation265_spill] sm:$0xff] }
 0xdc2   :  { %v2688_v45 = vsel %vm278_vm5, %v2683_v0, %v2685_v43  ;;  %v2421_v27 = vadd.f32 %v2417_v15, %v2326_v37  ;;  %v2598_v53 = vadd.f32 %v6581_v32, %v2503_v61  ;;  %v2156_v26 = vadd.f32 %v2152_v21, %v2058_v35  ;;  %v6591_v0 = vld [vmem:[#allocation258_spill] sm:$0xff] }
 0xdc3   :  { %v5651_v16 = vadd.f32 %v2688_v45, %v2597_v62  ;;  %v2247_v9 = vsel %vm256_vm2, %v6571_v52, %v6582_v47  ;;  %v2436_v11 = vsel %vm60_vm0, %v6584_v5, %v6583_v60  ;;  %v2345_v48 = vadd.f32 %v2341_v8, %v2250_v50  ;;  %v6593_v61 = vld [vmem:[#allocation266_spill] sm:$0xff]  ;;  %v5712_v50 = vld [vmem:[%s5963_s0 + $0x30] sm:$0xff]  ;;  %v3471_v5 = vld [vmem:[%s5966_s3 + $0x88] sm:$0xff] }
 0xdc4   :  { %v2703_v57 = vpop.permute.xlu0 %2702  ;;  %v2522_v58 = vadd.f32 %v2518_v54, %v2420_v56  ;;  %v2523_v7 = vadd.f32 %v2519_v3, %v2421_v27  ;;  %v2342_v18 = vsel %vm158_vm1, %v6576_v51, %v6585_v14  ;;  %v2538_v24 = vsel %vm82_vm7, %v6587_v36, %v6586_v40  ;;  %v5706_v3 = vld [vmem:[%s5963_s0 + $0x38] sm:$0xff]  ;;  %v3468_v47 = vld [vmem:[%s5966_s3 + $0x60] sm:$0xff]  ;;  %s3447_s0 = sld [smem:[#allocation3 + $0x47]] }
 0xdc5   :  { %v2687_v6 = vpop.permute.xlu1 %2686  ;;  %v2251_v17 = vadd.f32 %v2247_v9, %v2156_v26  ;;  %v2440_v21 = vadd.f32 %v2436_v11, %v2345_v48  ;;  %v2437_v23 = vsel %vm60_vm0, %v6583_v60, %v6590_v59  ;;  %v2539_v52 = vsel %vm82_vm7, %v6586_v40, %v6591_v0  ;;  %v3467_v26 = vld [vmem:[%s5966_s3 + $0x68] sm:$0xff]  ;;  %v3469_v9 = vld [vmem:[%s5966_s3 + $0x78] sm:$0xff]  ;;  %v3470_v60 = vld [vmem:[%s5966_s3 + $0x70] sm:$0xff] }
 0xdc6   :  { %v2689_v38 = vsel %vm278_vm5, %v2685_v43, %v2687_v6  ;;  %v2617_v25 = vadd.f32 %v6588_v41, %v2522_v58  ;;  %v2618_v42 = vadd.f32 %v6589_v19, %v2523_v7  ;;  %v2750_v37 = vstv %s3418_s2  ;;  %v3426_v6 = vld [vmem:[%s5966_s3 + $0x50] sm:$0xff] }
 0xdc7   :  { %v5671_v4 = vadd.f32 %v2689_v38, %v2598_v53  ;;  %v2346_v34 = vadd.f32 %v2342_v18, %v2251_v17  ;;  %v2542_v63 = vadd.f32 %v2538_v24, %v2440_v21  ;;  %v3427_v53 = vld [vmem:[%s5966_s3 + $0x58] sm:$0xff]  ;;  %v2770_v11 = vstv %s3419_s16  ;;  %v3472_v38 = vld [vmem:[%s5966_s3 + $0x80] sm:$0xff]  ;;  %s3428_s3 = sld [smem:[#allocation3 + $0x20]]  ;;  %s3449_s16 = sld [smem:[#allocation3 + $0x8f]] }
 0xdc8   :  { %v2707_v22 = vpop.permute.xlu0 %2706  ;;  %v2790_v7 = vstv %s3420_s19  ;;  %v2810_v24 = vstv %s3421_s25 }
 0xdc9   :  { %v2705_v55 = vpop.permute.xlu1 %2704  ;;  %v2441_v20 = vadd.f32 %v2437_v23, %v2346_v34  ;;  %v2637_v10 = vadd.f32 %v6592_v30, %v2542_v63 }
 0xdca   :  { %v2708_v43 = vsel %vm278_vm5, %v2703_v57, %v2705_v55  ;;  %v2709_v29 = vsel %vm278_vm5, %v2705_v55, %v2707_v22 }
 0xdcb   :  { %v5686_v33 = vadd.f32 %v2708_v43, %v2617_v25  ;;  %v5688_v62 = vadd.f32 %v2709_v29, %v2618_v42  ;;  %v2543_v15 = vadd.f32 %v2539_v52, %v2441_v20 }
 0xdcc   :  { %v2725_v28 = vpop.permute.xlu0 %2724 }
 0xdcd   :  { %v2723_v31 = vpop.permute.xlu1 %2722  ;;  %v2638_v35 = vadd.f32 %v6593_v61, %v2543_v15  ;;  %v2872_v34 = vstv %s3428_s3 }
 0xdce   :  { %v2728_v44 = vsel %vm278_vm5, %v2723_v31, %v2725_v28 }
 0xdcf   :  { %v5695_v45 = vadd.f32 %v2728_v44, %v2637_v10 }
 0xdd0   :  { %v2739_v46 = vpop.permute.xlu0 %2738 }
 0xdd1   :  { %v2746_v51 = vmul.f32 0.0, %v2739_v46  ;;  %v2727_v2 = vpop.permute.xlu1 %2726 }
 0xdd2   :  { %v2729_v8 = vsel %vm278_vm5, %v2725_v28, %v2727_v2 }
 0xdd3   :  { %v5699_v39 = vadd.f32 %v2729_v8, %v2638_v35  ;;  %v2751_v49 = vmul.f32 %v2750_v37, %v2746_v51  ;;  %v2771_v58 = vmul.f32 %v2770_v11, %v2746_v51  ;;  %v2791_v14 = vmul.f32 %v2790_v7, %v2746_v51 }
 0xdd4   :  { %v2811_v17 = vmul.f32 %v2810_v24, %v2746_v51 }
 0xdd5   :  { %v2741_v54 = vpop.permute.xlu1 %2740  ;;  %2757 = vrot.lane.b32.xlu0 %v2751_v49, %s3492_s15 }
 0xdd6   :  { %v2742_v1 = vsel %vm354_vm3, %v2739_v46, %v2741_v54  ;;  %v2748_v57 = vmul.f32 %v5706_v3, %v2741_v54 }
 0xdd7   :  { %v2747_v56 = vmul.f32 %v5712_v50, %v2742_v1 }
 0xdd8   :  { %v2753_v27 = vmul.f32 %v2750_v37, %v2748_v57  ;;  %v2773_v18 = vmul.f32 %v2770_v11, %v2748_v57  ;;  %v2793_v40 = vmul.f32 %v2790_v7, %v2748_v57  ;;  %v2813_v21 = vmul.f32 %v2810_v24, %v2748_v57 }
 0xdd9   :  { %v2752_v32 = vmul.f32 %v2750_v37, %v2747_v56  ;;  %v2772_v48 = vmul.f32 %v2770_v11, %v2747_v56  ;;  %v2792_v36 = vmul.f32 %v2790_v7, %v2747_v56  ;;  %v2812_v22 = vmul.f32 %v2810_v24, %v2747_v56 }
 0xdda   :  { %2761 = vrot.lane.b32.xlu0 %v2753_v27, %s3492_s15  ;;  %v2967_v11 = vstv %s3434_s7 }
 0xddb   :  { %2759 = vrot.lane.b32.xlu1 %v2752_v32, %s3492_s15 }
 0xdde   :  { %2862 = vrot.lane.b32.xlu0 %v3427_v53, %s3492_s15 }
 0xddf   :  { %2860 = vrot.lane.b32.xlu1 %v3426_v6, %s3492_s15 }
 0xde2   :  { %2957 = vrot.lane.b32.xlu0 %v3467_v26, %s3495_s11 }
 0xde3   :  { %2955 = vrot.lane.b32.xlu1 %v3468_v47, %s3495_s11 }
 0xde6   :  { %3052 = vrot.lane.b32.xlu0 %v3469_v9, %s3494_s30 }
 0xde7   :  { %3050 = vrot.lane.b32.xlu1 %v3470_v60, %s3494_s30  ;;  %s3431_s30 = sld [smem:[#allocation3 + $0x8c]] }
 0xdea   :  { %3147 = vrot.lane.b32.xlu0 %v3471_v5, %s3493_s24 }
 0xdeb   :  { %3145 = vrot.lane.b32.xlu1 %v3472_v38, %s3493_s24  ;;  %s3429_s24 = sld [smem:[#allocation3 + $0x44]] }
 0xded   :  { %v2932_v56 = vstv %s3431_s30 }
 0xdee   :  { %2779 = vrot.lane.b32.xlu0 %v2772_v48, %s3492_s15 }
 0xdef   :  { %2777 = vrot.lane.b32.xlu1 %v2771_v58, %s3492_s15 }
 0xdf2   :  { %2797 = vrot.lane.b32.xlu0 %v2791_v14, %s3492_s15 }
 0xdf3   :  { %2781 = vrot.lane.b32.xlu1 %v2773_v18, %s3492_s15 }
 0xdf6   :  { %2801 = vrot.lane.b32.xlu0 %v2793_v40, %s3492_s15 }
 0xdf7   :  { %2799 = vrot.lane.b32.xlu1 %v2792_v36, %s3492_s15 }
 0xdfa   :  { %2819 = vrot.lane.b32.xlu0 %v2812_v22, %s3492_s15 }
 0xdfb   :  { %2817 = vrot.lane.b32.xlu1 %v2811_v17, %s3492_s15 }
 0xdff   :  { %2821 = vrot.lane.b32.xlu1 %v2813_v21, %s3492_s15  ;;  %s3430_s15 = sld [smem:[#allocation3 + $0x68]] }
 0xe05   :  { %v2912_v2 = vstv %s3430_s15 }
 0xe47   :  { %v2758_v41 = vpop.permute.xlu0 %2757 }
 0xe4c   :  { %v2762_v25 = vpop.permute.xlu0 %2761 }
 0xe4d   :  { %v2760_v19 = vpop.permute.xlu1 %2759 }
 0xe4e   :  { %v2763_v42 = vsel %vm376_vm4, %v2758_v41, %v2760_v19  ;;  %v2764_v55 = vsel %vm376_vm4, %v2760_v19, %v2762_v25  ;;  %v2987_v25 = vstv %s3435_s8 }
 0xe4f   :  { %v5761_v59 = vadd.f32 %v2763_v42, %v5624_v12  ;;  %v5764_v23 = vadd.f32 %v2764_v55, %v5626_v13  ;;  %v2892_v12 = vstv %s3429_s24 }
 0xe50   :  { %v2863_v43 = vpop.permute.xlu0 %2862 }
 0xe51   :  { %v2861_v29 = vpop.permute.xlu1 %2860  ;;  %v2870_v28 = vmul.f32 0.0, %v2863_v43 }
 0xe52   :  { %v2864_v63 = vsel %vm376_vm4, %v2861_v29, %v2863_v43  ;;  %v2868_v0 = vmul.f32 %v5712_v50, %v2861_v29  ;;  %v3007_v43 = vstv %s3436_s1 }
 0xe53   :  { %v2869_v52 = vmul.f32 %v5706_v3, %v2864_v63  ;;  %v2875_v44 = vmul.f32 %v2872_v34, %v2870_v28  ;;  %v2895_v51 = vmul.f32 %v2892_v12, %v2870_v28  ;;  %v2915_v6 = vmul.f32 %v2912_v2, %v2870_v28 }
 0xe54   :  { %v2958_v20 = vpop.permute.xlu0 %2957  ;;  %v2873_v30 = vmul.f32 %v2872_v34, %v2868_v0  ;;  %v2893_v46 = vmul.f32 %v2892_v12, %v2868_v0  ;;  %v2913_v49 = vmul.f32 %v2912_v2, %v2868_v0  ;;  %v2933_v47 = vmul.f32 %v2932_v56, %v2868_v0 }
 0xe55   :  { %v2956_v10 = vpop.permute.xlu1 %2955  ;;  %v2874_v31 = vmul.f32 %v2872_v34, %v2869_v52  ;;  %v2894_v61 = vmul.f32 %v2892_v12, %v2869_v52  ;;  %v2914_v1 = vmul.f32 %v2912_v2, %v2869_v52  ;;  %v2934_v48 = vmul.f32 %v2932_v56, %v2869_v52 }
 0xe56   :  { %2879 = vrot.lane.b32.xlu0 %v2873_v30, %s3491_s10  ;;  %v2959_v32 = vsel %vm278_vm5, %v2956_v10, %v2958_v20  ;;  %v2963_v9 = vmul.f32 %v5712_v50, %v2956_v10  ;;  %v2935_v7 = vmul.f32 %v2932_v56, %v2870_v28  ;;  %v2965_v22 = vmul.f32 0.0, %v2958_v20 }
 0xe57   :  { %2881 = vrot.lane.b32.xlu1 %v2874_v31, %s3491_s10  ;;  %v2964_v5 = vmul.f32 %v5706_v3, %v2959_v32  ;;  %v3062_v30 = vstv %s3440_s23 }
 0xe58   :  { %v5771_v13 = vpop.permute.xlu0 %3052  ;;  %v2968_v40 = vmul.f32 %v2967_v11, %v2963_v9  ;;  %v2988_v19 = vmul.f32 %v2987_v25, %v2963_v9  ;;  %v2990_v55 = vmul.f32 %v2987_v25, %v2965_v22  ;;  %v3008_v29 = vmul.f32 %v3007_v43, %v2963_v9 }
 0xe59   :  { %v5773_v15 = vpop.permute.xlu1 %3050  ;;  %v2969_v24 = vmul.f32 %v2967_v11, %v2964_v5  ;;  %v2989_v42 = vmul.f32 %v2987_v25, %v2964_v5  ;;  %v3010_v0 = vmul.f32 %v3007_v43, %v2965_v22 }
 0xe5a   :  { %2883 = vrot.lane.b32.xlu0 %v2875_v44, %s3491_s10  ;;  %v3054_v63 = vsel %vm180_vm6, %v5773_v15, %v5771_v13  ;;  %v3058_v28 = vmul.f32 %v5712_v50, %v5773_v15  ;;  %v3082_v15 = vstv %s3441_s9 }
 0xe5b   :  { %2899 = vrot.lane.b32.xlu1 %v2893_v46, %s3491_s10  ;;  %v3059_v20 = vmul.f32 %v5706_v3, %v3054_v63  ;;  %v3060_v46 = vmul.f32 0.0, %v5771_v13 }
 0xe5c   :  { %v5777_v37 = vpop.permute.xlu0 %3147  ;;  %v3063_v12 = vmul.f32 %v3062_v30, %v3058_v28 }
 0xe5d   :  { %v5779_v35 = vpop.permute.xlu1 %3145  ;;  %v3064_v44 = vmul.f32 %v3062_v30, %v3059_v20  ;;  %v3084_v2 = vmul.f32 %v3082_v15, %v3059_v20 }
 0xe5e   :  { %2901 = vrot.lane.b32.xlu0 %v2894_v61, %s3491_s10  ;;  %v3065_v61 = vmul.f32 %v3062_v30, %v3060_v46 }
 0xe5f   :  { %2903 = vrot.lane.b32.xlu1 %v2895_v51, %s3491_s10  ;;  %v3083_v51 = vmul.f32 %v3082_v15, %v3058_v28 }
 0xe60   :  { %v2780_v8 = vpop.permute.xlu0 %2779 }
 0xe61   :  { %v2778_v54 = vpop.permute.xlu1 %2777 }
 0xe62   :  { %v2783_v57 = vsel %vm376_vm4, %v2778_v54, %v2780_v8  ;;  %2919 = vrot.lane.b32.xlu0 %v2913_v49, %s3491_s10  ;;  %v3102_v49 = vstv %s3442_s12 }
 0xe63   :  { %v5786_v27 = vadd.f32 %v2783_v57, %v5651_v16  ;;  %2921 = vrot.lane.b32.xlu1 %v2914_v1, %s3491_s10  ;;  %v3103_v13 = vmul.f32 %v3102_v49, %v3058_v28  ;;  %v3104_v54 = vmul.f32 %v3102_v49, %v3059_v20  ;;  %v3122_v1 = vstv %s3443_s13 }
 0xe64   :  { %v2798_v53 = vpop.permute.xlu0 %2797  ;;  %v3149_v57 = vsel %vm82_vm7, %v5779_v35, %v5777_v37  ;;  %v3105_v56 = vmul.f32 %v3102_v49, %v3060_v46  ;;  %v3123_v32 = vmul.f32 %v3122_v1, %v3058_v28 }
 0xe65   :  { %v2782_v26 = vpop.permute.xlu1 %2781 }
 0xe66   :  { %v2784_v60 = vsel %vm376_vm4, %v2780_v8, %v2782_v26  ;;  %2923 = vrot.lane.b32.xlu0 %v2915_v6, %s3491_s10  ;;  %v3085_v8 = vmul.f32 %v3082_v15, %v3060_v46  ;;  %v3154_v6 = vmul.f32 %v5706_v3, %v3149_v57 }
 0xe67   :  { %v5795_v16 = vadd.f32 %v2784_v60, %v5671_v4  ;;  %2939 = vrot.lane.b32.xlu1 %v2933_v47, %s3491_s10  ;;  %v3124_v47 = vmul.f32 %v3122_v1, %v3059_v20 }
 0xe68   :  { %v2802_v38 = vpop.permute.xlu0 %2801 }
 0xe69   :  { %v2800_v58 = vpop.permute.xlu1 %2799 }
 0xe6a   :  { %v2803_v14 = vsel %vm376_vm4, %v2798_v53, %v2800_v58  ;;  %v2804_v18 = vsel %vm376_vm4, %v2800_v58, %v2802_v38  ;;  %2941 = vrot.lane.b32.xlu0 %v2934_v48, %s3491_s10  ;;  %v3153_v53 = vmul.f32 %v5712_v50, %v5779_v35  ;;  %v3177_v35 = vstv %s3447_s0 }
 0xe6b   :  { %v5802_v36 = vadd.f32 %v2803_v14, %v5686_v33  ;;  %v5805_v4 = vadd.f32 %v2804_v18, %v5688_v62  ;;  %2943 = vrot.lane.b32.xlu1 %v2935_v7, %s3491_s10  ;;  %v2970_v62 = vmul.f32 %v2967_v11, %v2965_v22  ;;  %s3437_s10 = sld [smem:[#allocation3 + $0x8d]]  ;;  %v3155_v11 = vmul.f32 0.0, %v5777_v37 }
 0xe6c   :  { %v5808_v17 = vpop.permute.xlu0 %2819  ;;  %v3178_v48 = vmul.f32 %v3177_v35, %v3153_v53  ;;  %v3179_v58 = vmul.f32 %v3177_v35, %v3154_v6  ;;  %v3197_v14 = vstv %s3448_s14 }
 0xe6d   :  { %v2818_v21 = vpop.permute.xlu1 %2817  ;;  %v3180_v7 = vmul.f32 %v3177_v35, %v3155_v11  ;;  %v3198_v37 = vmul.f32 %v3197_v14, %v3153_v53  ;;  %v3199_v18 = vmul.f32 %v3197_v14, %v3154_v6 }
 0xe6e   :  { %v2823_v41 = vsel %vm376_vm4, %v2818_v21, %v5808_v17  ;;  %2974 = vrot.lane.b32.xlu0 %v2968_v40, %s3490_s5  ;;  %v3217_v40 = vstv %s3449_s16 }
 0xe6f   :  { %v5814_v33 = vadd.f32 %v2823_v41, %v5695_v45  ;;  %2976 = vrot.lane.b32.xlu1 %v2969_v24, %s3490_s5  ;;  %v3009_v45 = vmul.f32 %v3007_v43, %v2964_v5  ;;  %v3200_v24 = vmul.f32 %v3197_v14, %v3155_v11  ;;  %v3219_v21 = vmul.f32 %v3217_v40, %v3154_v6 }
 0xe70   :  { %v3220_v41 = vmul.f32 %v3217_v40, %v3155_v11 }
 0xe71   :  { %v3027_v34 = vstv %s3437_s10 }
 0xe72   :  { %2978 = vrot.lane.b32.xlu0 %v2970_v62, %s3490_s5  ;;  %v3028_v52 = vmul.f32 %v3027_v34, %v2963_v9  ;;  %v3029_v10 = vmul.f32 %v3027_v34, %v2964_v5  ;;  %v3030_v31 = vmul.f32 %v3027_v34, %v2965_v22  ;;  %v3125_v9 = vmul.f32 %v3122_v1, %v3060_v46  ;;  %v2822_v62 = vpop.permute.xlu1 %2821 }
 0xe73   :  { %2994 = vrot.lane.b32.xlu1 %v2988_v19, %s3490_s5  ;;  %v3218_v22 = vmul.f32 %v3217_v40, %v3153_v53  ;;  %v2824_v57 = vsel %vm376_vm4, %v5808_v17, %v2822_v62 }
 0xe76   :  { %2996 = vrot.lane.b32.xlu0 %v2989_v42, %s3490_s5 }
 0xe77   :  { %2998 = vrot.lane.b32.xlu1 %v2990_v55, %s3490_s5 }
 0xe7a   :  { %3014 = vrot.lane.b32.xlu0 %v3008_v29, %s3490_s5 }
 0xe7b   :  { %3016 = vrot.lane.b32.xlu1 %v3009_v45, %s3490_s5  ;;  %v2836_v45 = vstv %s3423_s17 }
 0xe7c   :  { %v2837_v28 = vmul.f32 %v5712_v50, %v2836_v45 }
 0xe7e   :  { %3018 = vrot.lane.b32.xlu0 %v3010_v0, %s3490_s5 }
 0xe7f   :  { %3034 = vrot.lane.b32.xlu1 %v3028_v52, %s3490_s5 }
 0xe82   :  { %3036 = vrot.lane.b32.xlu0 %v3029_v10, %s3490_s5  ;;  %v2838_v10 = vmul.f32 %v5706_v3, %v2836_v45 }
 0xe83   :  { %3038 = vrot.lane.b32.xlu1 %v3030_v31, %s3490_s5  ;;  %s3446_s5 = sld [smem:[#allocation3 + $0x23]] }
 0xe86   :  { %3069 = vrot.lane.b32.xlu0 %v3063_v12, %s3489_s26  ;;  %v2842_v12 = vstv %s3424_s18 }
 0xe87   :  { %3071 = vrot.lane.b32.xlu1 %v3064_v44, %s3489_s26  ;;  %v2839_v44 = vadd.f32 %v2837_v28, %v5786_v27 }
 0xe89   :  { %v3157_v26 = vstv %s3446_s5 }
 0xe8a   :  { %3073 = vrot.lane.b32.xlu0 %v3065_v61, %s3489_s26  ;;  %v3158_v60 = vmul.f32 %v3157_v26, %v3153_v53  ;;  %v3159_v5 = vmul.f32 %v3157_v26, %v3154_v6  ;;  %v3160_v38 = vmul.f32 %v3157_v26, %v3155_v11  ;;  %v2840_v61 = vadd.f32 %v2838_v10, %v5795_v16 }
 0xe8b   :  { %3089 = vrot.lane.b32.xlu1 %v3083_v51, %s3489_s26  ;;  %v2828_v26 = vadd.f32 %v2824_v57, %v5699_v39 }
 0xe8e   :  { %3091 = vrot.lane.b32.xlu0 %v3084_v2, %s3489_s26 }
 0xe8f   :  { %3093 = vrot.lane.b32.xlu1 %v3085_v8, %s3489_s26 }
 0xe92   :  { %3109 = vrot.lane.b32.xlu0 %v3103_v13, %s3489_s26  ;;  %v2844_v13 = vmul.f32 %v5706_v3, %v2842_v12 }
 0xe93   :  { %3111 = vrot.lane.b32.xlu1 %v3104_v54, %s3489_s26 }
 0xe94   :  { %v2846_v53 = vadd.f32 %v2844_v13, %v5805_v4 }
 0xe96   :  { %3113 = vrot.lane.b32.xlu0 %v3105_v56, %s3489_s26 }
 0xe97   :  { %3129 = vrot.lane.b32.xlu1 %v3123_v32, %s3489_s26 }
 0xe9a   :  { %3131 = vrot.lane.b32.xlu0 %v3124_v47, %s3489_s26 }
 0xe9b   :  { %3133 = vrot.lane.b32.xlu1 %v3125_v9, %s3489_s26  ;;  %s3422_s26 = sld [smem:[#allocation3 + $0x1f]] }
 0xe9e   :  { %3164 = vrot.lane.b32.xlu0 %v3158_v60, %s3488_s22 }
 0xe9f   :  { %3166 = vrot.lane.b32.xlu1 %v3159_v5, %s3488_s22 }
 0xea1   :  { %v2830_v25 = vstv %s3422_s26 }
 0xea2   :  { %3168 = vrot.lane.b32.xlu0 %v3160_v38, %s3488_s22  ;;  %v2831_v19 = vmul.f32 %v5712_v50, %v2830_v25  ;;  %v2832_v55 = vmul.f32 %v5706_v3, %v2830_v25 }
 0xea3   :  { %3184 = vrot.lane.b32.xlu1 %v3178_v48, %s3488_s22 }
 0xea4   :  { %v2833_v29 = vadd.f32 %v2831_v19, %v5761_v59  ;;  %v2834_v52 = vadd.f32 %v2832_v55, %v5764_v23  ;;  %v2843_v23 = vmul.f32 %v5712_v50, %v2842_v12 }
 0xea6   :  { %3186 = vrot.lane.b32.xlu0 %v3179_v58, %s3488_s22  ;;  %v2845_v1 = vadd.f32 %v2843_v23, %v5802_v36 }
 0xea7   :  { %3188 = vrot.lane.b32.xlu1 %v3180_v7, %s3488_s22 }
 0xeaa   :  { %3204 = vrot.lane.b32.xlu0 %v3198_v37, %s3488_s22 }
 0xeab   :  { %3206 = vrot.lane.b32.xlu1 %v3199_v18, %s3488_s22 }
 0xeae   :  { %3208 = vrot.lane.b32.xlu0 %v3200_v24, %s3488_s22 }
 0xeaf   :  { %3224 = vrot.lane.b32.xlu1 %v3218_v22, %s3488_s22 }
 0xeb2   :  { %3226 = vrot.lane.b32.xlu0 %v3219_v21, %s3488_s22 }
 0xeb3   :  { %3228 = vrot.lane.b32.xlu1 %v3220_v41, %s3488_s22  ;;  %s3425_s22 = sld [smem:[#allocation3 + $0x8b]] }
 0xeb9   :  { %v2848_v27 = vstv %s3425_s22 }
 0xeba   :  { %v2849_v6 = vmul.f32 %v5712_v50, %v2848_v27  ;;  %v2850_v36 = vmul.f32 %v5706_v3, %v2848_v27 }
 0xebc   :  { %v2851_v17 = vadd.f32 %v2849_v6, %v5814_v33  ;;  %v2852_v38 = vadd.f32 %v2850_v36, %v2828_v26 }
 0xec8   :  { %v2880_v42 = vpop.permute.xlu0 %2879 }
 0xec9   :  { %v2882_v43 = vpop.permute.xlu1 %2881 }
 0xeca   :  { %v2885_v34 = vsel %vm354_vm3, %v2880_v42, %v2882_v43 }
 0xecb   :  { %v5869_v63 = vadd.f32 %v2885_v34, %v2833_v29 }
 0xecc   :  { %v2884_v0 = vpop.permute.xlu0 %2883 }
 0xecd   :  { %v2886_v20 = vsel %vm354_vm3, %v2882_v43, %v2884_v0  ;;  %v2900_v30 = vpop.permute.xlu1 %2899 }
 0xece   :  { %v5875_v31 = vadd.f32 %v2886_v20, %v2834_v52 }
 0xed0   :  { %v2902_v59 = vpop.permute.xlu0 %2901 }
 0xed1   :  { %v2905_v46 = vsel %vm354_vm3, %v2900_v30, %v2902_v59  ;;  %v2904_v15 = vpop.permute.xlu1 %2903 }
 0xed2   :  { %v5881_v51 = vadd.f32 %v2905_v46, %v2839_v44  ;;  %v2906_v2 = vsel %vm354_vm3, %v2902_v59, %v2904_v15 }
 0xed3   :  { %v5884_v8 = vadd.f32 %v2906_v2, %v2840_v61 }
 0xed4   :  { %v2920_v49 = vpop.permute.xlu0 %2919 }
 0xed5   :  { %v2922_v54 = vpop.permute.xlu1 %2921 }
 0xed6   :  { %v2925_v16 = vsel %vm354_vm3, %v2920_v49, %v2922_v54 }
 0xed7   :  { %v5891_v56 = vadd.f32 %v2925_v16, %v2845_v1 }
 0xed8   :  { %v2924_v32 = vpop.permute.xlu0 %2923 }
 0xed9   :  { %v2926_v47 = vsel %vm354_vm3, %v2922_v54, %v2924_v32  ;;  %v2940_v9 = vpop.permute.xlu1 %2939 }
 0xeda   :  { %v5898_v60 = vadd.f32 %v2926_v47, %v2846_v53 }
 0xedc   :  { %v2942_v5 = vpop.permute.xlu0 %2941 }
 0xedd   :  { %v2945_v11 = vsel %vm354_vm3, %v2940_v9, %v2942_v5  ;;  %v2944_v35 = vpop.permute.xlu1 %2943 }
 0xede   :  { %v5902_v48 = vadd.f32 %v2945_v11, %v2851_v17  ;;  %v2946_v50 = vsel %vm354_vm3, %v2942_v5, %v2944_v35 }
 0xedf   :  { %v5905_v4 = vadd.f32 %v2946_v50, %v2852_v38 }
 0xee0   :  { %v2975_v39 = vpop.permute.xlu0 %2974 }
 0xee1   :  { %v2977_v58 = vpop.permute.xlu1 %2976 }
 0xee2   :  { %v2980_v0 = vsel %vm256_vm2, %v2975_v39, %v2977_v58 }
 0xee3   :  { %v2984_v30 = vadd.f32 %v2980_v0, %v5869_v63 }
 0xee4   :  { %v2979_v7 = vpop.permute.xlu0 %2978 }
 0xee5   :  { %v2995_v14 = vpop.permute.xlu1 %2994  ;;  %v2981_v10 = vsel %vm256_vm2, %v2977_v58, %v2979_v7 }
 0xee6   :  { %v2985_v15 = vadd.f32 %v2981_v10, %v5875_v31 }
 0xee8   :  { %v2997_v3 = vpop.permute.xlu0 %2996 }
 0xee9   :  { %v2999_v37 = vpop.permute.xlu1 %2998  ;;  %v3000_v23 = vsel %vm256_vm2, %v2995_v14, %v2997_v3 }
 0xeea   :  { %v3001_v49 = vsel %vm256_vm2, %v2997_v3, %v2999_v37  ;;  %v3004_v31 = vadd.f32 %v3000_v23, %v5881_v51 }
 0xeeb   :  { %v3005_v32 = vadd.f32 %v3001_v49, %v5884_v8 }
 0xeec   :  { %v3015_v18 = vpop.permute.xlu0 %3014 }
 0xeed   :  { %v3017_v40 = vpop.permute.xlu1 %3016 }
 0xeee   :  { %v3020_v53 = vsel %vm256_vm2, %v3015_v18, %v3017_v40 }
 0xeef   :  { %v3024_v11 = vadd.f32 %v3020_v53, %v5891_v56 }
 0xef0   :  { %v3019_v24 = vpop.permute.xlu0 %3018 }
 0xef1   :  { %v3035_v33 = vpop.permute.xlu1 %3034  ;;  %v3021_v8 = vsel %vm256_vm2, %v3017_v40, %v3019_v24 }
 0xef2   :  { %v3025_v7 = vadd.f32 %v3021_v8, %v5898_v60 }
 0xef4   :  { %v3037_v22 = vpop.permute.xlu0 %3036 }
 0xef5   :  { %v3039_v21 = vpop.permute.xlu1 %3038  ;;  %v3040_v14 = vsel %vm256_vm2, %v3035_v33, %v3037_v22 }
 0xef6   :  { %v3041_v37 = vsel %vm256_vm2, %v3037_v22, %v3039_v21  ;;  %v3044_v60 = vadd.f32 %v3040_v14, %v5902_v48 }
 0xef7   :  { %v3045_v33 = vadd.f32 %v3041_v37, %v5905_v4 }
 0xef8   :  { %v3070_v41 = vpop.permute.xlu0 %3069 }
 0xef9   :  { %v3072_v25 = vpop.permute.xlu1 %3071 }
 0xefa   :  { %v3075_v20 = vsel %vm158_vm1, %v3070_v41, %v3072_v25 }
 0xefb   :  { %v3079_v59 = vadd.f32 %v3075_v20, %v2984_v30 }
 0xefc   :  { %v3074_v62 = vpop.permute.xlu0 %3073 }
 0xefd   :  { %v3090_v19 = vpop.permute.xlu1 %3089  ;;  %v3076_v44 = vsel %vm158_vm1, %v3072_v25, %v3074_v62 }
 0xefe   :  { %v3080_v13 = vadd.f32 %v3076_v44, %v2985_v15 }
 0xf00   :  { %v3092_v42 = vpop.permute.xlu0 %3091 }
 0xf01   :  { %v3094_v55 = vpop.permute.xlu1 %3093  ;;  %v3095_v63 = vsel %vm158_vm1, %v3090_v19, %v3092_v42 }
 0xf02   :  { %v3096_v57 = vsel %vm158_vm1, %v3092_v42, %v3094_v55  ;;  %v3099_v6 = vadd.f32 %v3095_v63, %v3004_v31 }
 0xf03   :  { %v3100_v47 = vadd.f32 %v3096_v57, %v3005_v32 }
 0xf04   :  { %v3110_v43 = vpop.permute.xlu0 %3109 }
 0xf05   :  { %v3112_v29 = vpop.permute.xlu1 %3111 }
 0xf06   :  { %v3115_v5 = vsel %vm158_vm1, %v3110_v43, %v3112_v29 }
 0xf07   :  { %v3119_v50 = vadd.f32 %v3115_v5, %v3024_v11 }
 0xf08   :  { %v3114_v45 = vpop.permute.xlu0 %3113 }
 0xf09   :  { %v3130_v34 = vpop.permute.xlu1 %3129  ;;  %v3116_v39 = vsel %vm158_vm1, %v3112_v29, %v3114_v45 }
 0xf0a   :  { %v3120_v18 = vadd.f32 %v3116_v39, %v3025_v7 }
 0xf0c   :  { %v3132_v52 = vpop.permute.xlu0 %3131 }
 0xf0d   :  { %v3134_v28 = vpop.permute.xlu1 %3133  ;;  %v3135_v24 = vsel %vm158_vm1, %v3130_v34, %v3132_v52 }
 0xf0e   :  { %v3136_v62 = vsel %vm158_vm1, %v3132_v52, %v3134_v28  ;;  %v3139_v42 = vadd.f32 %v3135_v24, %v3044_v60 }
 0xf0f   :  { %v3140_v21 = vadd.f32 %v3136_v62, %v3045_v33 }
 0xf10   :  { %v3165_v12 = vpop.permute.xlu0 %3164 }
 0xf11   :  { %v3167_v46 = vpop.permute.xlu1 %3166 }
 0xf12   :  { %v3170_v61 = vsel %vm60_vm0, %v3165_v12, %v3167_v46 }
 0xf13   :  { %v3174_v2 = vadd.f32 %v3170_v61, %v3079_v59 }
 0xf14   :  { %v3169_v54 = vpop.permute.xlu0 %3168 }
 0xf15   :  { %3238 = vst [vmem:[%s5967_s4] sm:$0xff] %v3174_v2  ;;  %v3171_v1 = vsel %vm60_vm0, %v3167_v46, %v3169_v54  ;;  %v3185_v27 = vpop.permute.xlu1 %3184 }
 0xf16   :  { %v3175_v16 = vadd.f32 %v3171_v1, %v3080_v13 }
 0xf18   :  { %3239 = vst [vmem:[%s5967_s4 + $0x8] sm:$0xff] %v3175_v16  ;;  %v3187_v26 = vpop.permute.xlu0 %3186 }
 0xf19   :  { %v3190_v9 = vsel %vm60_vm0, %v3185_v27, %v3187_v26  ;;  %v3189_v36 = vpop.permute.xlu1 %3188 }
 0xf1a   :  { %v3194_v51 = vadd.f32 %v3190_v9, %v3099_v6  ;;  %v3191_v17 = vsel %vm60_vm0, %v3187_v26, %v3189_v36 }
 0xf1b   :  { %v3195_v35 = vadd.f32 %v3191_v17, %v3100_v47 }
 0xf1c   :  { %3240 = vst [vmem:[%s5967_s4 + $0x10] sm:$0xff] %v3194_v51  ;;  %v3205_v38 = vpop.permute.xlu0 %3204 }
 0xf1d   :  { %3241 = vst [vmem:[%s5967_s4 + $0x18] sm:$0xff] %v3195_v35  ;;  %v3207_v58 = vpop.permute.xlu1 %3206 }
 0xf1e   :  { %v3210_v56 = vsel %vm60_vm0, %v3205_v38, %v3207_v58 }
 0xf1f   :  { %v3214_v3 = vadd.f32 %v3210_v56, %v3119_v50 }
 0xf20   :  { %v3209_v40 = vpop.permute.xlu0 %3208 }
 0xf21   :  { %3242 = vst [vmem:[%s5967_s4 + $0x20] sm:$0xff] %v3214_v3  ;;  %v3211_v41 = vsel %vm60_vm0, %v3207_v58, %v3209_v40  ;;  %v3225_v25 = vpop.permute.xlu1 %3224 }
 0xf22   :  { %v3215_v19 = vadd.f32 %v3211_v41, %v3120_v18 }
 0xf24   :  { %3243 = vst [vmem:[%s5967_s4 + $0x28] sm:$0xff] %v3215_v19  ;;  %v3227_v22 = vpop.permute.xlu0 %3226 }
 0xf25   :  { %v3230_v55 = vsel %vm60_vm0, %v3225_v25, %v3227_v22  ;;  %v3229_v43 = vpop.permute.xlu1 %3228 }
 0xf26   :  { %v3234_v29 = vadd.f32 %v3230_v55, %v3139_v42  ;;  %v3231_v45 = vsel %vm60_vm0, %v3227_v22, %v3229_v43 }
 0xf27   :  { %v3235_v34 = vadd.f32 %v3231_v45, %v3140_v21 }
 0xf28   :  { %3244 = vst [vmem:[%s5967_s4 + $0x30] sm:$0xff] %v3234_v29 }
 0xf29   :  { %3245 = vst [vmem:[%s5967_s4 + $0x38] sm:$0xff] %v3235_v34 }
 0xf2a   :  { %3250 = vsyncpa [#allocation4], 1 }

</bundles_post_ra>
